<compile_context>
chip_gen: v6e
topology: v6e:2x2x1
jax: 0.10.0
libtpu: 0.0.40
codegen_flags: <defaults>
</compile_context>

<pallas_src>
import jax
import jax.numpy as jnp
from jax import lax
from jax.experimental import pallas as pl
from jax.experimental.pallas import tpu as pltpu

LANE = 128
SUBPAD = 8  # sublane padding at top/bottom of the h scratch so corner-tap
            # slices never start below 0 / end past the allocation.


def _round_up(x, m):
    return (x + m - 1) // m * m


def _make_kernel(H, W, TH, Cin_p, Cmid_p, Cout_p):
    HALO = (TH + 2) * W     # tile rows + one halo row above and below (flattened)
    TWH = TH * W            # flattened output tile

    def kernel(x_main_ref, x_top_ref, x_bot_ref, w1_ref, b1_ref, w3_ref, b2_ref,
               out_ref, xext_ref, h_ref, h9_ref):
        t = pl.program_id(1)
        nt = pl.num_programs(1)

        # ---- assemble [top halo row | TH rows | bottom halo row] of x (bf16) ----
        xext_ref[0:W, :] = x_top_ref[0].astype(jnp.bfloat16)
        xext_ref[W:W + TWH, :] = x_main_ref[0].astype(jnp.bfloat16)
        xext_ref[W + TWH:HALO, :] = x_bot_ref[0].astype(jnp.bfloat16)

        # ---- conv1x1 (BN scale folded into w1) + bias + LeakyReLU(0.1) ----
        h = jnp.dot(xext_ref[...], w1_ref[...], preferred_element_type=jnp.float32)
        h = h + b1_ref[...]
        h = jnp.where(h > 0, h, 0.1 * h)
        h_ref[SUBPAD:SUBPAD + HALO, :] = h

        # Zero-padding for the 3x3 conv applies to h: halo rows outside the image
        # must contribute zero (note conv1(0) != 0 because of the folded BN bias).
        @pl.when(t == 0)
        def _():
            h_ref[SUBPAD:SUBPAD + W, :] = jnp.zeros((W, Cmid_p), jnp.float32)

        @pl.when(t == nt - 1)
        def _():
            h_ref[SUBPAD + (TH + 1) * W:SUBPAD + HALO, :] = jnp.zeros(
                (W, Cmid_p), jnp.float32)

        # ---- im2col: 9 shifted static slices of h + column-boundary mask ----
        col = lax.broadcasted_iota(jnp.int32, (TWH, 1), 0) % W
        for k in range(9):
            dh, dw = k // 3 - 1, k % 3 - 1
            start = SUBPAD + (1 + dh) * W + dw
            tap = h_ref[start:start + TWH, :]
            if dw != 0:
                ok = (col + dw >= 0) & (col + dw < W)
                tap = jnp.where(ok, tap, 0.0)
            h9_ref[:, k * Cmid_p:(k + 1) * Cmid_p] = tap.astype(jnp.bfloat16)

        # ---- fused 3x3 conv: one (TWH, 9*Cmid) x (9*Cmid, Cout) matmul ----
        acc = jnp.dot(h9_ref[...], w3_ref[...], preferred_element_type=jnp.float32)
        acc = acc + b2_ref[...]
        acc = jnp.where(acc > 0, acc, 0.1 * acc)

        # ---- residual add (f32) ----
        out_ref[0] = (acc + x_main_ref[0]).astype(out_ref.dtype)

    return kernel


def darknet_basic_block_v3(x_nchw, p):
    """x_nchw: (N, Cin, H, W) float32 -> (N, Cin, H, W) float32."""
    N, Cin, H, W = x_nchw.shape
    Cout = p["Cout"]
    assert Cout == Cin, "residual add requires planes*2 == inplanes"
    Cin_p, Cmid_p = p["w1"].shape
    Cout_p = p["w3"].shape[1]
    assert Cin_p == Cout_p

    # TODO(synk): generalize row-tiling to H not divisible by 8 / W not divisible
    # by 8 (pl.BoundedSlice or row padding); fine for typical Darknet maps.
    assert W % 8 == 0
    TH = 8 if H % 8 == 0 else H          # rows per spatial tile
    nT = H // TH
    HW = H * W

    x_nhwc = jnp.transpose(x_nchw, (0, 2, 3, 1)).reshape(N, HW, Cin)
    x_flat = jnp.zeros((N, HW, Cin_p), x_nchw.dtype).at[:, :, :Cin].set(x_nhwc)

    grid_spec = pltpu.PrefetchScalarGridSpec(
        num_scalar_prefetch=0,
        grid=(N, nT),
        in_specs=[
            # main tile (TH rows)
            pl.BlockSpec((1, TH * W, Cin_p), lambda n, t: (n, t, 0)),
            # top halo row (row t*TH - 1; clamped and zero-masked in-kernel at t==0)
            pl.BlockSpec((1, W, Cin_p),
                         lambda n, t: (n, jnp.maximum(t * TH - 1, 0), 0)),
            # bottom halo row (row (t+1)*TH; clamped and zero-masked at t==nT-1)
            pl.BlockSpec((1, W, Cin_p),
                         lambda n, t: (n, jnp.minimum((t + 1) * TH, H - 1), 0)),
            # weights / biases: constant index maps -> stay VMEM-resident
            pl.BlockSpec((Cin_p, Cmid_p), lambda n, t: (0, 0)),
            pl.BlockSpec((1, Cmid_p), lambda n, t: (0, 0)),
            pl.BlockSpec((9 * Cmid_p, Cout_p), lambda n, t: (0, 0)),
            pl.BlockSpec((1, Cout_p), lambda n, t: (0, 0)),
        ],
        out_specs=pl.BlockSpec((1, TH * W, Cout_p), lambda n, t: (n, t, 0)),
        scratch_shapes=[
            pltpu.VMEM(((TH + 2) * W, Cin_p), jnp.bfloat16),            # x + halo
            pltpu.VMEM(((TH + 2) * W + 2 * SUBPAD, Cmid_p), jnp.float32),  # h + halo
            pltpu.VMEM((TH * W, 9 * Cmid_p), jnp.bfloat16),             # im2col h9
        ],
    )

    out_flat = pl.pallas_call(
        _make_kernel(H, W, TH, Cin_p, Cmid_p, Cout_p),
        out_shape=jax.ShapeDtypeStruct((N, HW, Cout_p), x_nchw.dtype),
        grid_spec=grid_spec,
        compiler_params=pltpu.CompilerParams(
            dimension_semantics=("parallel", "parallel"),
            vmem_limit_bytes=32 * 1024 * 1024,
        ),
    )(x_flat, x_flat, x_flat, p["w1"], p["b1"], p["w3"], p["b2"])

    out = out_flat[:, :, :Cout].reshape(N, H, W, Cout)
    return jnp.transpose(out, (0, 3, 1, 2))


# -------------------- parameter setup / folding (wrapper-side glue) --------------------

def init_raw_params(key, inplanes, planes):
    Cin, Cmid, Cout = inplanes, planes, planes * 2
    ks = jax.random.split(key, 10)
    return dict(
        w1=0.3 * jax.random.normal(ks[0], (Cmid, Cin, 1, 1), jnp.float32),   # OIHW
        w3=0.3 * jax.random.normal(ks[1], (Cout, Cmid, 3, 3), jnp.float32),  # OIHW
        g1=1.0 + 0.1 * jax.random.normal(ks[2], (Cmid,), jnp.float32),
        be1=0.1 * jax.random.normal(ks[3], (Cmid,), jnp.float32),
        m1=0.1 * jax.random.normal(ks[4], (Cmid,), jnp.float32),
        v1=1.0 + 0.1 * jnp.abs(jax.random.normal(ks[5], (Cmid,), jnp.float32)),
        g2=1.0 + 0.1 * jax.random.normal(ks[6], (Cout,), jnp.float32),
        be2=0.1 * jax.random.normal(ks[7], (Cout,), jnp.float32),
        m2=0.1 * jax.random.normal(ks[8], (Cout,), jnp.float32),
        v2=1.0 + 0.1 * jnp.abs(jax.random.normal(ks[9], (Cout,), jnp.float32)),
    )


def prepare_params(raw, eps=1e-5):
    """Fold BN scale into conv weights, pad channels to 128 lanes, cast weights to bf16."""
    Cmid, Cin = raw["w1"].shape[:2]
    Cout = raw["w3"].shape[0]
    s1 = raw["g1"] / jnp.sqrt(raw["v1"] + eps)
    b1 = raw["be1"] - raw["m1"] * s1
    s2 = raw["g2"] / jnp.sqrt(raw["v2"] + eps)
    b2 = raw["be2"] - raw["m2"] * s2

    w1f = (raw["w1"][:, :, 0, 0] * s1[:, None]).T            # (Cin, Cmid), scale folded
    w3f = jnp.transpose(raw["w3"], (2, 3, 1, 0)) * s2[None, None, None, :]  # (3,3,Cmid,Cout)

    Cin_p, Cmid_p, Cout_p = (_round_up(c, LANE) for c in (Cin, Cmid, Cout))
    w1p = jnp.zeros((Cin_p, Cmid_p), jnp.float32).at[:Cin, :Cmid].set(w1f)
    w3p = jnp.zeros((3, 3, Cmid_p, Cout_p), jnp.float32).at[:, :, :Cmid, :Cout].set(w3f)
    return dict(
        w1=w1p.astype(jnp.bfloat16),
        b1=jnp.zeros((1, Cmid_p), jnp.float32).at[0, :Cmid].set(b1),
        w3=w3p.reshape(9 * Cmid_p, Cout_p).astype(jnp.bfloat16),
        b2=jnp.zeros((1, Cout_p), jnp.float32).at[0, :Cout].set(b2),
        Cout=Cout,
    )


# -------------------- pure-JAX reference for verification --------------------

def ref_forward(x, raw, eps=1e-5):
    def conv_bn_lrelu(x, w, g, b, m, v, pad):
        y = lax.conv_general_dilated(
            x, w, window_strides=(1, 1), padding=[(pad, pad), (pad, pad)],
            dimension_numbers=("NCHW", "OIHW", "NCHW"),
            precision=lax.Precision.HIGHEST)
        scale = g / jnp.sqrt(v + eps)
        bias = b - m * scale
        y = y * scale[None, :, None, None] + bias[None, :, None, None]
        return jnp.where(y > 0, y, 0.1 * y)

    h = conv_bn_lrelu(x, raw["w1"], raw["g1"], raw["be1"], raw["m1"], raw["v1"], 0)
    h = conv_bn_lrelu(h, raw["w3"], raw["g2"], raw["be2"], raw["m2"], raw["v2"], 1)
    return h + x


if __name__ == "__main__":
    N, inplanes, H, W = 2, 4, 16, 16
    planes = inplanes // 2          # residual requires planes*2 == inplanes

    key = jax.random.PRNGKey(0)
    kx, kp = jax.random.split(key)
    x = jax.random.normal(kx, (N, inplanes, H, W), jnp.float32)

    raw = init_raw_params(kp, inplanes, planes)
    params = prepare_params(raw)

    out = darknet_basic_block_v3(x, params)
    out = jax.block_until_ready(out)

    ref = ref_forward(x, raw)
    err = float(jnp.max(jnp.abs(out - ref)))
    # bf16 MXU inputs with f32 accumulation: tolerance relaxed vs pure-f32 ref.
    assert out.shape == x.shape and err < 5e-2, f"max abs error too large: {err}"
    print("KERNEL_OK")
</pallas_src>

<mosaic_0001>
module attributes {stable_mosaic.version = 11 : i64} {
  func.func @kernel(%arg0: i32, %arg1: i32, %arg2: memref<1x128x128xf32, #tpu.memory_space<vmem>>, %arg3: memref<1x16x128xf32, #tpu.memory_space<vmem>>, %arg4: memref<1x16x128xf32, #tpu.memory_space<vmem>>, %arg5: memref<128x128xbf16, #tpu.memory_space<vmem>>, %arg6: memref<1x128xf32, #tpu.memory_space<vmem>>, %arg7: memref<1152x128xbf16, #tpu.memory_space<vmem>>, %arg8: memref<1x128xf32, #tpu.memory_space<vmem>>, %arg9: memref<1x128x128xf32, #tpu.memory_space<vmem>>, %arg10: memref<160x128xbf16, #tpu.memory_space<vmem>>, %arg11: memref<176x128xf32, #tpu.memory_space<vmem>>, %arg12: memref<128x1152xbf16, #tpu.memory_space<vmem>>) attributes {dimension_semantics = [#tpu.dimension_semantics<parallel>, #tpu.dimension_semantics<parallel>], iteration_bounds = array<i64: 2, 2>, scalar_prefetch = 0 : i64, scratch_operands = 3 : i64, tpu.core_type = #tpu.core_type<tc>, window_params = [{transform_indices = @transform_0, window_bounds = array<i64: 1, 128, 128>}, {transform_indices = @transform_1, window_bounds = array<i64: 1, 16, 128>}, {transform_indices = @transform_2, window_bounds = array<i64: 1, 16, 128>}, {pipeline_mode = #tpu.pipeline_mode<synchronous>, transform_indices = @transform_3, window_bounds = array<i64: 128, 128>}, {pipeline_mode = #tpu.pipeline_mode<synchronous>, transform_indices = @transform_4, window_bounds = array<i64: 1, 128>}, {pipeline_mode = #tpu.pipeline_mode<synchronous>, transform_indices = @transform_5, window_bounds = array<i64: 1152, 128>}, {pipeline_mode = #tpu.pipeline_mode<synchronous>, transform_indices = @transform_6, window_bounds = array<i64: 1, 128>}, {transform_indices = @transform_7, window_bounds = array<i64: 1, 128, 128>}]} {
    %c0 = arith.constant 0 : index
    %c0_0 = arith.constant 0 : index
    %c0_1 = arith.constant 0 : index
    %0 = vector.load %arg3[%c0, %c0_0, %c0_1] : memref<1x16x128xf32, #tpu.memory_space<vmem>>, vector<1x16x128xf32>
    %1 = vector.shape_cast %0 : vector<1x16x128xf32> to vector<16x128xf32>
    %2 = arith.truncf %1 : vector<16x128xf32> to vector<16x128xbf16>
    %c0_2 = arith.constant 0 : index
    %c0_3 = arith.constant 0 : index
    %3 = vector.load %arg10[%c0_2, %c0_3] : memref<160x128xbf16, #tpu.memory_space<vmem>>, vector<16x128xbf16>
    tpu.vector_store %arg10[%c0_2, %c0_3], %2 {strides = array<i32>} : memref<160x128xbf16, #tpu.memory_space<vmem>>, vector<16x128xbf16>,
    %c0_4 = arith.constant 0 : index
    %c0_5 = arith.constant 0 : index
    %c0_6 = arith.constant 0 : index
    %4 = vector.load %arg2[%c0_4, %c0_5, %c0_6] : memref<1x128x128xf32, #tpu.memory_space<vmem>>, vector<1x128x128xf32>
    %5 = vector.shape_cast %4 : vector<1x128x128xf32> to vector<128x128xf32>
    %6 = arith.truncf %5 : vector<128x128xf32> to vector<128x128xbf16>
    %c16 = arith.constant 16 : index
    %c0_7 = arith.constant 0 : index
    %7 = vector.load %arg10[%c16, %c0_7] : memref<160x128xbf16, #tpu.memory_space<vmem>>, vector<128x128xbf16>
    tpu.vector_store %arg10[%c16, %c0_7], %6 {strides = array<i32>} : memref<160x128xbf16, #tpu.memory_space<vmem>>, vector<128x128xbf16>,
    %c0_8 = arith.constant 0 : index
    %c0_9 = arith.constant 0 : index
    %c0_10 = arith.constant 0 : index
    %8 = vector.load %arg4[%c0_8, %c0_9, %c0_10] : memref<1x16x128xf32, #tpu.memory_space<vmem>>, vector<1x16x128xf32>
    %9 = vector.shape_cast %8 : vector<1x16x128xf32> to vector<16x128xf32>
    %10 = arith.truncf %9 : vector<16x128xf32> to vector<16x128xbf16>
    %c144 = arith.constant 144 : index
    %c0_11 = arith.constant 0 : index
    %11 = vector.load %arg10[%c144, %c0_11] : memref<160x128xbf16, #tpu.memory_space<vmem>>, vector<16x128xbf16>
    tpu.vector_store %arg10[%c144, %c0_11], %10 {strides = array<i32>} : memref<160x128xbf16, #tpu.memory_space<vmem>>, vector<16x128xbf16>,
    %c0_12 = arith.constant 0 : index
    %c0_13 = arith.constant 0 : index
    %12 = vector.load %arg10[%c0_12, %c0_13] : memref<160x128xbf16, #tpu.memory_space<vmem>>, vector<160x128xbf16>
    %c0_14 = arith.constant 0 : index
    %c0_15 = arith.constant 0 : index
    %13 = vector.load %arg5[%c0_14, %c0_15] : memref<128x128xbf16, #tpu.memory_space<vmem>>, vector<128x128xbf16>
    %cst = arith.constant dense<0.000000e+00> : vector<160x128xf32>
    %14 = tpu.matmul %12, %13, %cst {dimension_numbers = #tpu.dot_dimension_numbers<[1], [0], [0], [1], [0, 0, 1, 1], [], []>} : vector<160x128xbf16>, vector<128x128xbf16>, vector<160x128xf32> -> vector<160x128xf32>
    %c0_16 = arith.constant 0 : index
    %c0_17 = arith.constant 0 : index
    %15 = vector.load %arg6[%c0_16, %c0_17] : memref<1x128xf32, #tpu.memory_space<vmem>>, vector<1x128xf32>
    %16 = vector.broadcast %15 : vector<1x128xf32> to vector<160x128xf32>
    %17 = arith.addf %14, %16 : vector<160x128xf32>
    %cst_18 = arith.constant 0.000000e+00 : f32
    %18 = vector.broadcast %cst_18 : f32 to vector<160x128xf32>
    %19 = arith.cmpf ogt, %17, %18 : vector<160x128xf32>
    %cst_19 = arith.constant 1.000000e-01 : f32
    %20 = vector.broadcast %cst_19 : f32 to vector<160x128xf32>
    %21 = arith.mulf %20, %17 : vector<160x128xf32>
    %22 = arith.select %19, %17, %21 : vector<160x128xi1>, vector<160x128xf32>
    %c8 = arith.constant 8 : index
    %c0_20 = arith.constant 0 : index
    %23 = vector.load %arg11[%c8, %c0_20] : memref<176x128xf32, #tpu.memory_space<vmem>>, vector<160x128xf32>
    tpu.vector_store %arg11[%c8, %c0_20], %22 {strides = array<i32>} : memref<176x128xf32, #tpu.memory_space<vmem>>, vector<160x128xf32>,
    %c0_i32 = arith.constant 0 : i32
    %24 = arith.cmpi eq, %arg1, %c0_i32 : i32
    %25 = arith.extui %24 : i1 to i32
    %c0_i32_21 = arith.constant 0 : i32
    %26 = arith.cmpi ne, %25, %c0_i32_21 : i32
    scf.if %26 {
      %cst_92 = arith.constant 0.000000e+00 : f32
      %169 = vector.broadcast %cst_92 : f32 to vector<16x128xf32>
      %c8_93 = arith.constant 8 : index
      %c0_94 = arith.constant 0 : index
      %170 = vector.load %arg11[%c8_93, %c0_94] : memref<176x128xf32, #tpu.memory_space<vmem>>, vector<16x128xf32>
      tpu.vector_store %arg11[%c8_93, %c0_94], %169 {strides = array<i32>} : memref<176x128xf32, #tpu.memory_space<vmem>>, vector<16x128xf32>,
    } else {
    }
    %c1_i32 = arith.constant 1 : i32
    %27 = arith.cmpi eq, %arg1, %c1_i32 : i32
    %28 = arith.extui %27 : i1 to i32
    %c0_i32_22 = arith.constant 0 : i32
    %29 = arith.cmpi ne, %28, %c0_i32_22 : i32
    scf.if %29 {
      %cst_92 = arith.constant 0.000000e+00 : f32
      %169 = vector.broadcast %cst_92 : f32 to vector<16x128xf32>
      %c152 = arith.constant 152 : index
      %c0_93 = arith.constant 0 : index
      %170 = vector.load %arg11[%c152, %c0_93] : memref<176x128xf32, #tpu.memory_space<vmem>>, vector<16x128xf32>
      tpu.vector_store %arg11[%c152, %c0_93], %169 {strides = array<i32>} : memref<176x128xf32, #tpu.memory_space<vmem>>, vector<16x128xf32>,
    } else {
    }
    %30 = tpu.iota {dimensions = array<i32: 0>} : vector<128x1xi32>
    %c16_i32 = arith.constant 16 : i32
    %c0_i32_23 = arith.constant 0 : i32
    %31 = arith.cmpi eq, %c16_i32, %c0_i32_23 : i32
    %c1_i32_24 = arith.constant 1 : i32
    %32 = arith.select %31, %c1_i32_24, %c16_i32 : i32
    %33 = vector.broadcast %32 : i32 to vector<128x1xi32>
    %34 = arith.remsi %30, %33 : vector<128x1xi32>
    %c0_i32_25 = arith.constant 0 : i32
    %35 = vector.broadcast %c0_i32_25 : i32 to vector<128x1xi32>
    %36 = arith.cmpi ne, %34, %35 : vector<128x1xi32>
    %c0_i32_26 = arith.constant 0 : i32
    %37 = vector.broadcast %c0_i32_26 : i32 to vector<128x1xi32>
    %38 = arith.cmpi slt, %34, %37 : vector<128x1xi32>
    %c0_i32_27 = arith.constant 0 : i32
    %39 = arith.cmpi slt, %32, %c0_i32_27 : i32
    %40 = vector.broadcast %39 : i1 to vector<128x1xi1>
    %41 = vector.broadcast %40 : vector<128x1xi1> to vector<128x1xi1>
    %42 = arith.xori %38, %41 : vector<128x1xi1>
    %43 = arith.andi %42, %36 : vector<128x1xi1>
    %44 = vector.broadcast %32 : i32 to vector<128x1xi32>
    %45 = arith.addi %34, %44 : vector<128x1xi32>
    %46 = arith.select %43, %45, %34 : vector<128x1xi1>, vector<128x1xi32>
    %c7 = arith.constant 7 : index
    %c0_28 = arith.constant 0 : index
    %47 = vector.load %arg11[%c7, %c0_28] : memref<176x128xf32, #tpu.memory_space<vmem>>, vector<128x128xf32>
    %c-1_i32 = arith.constant -1 : i32
    %48 = vector.broadcast %c-1_i32 : i32 to vector<128x1xi32>
    %49 = arith.addi %46, %48 : vector<128x1xi32>
    %c0_i32_29 = arith.constant 0 : i32
    %50 = vector.broadcast %c0_i32_29 : i32 to vector<128x1xi32>
    %51 = arith.cmpi sge, %49, %50 : vector<128x1xi32>
    %c-1_i32_30 = arith.constant -1 : i32
    %52 = vector.broadcast %c-1_i32_30 : i32 to vector<128x1xi32>
    %53 = arith.addi %46, %52 : vector<128x1xi32>
    %c16_i32_31 = arith.constant 16 : i32
    %54 = vector.broadcast %c16_i32_31 : i32 to vector<128x1xi32>
    %55 = arith.cmpi slt, %53, %54 : vector<128x1xi32>
    %56 = arith.andi %51, %55 : vector<128x1xi1>
    %cst_32 = arith.constant 0.000000e+00 : f32
    %57 = vector.shape_cast %56 : vector<128x1xi1> to vector<128x1xi1>
    %58 = vector.broadcast %57 : vector<128x1xi1> to vector<128x128xi1>
    %59 = vector.broadcast %cst_32 : f32 to vector<128x128xf32>
    %60 = arith.select %58, %47, %59 : vector<128x128xi1>, vector<128x128xf32>
    %61 = arith.truncf %60 : vector<128x128xf32> to vector<128x128xbf16>
    %c0_33 = arith.constant 0 : index
    %c0_34 = arith.constant 0 : index
    %62 = vector.load %arg12[%c0_33, %c0_34] : memref<128x1152xbf16, #tpu.memory_space<vmem>>, vector<128x128xbf16>
    tpu.vector_store %arg12[%c0_33, %c0_34], %61 {strides = array<i32>} : memref<128x1152xbf16, #tpu.memory_space<vmem>>, vector<128x128xbf16>,
    %c8_35 = arith.constant 8 : index
    %c0_36 = arith.constant 0 : index
    %63 = vector.load %arg11[%c8_35, %c0_36] : memref<176x128xf32, #tpu.memory_space<vmem>>, vector<128x128xf32>
    %64 = arith.truncf %63 : vector<128x128xf32> to vector<128x128xbf16>
    %c0_37 = arith.constant 0 : index
    %c128 = arith.constant 128 : index
    %65 = vector.load %arg12[%c0_37, %c128] : memref<128x1152xbf16, #tpu.memory_space<vmem>>, vector<128x128xbf16>
    tpu.vector_store %arg12[%c0_37, %c128], %64 {strides = array<i32>} : memref<128x1152xbf16, #tpu.memory_space<vmem>>, vector<128x128xbf16>,
    %c9 = arith.constant 9 : index
    %c0_38 = arith.constant 0 : index
    %66 = vector.load %arg11[%c9, %c0_38] : memref<176x128xf32, #tpu.memory_space<vmem>>, vector<128x128xf32>
    %c1_i32_39 = arith.constant 1 : i32
    %67 = vector.broadcast %c1_i32_39 : i32 to vector<128x1xi32>
    %68 = arith.addi %46, %67 : vector<128x1xi32>
    %c0_i32_40 = arith.constant 0 : i32
    %69 = vector.broadcast %c0_i32_40 : i32 to vector<128x1xi32>
    %70 = arith.cmpi sge, %68, %69 : vector<128x1xi32>
    %c1_i32_41 = arith.constant 1 : i32
    %71 = vector.broadcast %c1_i32_41 : i32 to vector<128x1xi32>
    %72 = arith.addi %46, %71 : vector<128x1xi32>
    %c16_i32_42 = arith.constant 16 : i32
    %73 = vector.broadcast %c16_i32_42 : i32 to vector<128x1xi32>
    %74 = arith.cmpi slt, %72, %73 : vector<128x1xi32>
    %75 = arith.andi %70, %74 : vector<128x1xi1>
    %cst_43 = arith.constant 0.000000e+00 : f32
    %76 = vector.shape_cast %75 : vector<128x1xi1> to vector<128x1xi1>
    %77 = vector.broadcast %76 : vector<128x1xi1> to vector<128x128xi1>
    %78 = vector.broadcast %cst_43 : f32 to vector<128x128xf32>
    %79 = arith.select %77, %66, %78 : vector<128x128xi1>, vector<128x128xf32>
    %80 = arith.truncf %79 : vector<128x128xf32> to vector<128x128xbf16>
    %c0_44 = arith.constant 0 : index
    %c256 = arith.constant 256 : index
    %81 = vector.load %arg12[%c0_44, %c256] : memref<128x1152xbf16, #tpu.memory_space<vmem>>, vector<128x128xbf16>
    tpu.vector_store %arg12[%c0_44, %c256], %80 {strides = array<i32>} : memref<128x1152xbf16, #tpu.memory_space<vmem>>, vector<128x128xbf16>,
    %c23 = arith.constant 23 : index
    %c0_45 = arith.constant 0 : index
    %82 = vector.load %arg11[%c23, %c0_45] : memref<176x128xf32, #tpu.memory_space<vmem>>, vector<128x128xf32>
    %c-1_i32_46 = arith.constant -1 : i32
    %83 = vector.broadcast %c-1_i32_46 : i32 to vector<128x1xi32>
    %84 = arith.addi %46, %83 : vector<128x1xi32>
    %c0_i32_47 = arith.constant 0 : i32
    %85 = vector.broadcast %c0_i32_47 : i32 to vector<128x1xi32>
    %86 = arith.cmpi sge, %84, %85 : vector<128x1xi32>
    %c-1_i32_48 = arith.constant -1 : i32
    %87 = vector.broadcast %c-1_i32_48 : i32 to vector<128x1xi32>
    %88 = arith.addi %46, %87 : vector<128x1xi32>
    %c16_i32_49 = arith.constant 16 : i32
    %89 = vector.broadcast %c16_i32_49 : i32 to vector<128x1xi32>
    %90 = arith.cmpi slt, %88, %89 : vector<128x1xi32>
    %91 = arith.andi %86, %90 : vector<128x1xi1>
    %cst_50 = arith.constant 0.000000e+00 : f32
    %92 = vector.shape_cast %91 : vector<128x1xi1> to vector<128x1xi1>
    %93 = vector.broadcast %92 : vector<128x1xi1> to vector<128x128xi1>
    %94 = vector.broadcast %cst_50 : f32 to vector<128x128xf32>
    %95 = arith.select %93, %82, %94 : vector<128x128xi1>, vector<128x128xf32>
    %96 = arith.truncf %95 : vector<128x128xf32> to vector<128x128xbf16>
    %c0_51 = arith.constant 0 : index
    %c384 = arith.constant 384 : index
    %97 = vector.load %arg12[%c0_51, %c384] : memref<128x1152xbf16, #tpu.memory_space<vmem>>, vector<128x128xbf16>
    tpu.vector_store %arg12[%c0_51, %c384], %96 {strides = array<i32>} : memref<128x1152xbf16, #tpu.memory_space<vmem>>, vector<128x128xbf16>,
    %c24 = arith.constant 24 : index
    %c0_52 = arith.constant 0 : index
    %98 = vector.load %arg11[%c24, %c0_52] : memref<176x128xf32, #tpu.memory_space<vmem>>, vector<128x128xf32>
    %99 = arith.truncf %98 : vector<128x128xf32> to vector<128x128xbf16>
    %c0_53 = arith.constant 0 : index
    %c512 = arith.constant 512 : index
    %100 = vector.load %arg12[%c0_53, %c512] : memref<128x1152xbf16, #tpu.memory_space<vmem>>, vector<128x128xbf16>
    tpu.vector_store %arg12[%c0_53, %c512], %99 {strides = array<i32>} : memref<128x1152xbf16, #tpu.memory_space<vmem>>, vector<128x128xbf16>,
    %c25 = arith.constant 25 : index
    %c0_54 = arith.constant 0 : index
    %101 = vector.load %arg11[%c25, %c0_54] : memref<176x128xf32, #tpu.memory_space<vmem>>, vector<128x128xf32>
    %c1_i32_55 = arith.constant 1 : i32
    %102 = vector.broadcast %c1_i32_55 : i32 to vector<128x1xi32>
    %103 = arith.addi %46, %102 : vector<128x1xi32>
    %c0_i32_56 = arith.constant 0 : i32
    %104 = vector.broadcast %c0_i32_56 : i32 to vector<128x1xi32>
    %105 = arith.cmpi sge, %103, %104 : vector<128x1xi32>
    %c1_i32_57 = arith.constant 1 : i32
    %106 = vector.broadcast %c1_i32_57 : i32 to vector<128x1xi32>
    %107 = arith.addi %46, %106 : vector<128x1xi32>
    %c16_i32_58 = arith.constant 16 : i32
    %108 = vector.broadcast %c16_i32_58 : i32 to vector<128x1xi32>
    %109 = arith.cmpi slt, %107, %108 : vector<128x1xi32>
    %110 = arith.andi %105, %109 : vector<128x1xi1>
    %cst_59 = arith.constant 0.000000e+00 : f32
    %111 = vector.shape_cast %110 : vector<128x1xi1> to vector<128x1xi1>
    %112 = vector.broadcast %111 : vector<128x1xi1> to vector<128x128xi1>
    %113 = vector.broadcast %cst_59 : f32 to vector<128x128xf32>
    %114 = arith.select %112, %101, %113 : vector<128x128xi1>, vector<128x128xf32>
    %115 = arith.truncf %114 : vector<128x128xf32> to vector<128x128xbf16>
    %c0_60 = arith.constant 0 : index
    %c640 = arith.constant 640 : index
    %116 = vector.load %arg12[%c0_60, %c640] : memref<128x1152xbf16, #tpu.memory_space<vmem>>, vector<128x128xbf16>
    tpu.vector_store %arg12[%c0_60, %c640], %115 {strides = array<i32>} : memref<128x1152xbf16, #tpu.memory_space<vmem>>, vector<128x128xbf16>,
    %c39 = arith.constant 39 : index
    %c0_61 = arith.constant 0 : index
    %117 = vector.load %arg11[%c39, %c0_61] : memref<176x128xf32, #tpu.memory_space<vmem>>, vector<128x128xf32>
    %c-1_i32_62 = arith.constant -1 : i32
    %118 = vector.broadcast %c-1_i32_62 : i32 to vector<128x1xi32>
    %119 = arith.addi %46, %118 : vector<128x1xi32>
    %c0_i32_63 = arith.constant 0 : i32
    %120 = vector.broadcast %c0_i32_63 : i32 to vector<128x1xi32>
    %121 = arith.cmpi sge, %119, %120 : vector<128x1xi32>
    %c-1_i32_64 = arith.constant -1 : i32
    %122 = vector.broadcast %c-1_i32_64 : i32 to vector<128x1xi32>
    %123 = arith.addi %46, %122 : vector<128x1xi32>
    %c16_i32_65 = arith.constant 16 : i32
    %124 = vector.broadcast %c16_i32_65 : i32 to vector<128x1xi32>
    %125 = arith.cmpi slt, %123, %124 : vector<128x1xi32>
    %126 = arith.andi %121, %125 : vector<128x1xi1>
    %cst_66 = arith.constant 0.000000e+00 : f32
    %127 = vector.shape_cast %126 : vector<128x1xi1> to vector<128x1xi1>
    %128 = vector.broadcast %127 : vector<128x1xi1> to vector<128x128xi1>
    %129 = vector.broadcast %cst_66 : f32 to vector<128x128xf32>
    %130 = arith.select %128, %117, %129 : vector<128x128xi1>, vector<128x128xf32>
    %131 = arith.truncf %130 : vector<128x128xf32> to vector<128x128xbf16>
    %c0_67 = arith.constant 0 : index
    %c768 = arith.constant 768 : index
    %132 = vector.load %arg12[%c0_67, %c768] : memref<128x1152xbf16, #tpu.memory_space<vmem>>, vector<128x128xbf16>
    tpu.vector_store %arg12[%c0_67, %c768], %131 {strides = array<i32>} : memref<128x1152xbf16, #tpu.memory_space<vmem>>, vector<128x128xbf16>,
    %c40 = arith.constant 40 : index
    %c0_68 = arith.constant 0 : index
    %133 = vector.load %arg11[%c40, %c0_68] : memref<176x128xf32, #tpu.memory_space<vmem>>, vector<128x128xf32>
    %134 = arith.truncf %133 : vector<128x128xf32> to vector<128x128xbf16>
    %c0_69 = arith.constant 0 : index
    %c896 = arith.constant 896 : index
    %135 = vector.load %arg12[%c0_69, %c896] : memref<128x1152xbf16, #tpu.memory_space<vmem>>, vector<128x128xbf16>
    tpu.vector_store %arg12[%c0_69, %c896], %134 {strides = array<i32>} : memref<128x1152xbf16, #tpu.memory_space<vmem>>, vector<128x128xbf16>,
    %c41 = arith.constant 41 : index
    %c0_70 = arith.constant 0 : index
    %136 = vector.load %arg11[%c41, %c0_70] : memref<176x128xf32, #tpu.memory_space<vmem>>, vector<128x128xf32>
    %c1_i32_71 = arith.constant 1 : i32
    %137 = vector.broadcast %c1_i32_71 : i32 to vector<128x1xi32>
    %138 = arith.addi %46, %137 : vector<128x1xi32>
    %c0_i32_72 = arith.constant 0 : i32
    %139 = vector.broadcast %c0_i32_72 : i32 to vector<128x1xi32>
    %140 = arith.cmpi sge, %138, %139 : vector<128x1xi32>
    %c1_i32_73 = arith.constant 1 : i32
    %141 = vector.broadcast %c1_i32_73 : i32 to vector<128x1xi32>
    %142 = arith.addi %46, %141 : vector<128x1xi32>
    %c16_i32_74 = arith.constant 16 : i32
    %143 = vector.broadcast %c16_i32_74 : i32 to vector<128x1xi32>
    %144 = arith.cmpi slt, %142, %143 : vector<128x1xi32>
    %145 = arith.andi %140, %144 : vector<128x1xi1>
    %cst_75 = arith.constant 0.000000e+00 : f32
    %146 = vector.shape_cast %145 : vector<128x1xi1> to vector<128x1xi1>
    %147 = vector.broadcast %146 : vector<128x1xi1> to vector<128x128xi1>
    %148 = vector.broadcast %cst_75 : f32 to vector<128x128xf32>
    %149 = arith.select %147, %136, %148 : vector<128x128xi1>, vector<128x128xf32>
    %150 = arith.truncf %149 : vector<128x128xf32> to vector<128x128xbf16>
    %c0_76 = arith.constant 0 : index
    %c1024 = arith.constant 1024 : index
    %151 = vector.load %arg12[%c0_76, %c1024] : memref<128x1152xbf16, #tpu.memory_space<vmem>>, vector<128x128xbf16>
    tpu.vector_store %arg12[%c0_76, %c1024], %150 {strides = array<i32>} : memref<128x1152xbf16, #tpu.memory_space<vmem>>, vector<128x128xbf16>,
    %c0_77 = arith.constant 0 : index
    %c0_78 = arith.constant 0 : index
    %152 = vector.load %arg12[%c0_77, %c0_78] : memref<128x1152xbf16, #tpu.memory_space<vmem>>, vector<128x1152xbf16>
    %c0_79 = arith.constant 0 : index
    %c0_80 = arith.constant 0 : index
    %153 = vector.load %arg7[%c0_79, %c0_80] : memref<1152x128xbf16, #tpu.memory_space<vmem>>, vector<1152x128xbf16>
    %cst_81 = arith.constant dense<0.000000e+00> : vector<128x128xf32>
    %154 = tpu.matmul %152, %153, %cst_81 {dimension_numbers = #tpu.dot_dimension_numbers<[1], [0], [0], [1], [0, 0, 1, 1], [], []>} : vector<128x1152xbf16>, vector<1152x128xbf16>, vector<128x128xf32> -> vector<128x128xf32>
    %c0_82 = arith.constant 0 : index
    %c0_83 = arith.constant 0 : index
    %155 = vector.load %arg8[%c0_82, %c0_83] : memref<1x128xf32, #tpu.memory_space<vmem>>, vector<1x128xf32>
    %156 = vector.broadcast %155 : vector<1x128xf32> to vector<128x128xf32>
    %157 = arith.addf %154, %156 : vector<128x128xf32>
    %cst_84 = arith.constant 0.000000e+00 : f32
    %158 = vector.broadcast %cst_84 : f32 to vector<128x128xf32>
    %159 = arith.cmpf ogt, %157, %158 : vector<128x128xf32>
    %cst_85 = arith.constant 1.000000e-01 : f32
    %160 = vector.broadcast %cst_85 : f32 to vector<128x128xf32>
    %161 = arith.mulf %160, %157 : vector<128x128xf32>
    %162 = arith.select %159, %157, %161 : vector<128x128xi1>, vector<128x128xf32>
    %c0_86 = arith.constant 0 : index
    %c0_87 = arith.constant 0 : index
    %c0_88 = arith.constant 0 : index
    %163 = vector.load %arg2[%c0_86, %c0_87, %c0_88] : memref<1x128x128xf32, #tpu.memory_space<vmem>>, vector<1x128x128xf32>
    %164 = vector.shape_cast %163 : vector<1x128x128xf32> to vector<128x128xf32>
    %165 = arith.addf %162, %164 : vector<128x128xf32>
    %c0_89 = arith.constant 0 : index
    %c0_90 = arith.constant 0 : index
    %c0_91 = arith.constant 0 : index
    %166 = vector.load %arg9[%c0_89, %c0_90, %c0_91] : memref<1x128x128xf32, #tpu.memory_space<vmem>>, vector<1x128x128xf32>
    %167 = vector.shape_cast %166 : vector<1x128x128xf32> to vector<128x128xf32>
    %168 = vector.shape_cast %165 : vector<128x128xf32> to vector<1x128x128xf32>
    tpu.vector_store %arg9[%c0_89, %c0_90, %c0_91], %168 {strides = array<i32>} : memref<1x128x128xf32, #tpu.memory_space<vmem>>, vector<1x128x128xf32>,
    return
  }
  func.func @transform_0(%arg0: i32, %arg1: i32) -> (i32, i32, i32) {
    %c0_i32 = arith.constant 0 : i32
    %c0_i32_0 = arith.constant 0 : i32
    return %arg0, %arg1, %c0_i32 : i32, i32, i32
  }
  func.func @transform_1(%arg0: i32, %arg1: i32) -> (i32, i32, i32) {
    %c8_i32 = arith.constant 8 : i32
    %0 = arith.muli %arg1, %c8_i32 : i32
    %c1_i32 = arith.constant 1 : i32
    %1 = arith.subi %0, %c1_i32 : i32
    %c0_i32 = arith.constant 0 : i32
    %2 = arith.maxsi %1, %c0_i32 : i32
    %c0_i32_0 = arith.constant 0 : i32
    %c0_i32_1 = arith.constant 0 : i32
    return %arg0, %2, %c0_i32_0 : i32, i32, i32
  }
  func.func @transform_2(%arg0: i32, %arg1: i32) -> (i32, i32, i32) {
    %c1_i32 = arith.constant 1 : i32
    %0 = arith.addi %arg1, %c1_i32 : i32
    %c8_i32 = arith.constant 8 : i32
    %1 = arith.muli %0, %c8_i32 : i32
    %c15_i32 = arith.constant 15 : i32
    %2 = arith.minsi %1, %c15_i32 : i32
    %c0_i32 = arith.constant 0 : i32
    %c0_i32_0 = arith.constant 0 : i32
    return %arg0, %2, %c0_i32 : i32, i32, i32
  }
  func.func @transform_3(%arg0: i32, %arg1: i32) -> (i32, i32) {
    %c0_i32 = arith.constant 0 : i32
    %c0_i32_0 = arith.constant 0 : i32
    %c0_i32_1 = arith.constant 0 : i32
    return %c0_i32, %c0_i32_0 : i32, i32
  }
  func.func @transform_4(%arg0: i32, %arg1: i32) -> (i32, i32) {
    %c0_i32 = arith.constant 0 : i32
    %c0_i32_0 = arith.constant 0 : i32
    %c0_i32_1 = arith.constant 0 : i32
    return %c0_i32, %c0_i32_0 : i32, i32
  }
  func.func @transform_5(%arg0: i32, %arg1: i32) -> (i32, i32) {
    %c0_i32 = arith.constant 0 : i32
    %c0_i32_0 = arith.constant 0 : i32
    %c0_i32_1 = arith.constant 0 : i32
    return %c0_i32, %c0_i32_0 : i32, i32
  }
  func.func @transform_6(%arg0: i32, %arg1: i32) -> (i32, i32) {
    %c0_i32 = arith.constant 0 : i32
    %c0_i32_0 = arith.constant 0 : i32
    %c0_i32_1 = arith.constant 0 : i32
    return %c0_i32, %c0_i32_0 : i32, i32
  }
  func.func @transform_7(%arg0: i32, %arg1: i32) -> (i32, i32, i32) {
    %c0_i32 = arith.constant 0 : i32
    %c0_i32_0 = arith.constant 0 : i32
    return %arg0, %arg1, %c0_i32 : i32, i32, i32
  }
}

</mosaic_0001>

<bundles_post_ra>
// kernel: tpu_custom_call.1
= control target key start
LH: loop header
LB: loop body
LE: loop exit
PB: predicated region body
PF: predicated region fallthrough
CT: control target
= control target key end

     0   :  { %s6635_s0 = inlined_call_operand.hbm [shape: f32[2,256,128], index: 0, kind: input, shape index: {}]   ;;  %s6636_s1 = inlined_call_operand.hbm [shape: f32[2,256,128], index: 1, kind: input, shape index: {}]   ;;  %s6637_s2 = inlined_call_operand.hbm [shape: f32[2,256,128], index: 2, kind: input, shape index: {}]   ;;  %s6638_s3 = inlined_call_operand.hbm [shape: bf16[128,128], index: 3, kind: input, shape index: {}]   ;;  %s6639_s4 = inlined_call_operand.vmem [shape: f32[1,128], index: 4, kind: input, shape index: {}]   ;;  %s6640_s5 = inlined_call_operand.hbm [shape: bf16[1152,128], index: 5, kind: input, shape index: {}]   ;;  %s6641_s6 = inlined_call_operand.vmem [shape: f32[1,128], index: 6, kind: input, shape index: {}]   ;;  %s6642_s7 = inlined_call_operand.hbm [shape: f32[2,256,128], index: 7, kind: output, shape index: {}]  }
   0x1   :  { %6666 = sst [smem:[#allocation57_spill]] %s6635_s0 }
   0x2   :  { %6667 = sst [smem:[#allocation58_spill]] %s6636_s1 }
   0x3   :  { %6668 = sst [smem:[#allocation59_spill]] %s6637_s2 }
   0x4   :  { %6669 = sst [smem:[#allocation60_spill]] %s6638_s3 }
   0x5   :  { %6670 = sst [smem:[#allocation61_spill]] %s6639_s4 }
   0x6   :  { %6671 = sst [smem:[#allocation62_spill]] %s6640_s5 }
   0x7   :  { %6672 = sst [smem:[#allocation63_spill]] %s6641_s6 }
   0x8   :  { %6673 = sst [smem:[#allocation64_spill]] %s6642_s7 }
   0x9   :  { %12 = vsyncpa [#allocation6], 0 }
   0xa   :  { %14 = vsyncpa [#allocation6 + $0x1], 0 }
   0xb   :  { %15 = vsyncpa [#allocation9], 0 }
   0xc   :  { %17 = vsyncpa [#allocation9 + $0x1], 0 }
   0xd   :  { %18 = vsyncpa [#allocation12], 0 }
   0xe   :  { %19 = vsyncpa [#allocation7], 0 }
   0xf   :  { %21 = vsyncpa [#allocation7 + $0x1], 0  ;;  %s5753_s24 = smov 0   ;;  %s5755_s25 = smov 0  }
  0x10   :  { %s5757_s26 = smov 0   ;;  %s5759_s27 = smov 0  }
  0x11   :  { %s5761_s28 = smov 0   ;;  %s5763_s29 = smov 0  }
  0x12   :  { %s5765_s30 = smov 0   ;;  %s5767_s8 = smov 0  }
  0x13   :  { %s5769_s9 = smov 0   ;;  %s5771_s10 = smov 0  }
  0x14   :  { %s5773_s11 = smov 0   ;;  %s5775_s12 = smov 0  }
  0x15   :  { %s5777_s13 = smov 0   ;;  %s5779_s14 = smov 0  }
  0x16 LB: > { %6674 = sst [smem:[#allocation20_spill]] %s5645_s24  ;;  %s5824_s15 = sadd.s32 4294967295, %s5697_s14   ;;  %s5697_s14 = sphi %s5779_s14, %s27_s14   ;;  %s5693_s13 = sphi %s5777_s13, %s6794_s13   ;;  %s5689_s12 = sphi %s5775_s12, %s6793_s12   ;;  %s5685_s11 = sphi %s5773_s11, %s6792_s11   ;;  %s5681_s10 = sphi %s5771_s10, %s6802_s10   ;;  %s5677_s9 = sphi %s5769_s9, %s6801_s9   ;;  %s5673_s8 = sphi %s5767_s8, %s6800_s8   ;;  %s5669_s30 = sphi %s5765_s30, %s6799_s30   ;;  %s5665_s29 = sphi %s5763_s29, %s6798_s29   ;;  %s5661_s28 = sphi %s5761_s28, %s6797_s28   ;;  %s5657_s27 = sphi %s5759_s27, %s6789_s27   ;;  %s5653_s26 = sphi %s5757_s26, %s6796_s26   ;;  %s5649_s25 = sphi %s5755_s25, %s6788_s25   ;;  %s5645_s24 = sphi %s5753_s24, %s6787_s24  }
  0x17   : > { %6675 = sst [smem:[#allocation21_spill]] %s5649_s25  ;;  %p4097_p0 = scmp.ge.s32.totalorder %s5697_s14, 1 }
  0x18   : > { %6676 = sst [smem:[#allocation22_spill]] %s5653_s26  ;;  %p6656_p1 = scmp.eq.s32.totalorder %s5824_s15, 0 }
  0x19   : > { %6677 = sst [smem:[#allocation23_spill]] %s5661_s28  ;;  %p256_p3 = scmp.lt.s32.totalorder %s5697_s14, 5 }
  0x1a   : > { %6678 = sst [smem:[#allocation24_spill]] %s5681_s10  ;;  %s5699_s17 = smov [#allocation11]  }
  0x1b   : > { %6679 = sst [smem:[#allocation25_spill]] %s5685_s11  ;;  %p5830_p4 = pnand %p4097_p0, %p256_p3 }
  0x1c   : > { %6680 = sst [smem:[#allocation26_spill]] %s5689_s12  ;;  %s268_s18 = sshll.u32 %s5699_s17, 4  ;;  %s269_s18 = int_to_ptr.vmem [resolvable:$true] %s268_s18 }
  0x1d   : > { %6681 = sst [smem:[#allocation27_spill]] %s5693_s13  ;;  %p5062_p5 = pneg %p5830_p4 }
  0x1e   : > { %s6682_s16 = scalar_select %p5830_p4, 1, 0 }
  0x1f   : > { %p5838_p6 = pnand %p5062_p5, %p6656_p1  ;;  %s5416_s20 = scalar_lea.vmem %s269_s18, 1024 }
  0x20   : > { %6683 = sst [smem:[#allocation28_spill]] %s6682_s16  ;;  %p5417_p8 = scmp.ne.s32.totalorder %s269_s18, %s5416_s20 }
  0x21   : > { %p5407_p7 = pneg %p5838_p6  ;;  %p5424_p11 = scmp.lt.s32.totalorder %s269_s18, %s269_s18 }
  0x22   : > { %p5425_p12 = scmp.lt.s32.totalorder %s5416_s20, %s5416_s20 }
  0x23   : > { %p5419_p9 = pnand %p5417_p8, %p5407_p7 }
  0x24   : > { %p5426_p13 = por %p5425_p12, %p5424_p11 }
  0x25   : > { %p5420_p10 = pneg %p5419_p9 }
  0x27   : > { %p5427_p0 = pnand %p5426_p13, %p5420_p10 }
  0x29   : > { %5430 = shalt.err (!%p5427_p0)
}
  0x2a   : > { %s6644_s21 = smov 64   ;;  %s6645_s22 = smov 4  }
  0x2b   : > { %s6685_s3 = sld [smem:[#allocation60_spill]]  ;;  %s36_s20 = sadd.s32 1, %s5689_s12 }
  0x2c   : > { %s39_s7 = sadd.s32 1, %s5693_s13  ;;  %p37_p3 = scmp.ge.s32.totalorder %s36_s20, 2 }
  0x2d   : > { %p6658_p5 = scmp.eq.s32.totalorder %s5697_s14, 0  ;;  %s4091_s11 = sshll.u32 %s5689_s12, 3 }
  0x2e   : > { %s84_s6 = sadd.s32 1, %s5665_s29  ;;  %s6804_s20 = smov (%p37_p3, %s36_s20), 0 }
  0x2f   : > { %6686 = sst [smem:[#allocation29_spill]] %s6804_s20  ;;  %s6806_s7 = smov (!%p37_p3, %s39_s7), %s5693_s13 }
  0x30   : > { %s44_s10 = ssub.s32 %s5689_s12, %s6804_s20  ;;  %s4092_s4 = sadd.s32 4294967295, %s4091_s11 }
  0x31   : > { %5065 = dma.hbm_to_vmem [thread:$0]  (!%p5838_p6), %s6685_s3, 1024, %s269_s18, [#allocation12], %s6644_s21, %s6644_s21, %s6645_s22  }
  0x32   : > { %p41_p8 = scmp.ge.s32.totalorder %s6806_s7, 2  ;;  %p73_p9 = scmp.gt.s32.totalorder %s4092_s4, 0 }
  0x33   : > { %s4093_s18 = sshll.u32 %s6804_s20, 3  ;;  %p91_p10 = scmp.ne.s32.totalorder %s5665_s29, %s5661_s28 }
  0x34   : > { %s6808_s7 = smov (%p41_p8, %s6806_s7), 0  ;;  %s6810_s4 = smov (!%p73_p9, %s4092_s4), 0 }
  0x35   : > { %6687 = sst [smem:[#allocation30_spill]] %s6808_s7  ;;  %s5872_s23 = ssub.s32 %s5693_s13, %s6808_s7 }
  0x36   : > { %6688 = sst [smem:[#allocation31_spill]] %s5872_s23  ;;  %s4094_s17 = sadd.s32 4294967295, %s4093_s18 }
  0x37   : > { %s5875_s21 = sor.u32 %s44_s10, %s5872_s23  ;;  %p77_p11 = scmp.gt.s32.totalorder %s4094_s17, 0 }
  0x38   : > { %p46_p12 = scmp.eq.s32.totalorder %s5875_s21, 0  ;;  %p5880_p13 = por %p91_p10, %p6658_p5 }
  0x39   : > { %s6812_s17 = smov (!%p77_p11, %s4094_s17), 0  ;;  %p97_p0 = scmp.ne.s32.totalorder %s5661_s28, %s5657_s27 }
  0x3a   : > { %s5886_s3 = sadd.s32 8, %s4091_s11  ;;  %s80_s7 = ssub.s32 %s6810_s4, %s6812_s17 }
  0x3b   : > { %s81_s10 = sor.u32 %s80_s7, %s5872_s23  ;;  %p5892_p8 = por %p97_p0, %p6656_p1 }
  0x3c   : > { %p82_p9 = scmp.eq.s32.totalorder %s81_s10, 0  ;;  %s5896_s16 = sadd.s32 8, %s4093_s18 }
  0x3d   : > { %s6690_s20 = scalar_select %p5892_p8, 1, 0 }
  0x3e   : > { %p6657_p11 = scmp.lt.s32.totalorder %s5697_s14, 4  ;;  %s5904_s11 = sshll.u32 %s5693_s13, 5 }
  0x3f   : > { %6691 = sst [smem:[#allocation32_spill]] %s6690_s20  ;;  %s324_s17 = sand.u32 1, %s5697_s14  }
  0x40   : > { %s5901_s27 = scalar_select %p82_p9, %s5665_s29, %s84_s6  }
  0x41   : > { %s326_s7 = sand.u32 1, %s5665_s29   ;;  %s4108_s2 = sshll.u32 %s6810_s4, 1 }
  0x42   : > { %6692 = sst [smem:[#allocation33_spill]] %s5901_s27  ;;  %s4105_s28 = sshll.u32 %s326_s7, 4 }
  0x43   : > { %s338_s23 = sadd.s32 %s4108_s2, %s5904_s11  ;;  %s328_s20 = scalar_lea.vmem [#allocation8], %s4105_s28 }
  0x44   : > { %s4110_s24 = sshll.u32 %s338_s23, 7  ;;  %s341_s10 = sshll.u32 %s328_s20, 4  ;;  %s342_s10 = int_to_ptr.vmem [resolvable:$true] %s341_s10 }
  0x45   : > { %s6693_s1 = sld [smem:[#allocation58_spill]]  ;;  %p5916_p0 = pnand %p6657_p11, %p5880_p13 }
  0x46   : > { %s5702_s13 = smov [#allocation13]   ;;  %s5922_s2 = scalar_lea.sflag [#allocation9], %s324_s17 }
  0x47   : > { %s284_s27 = sshll.u32 %s5702_s13, 4  ;;  %p5433_p9 = pneg %p5916_p0  ;;  %s5920_s27 = int_to_ptr.vmem [resolvable:$true] %s284_s27 }
  0x48   : > { %s5444_s4 = scalar_lea.vmem %s342_s10, 256 }
  0x49   : > { %p5445_p10 = scmp.ne.s32.totalorder %s342_s10, %s5444_s4 }
  0x4b   : > { %s340_s18 = scalar_lea.hbm %s6693_s1, %s4110_s24  ;;  %p5447_p3 = pnand %p5445_p10, %p5433_p9 }
  0x4c   : > { %s5703_s24 = smov [#allocation8]  }
  0x4d   : > { %p5448_p1 = pneg %p5447_p3  ;;  %s5449_s25 = sshll.u32 %s5703_s24, 4  ;;  %s5450_s25 = int_to_ptr.vmem [resolvable:$false] %s5449_s25 }
  0x4e   : > { %s5451_s26 = scalar_lea.vmem %s5450_s25, 512  ;;  %p5452_p13 = scmp.lt.s32.totalorder %s342_s10, %s5450_s25 }
  0x4f   : > { %p5453_p11 = scmp.lt.s32.totalorder %s5451_s26, %s5444_s4 }
  0x51   : > { %p5454_p2 = por %p5453_p11, %p5452_p13 }
  0x53   : > { %p5455_p5 = pnand %p5454_p2, %p5448_p1 }
  0x55   : > { %5458 = shalt.err (!%p5455_p5)
}
  0x56   : > { %s6659_s28 = smov 128   ;;  %s6661_s13 = smov 8  }
  0x57   : > { %5075 = dma.hbm_to_vmem [thread:$0]  (!%p5916_p0), %s340_s18, 256, %s342_s10, %s5922_s2, %s6659_s28, %s6659_s28, %s6661_s13  }
  0x58   : > { %s5470_s22 = scalar_lea.vmem %s5920_s27, 9216  ;;  %p5478_p2 = scmp.lt.s32.totalorder %s5920_s27, %s5920_s27 }
  0x59   : > { %p5471_p3 = scmp.ne.s32.totalorder %s5920_s27, %s5470_s22  ;;  %p5479_p5 = scmp.lt.s32.totalorder %s5470_s22, %s5470_s22 }
  0x5b   : > { %p5473_p10 = pnand %p5471_p3, %p5407_p7  ;;  %p5480_p11 = por %p5479_p5, %p5478_p2 }
  0x5d   : > { %p5474_p1 = pneg %p5473_p10 }
  0x5f   : > { %p5481_p9 = pnand %p5480_p11, %p5474_p1 }
  0x61   : > { %5484 = shalt.err (!%p5481_p9)
}
  0x62   : > { %s6695_s20 = smov 4   ;;  %s6696_s23 = smov 64  }
  0x63   : > { %s6697_s5 = sld [smem:[#allocation62_spill]]  ;;  %s4090_s19 = sadd.s32 4294967294, %s5697_s14  }
  0x64   : > { %s48_s10 = sadd.s32 1, %s5677_s9  ;;  %p55_p7 = scmp.ne.s32.totalorder %s5677_s9, %s5673_s8 }
  0x65   : > { %s5955_s18 = scalar_select %p46_p12, %s5677_s9, %s48_s10  }
  0x66   : > { %p6698_p0 = scmp.eq.s32.totalorder %s5697_s14, 0  ;;  %p61_p3 = scmp.ne.s32.totalorder %s5673_s8, %s5669_s30 }
  0x67   : > { %p6700_p10 = scmp.eq.s32.totalorder %s5824_s15, 3  ;;  %p6702_p2 = scmp.eq.s32.totalorder %s5824_s15, 0 }
  0x68   : > { %p5959_p13 = por %p6698_p0, %p55_p7  ;;  %s301_s21 = sand.u32 1, %s5677_s9  }
  0x69   : > { %5068 = dma.hbm_to_vmem [thread:$0]  (!%p5838_p6), %s6697_s5, 9216, %s5920_s27, [#allocation12], %s6696_s23, %s6696_s23, %s6695_s20  }
  0x6a   : > { %p5967_p1 = por %p6700_p10, %p55_p7  ;;  %p249_p6 = scmp.eq.s32.totalorder %s4090_s19, 3 }
  0x6b   : > { %p5973_p5 = por %p6702_p2, %p61_p3  ;;  %s4101_s25 = sshll.u32 %s301_s21, 7 }
  0x6c   : > { %s6701_s4 = scalar_select %p5967_p1, 1, 0 }
  0x6d   : > { %p5978_p12 = por %p249_p6, %p61_p3  ;;  %s4102_s26 = sshll.u32 %s5689_s12, 4 }
  0x6e   : > { %s311_s22 = sadd.s32 %s5904_s11, %s4102_s26  ;;  %s305_s23 = scalar_lea.vmem [#allocation5], %s4101_s25 }
  0x6f   : > { %s6704_s24 = scalar_select %p5978_p12, 1, 0 }
  0x70   : > { %s4104_s20 = sshll.u32 %s311_s22, 7  ;;  %s314_s17 = sshll.u32 %s305_s23, 4  ;;  %s315_s17 = int_to_ptr.vmem [resolvable:$true] %s314_s17 }
  0x71   : > { %s6705_s0 = sld [smem:[#allocation57_spill]]  ;;  %p6706_p11 = scmp.lt.s32.totalorder %s5697_s14, 4 }
  0x72   : > { %s302_s13 = scalar_lea.sflag [#allocation6], %s301_s21  ;;  %s5498_s1 = scalar_lea.vmem %s315_s17, 2048 }
  0x73   : > { %p5991_p9 = pnand %p6706_p11, %p5959_p13  ;;  %p5499_p0 = scmp.ne.s32.totalorder %s315_s17, %s5498_s1 }
  0x74   : > { %s5706_s25 = smov [#allocation5]  }
  0x75   : > { %p5487_p7 = pneg %p5991_p9  ;;  %s5503_s26 = sshll.u32 %s5706_s25, 4  ;;  %s5504_s26 = int_to_ptr.vmem [resolvable:$false] %s5503_s26 }
  0x76   : > { %s5505_s22 = scalar_lea.vmem %s5504_s26, 4096  ;;  %p5506_p6 = scmp.lt.s32.totalorder %s315_s17, %s5504_s26 }
  0x77   : > { %s313_s19 = scalar_lea.hbm %s6705_s0, %s4104_s20  ;;  %p5501_p3 = pnand %p5499_p0, %p5487_p7 }
  0x78   : > { %p5507_p2 = scmp.lt.s32.totalorder %s5505_s22, %s5498_s1 }
  0x79   : > { %p5502_p10 = pneg %p5501_p3 }
  0x7a   : > { %p5508_p12 = por %p5507_p2, %p5506_p6 }
  0x7c   : > { %p5509_p1 = pnand %p5508_p12, %p5502_p10 }
  0x7e   : > { %5512 = shalt.err (!%p5509_p1)
}
  0x7f   : > { %s6708_s6 = smov 8   ;;  %s6709_s20 = smov 128  }
  0x80   : > { %s6710_s21 = sld [smem:[#allocation22_spill]]  ;;  %p6714_p13 = scmp.lt.s32.totalorder %s5886_s3, 15 }
  0x81   : > { %s6711_s23 = sld [smem:[#allocation21_spill]]  ;;  %p6715_p1 = scmp.lt.s32.totalorder %s5896_s16, 15 }
  0x82   : > { %s6712_s7 = sld [smem:[#allocation20_spill]]  ;;  %s6814_s3 = smov (!%p6714_p13, %s5886_s3), 15 }
  0x83   : > { %s6713_s10 = sld [smem:[#allocation31_spill]]  ;;  %s6816_s16 = smov (!%p6715_p1, %s5896_s16), 15 }
  0x84   : > { %5072 = dma.hbm_to_vmem [thread:$0]  (!%p5991_p9), %s313_s19, 2048, %s315_s17, %s302_s13, %s6709_s20, %s6709_s20, %s6708_s6  }
  0x85   : > { %s116_s28 = ssub.s32 %s6814_s3, %s6816_s16  ;;  %p6716_p7 = scmp.eq.s32.totalorder %s5697_s14, 0 }
  0x86   : > { %s120_s1 = sadd.s32 1, %s6710_s21  ;;  %p6718_p10 = scmp.eq.s32.totalorder %s5824_s15, 0 }
  0x87   : > { %p127_p12 = scmp.ne.s32.totalorder %s6710_s21, %s6711_s23  ;;  %s353_s17 = sand.u32 1, %s6710_s21  }
  0x88   : > { %p133_p11 = scmp.ne.s32.totalorder %s6711_s23, %s6712_s7  ;;  %s4113_s19 = sshll.u32 %s6814_s3, 1 }
  0x89   : > { %s117_s25 = sor.u32 %s116_s28, %s6713_s10  ;;  %p6016_p0 = por %p127_p12, %p6716_p7 }
  0x8a   : > { %p118_p3 = scmp.eq.s32.totalorder %s117_s25, 0  ;;  %p6022_p6 = por %p133_p11, %p6718_p10 }
  0x8b   : > { %s4111_s16 = sshll.u32 %s353_s17, 4  ;;  %s365_s22 = sadd.s32 %s4113_s19, %s5904_s11 }
  0x8c   : > { %s6719_s13 = scalar_select %p6022_p6, 1, 0 }
  0x8d   : > { %s6818_s21 = smov (!%p118_p3, %s6710_s21), %s120_s1  ;;  %s4115_s23 = sshll.u32 %s365_s22, 7 }
  0x8e   : > { %s6720_s28 = sld [smem:[#allocation59_spill]]  ;;  %s355_s5 = scalar_lea.vmem [#allocation10], %s4111_s16 }
  0x8f   : > { %s368_s12 = sshll.u32 %s355_s5, 4  ;;  %p6721_p9 = scmp.lt.s32.totalorder %s5697_s14, 4  ;;  %s369_s12 = int_to_ptr.vmem [resolvable:$true] %s368_s12 }
  0x90   : > { %s5526_s3 = scalar_lea.vmem %s369_s12, 256  ;;  %s5707_s11 = smov [#allocation10]  }
  0x91   : > { %p6038_p2 = pnand %p6721_p9, %p6016_p0  ;;  %p5527_p1 = scmp.ne.s32.totalorder %s369_s12, %s5526_s3 }
  0x92   : > { %s5531_s1 = sshll.u32 %s5707_s11, 4  ;;  %s5532_s1 = int_to_ptr.vmem [resolvable:$false] %s5531_s1 }
  0x93   : > { %p5515_p13 = pneg %p6038_p2  ;;  %s5533_s17 = scalar_lea.vmem %s5532_s1, 512 }
  0x94   : > { %s367_s0 = scalar_lea.hbm %s6720_s28, %s4115_s23  ;;  %p5534_p7 = scmp.lt.s32.totalorder %s369_s12, %s5532_s1 }
  0x95   : > { %p5529_p12 = pnand %p5527_p1, %p5515_p13  ;;  %p5535_p3 = scmp.lt.s32.totalorder %s5533_s17, %s5526_s3 }
  0x97   : > { %p5530_p11 = pneg %p5529_p12  ;;  %p5536_p10 = por %p5535_p3, %p5534_p7 }
  0x99   : > { %p5537_p6 = pnand %p5536_p10, %p5530_p11 }
  0x9b   : > { %5540 = shalt.err (!%p5537_p6)
}
  0x9c   : > { %5078 = dma.hbm_to_vmem [thread:$0]  (!%p6038_p2), %s367_s0, 256, %s369_s12, %s5922_s2, %s6709_s20, %s6709_s20, %s6708_s6  }
  0x9d   : > { %380 = sbr.rel (%p5830_p4) target bundleno = 882 (0x372), region = 48 }
  0xa2   : > { %s6053_s26 = sand.u32 1, %s5673_s8  }
  0xa3   : > { %s4117_s19 = sshll.u32 %s6053_s26, 7  ;;  %s383_s16 = scalar_lea.sflag [#allocation6], %s6053_s26 }
  0xa4   : > { %s6059_s22 = scalar_lea.vmem [#allocation5], %s4117_s19 }
  0xa5   : > { %5624 = dma.done.wait (%p5973_p5), %s383_s16, 2048  }
  0xa6   : > { %5626 = vsyncadd (%p5973_p5), %s383_s16, 4294965248  ;;  %s6724_s0 = sld [smem:[#allocation23_spill]]  ;;  %s391_s2 = sand.u32 1, %s5824_s15  }
  0xa7   : > { %s392_s23 = scalar_lea.sflag [#allocation9], %s391_s2 }
  0xac   : > { %s393_s6 = sand.u32 1, %s6724_s0  }
  0xad   : > { %s4118_s20 = sshll.u32 %s393_s6, 4 }
  0xae   : > { %s395_s7 = scalar_lea.vmem [#allocation8], %s4118_s20 }
  0xaf   : > { %5628 = dma.done.wait (%p5892_p8), %s392_s23, 256  }
  0xb0   : > { %5630 = vsyncadd (%p5892_p8), %s392_s23, 4294967040  ;;  %s6726_s10 = sld [smem:[#allocation21_spill]]  ;;  %p6727_p4 = scmp.ne.s32.totalorder %s6719_s13, 0 }
  0xb6   : > { %s402_s28 = sand.u32 1, %s6726_s10  }
  0xb7   : > { %s6072_s25 = sshll.u32 %s402_s28, 4 }
  0xb8   : > { %s404_s27 = scalar_lea.vmem [#allocation10], %s6072_s25 }
  0xb9   : > { %5632 = dma.done.wait (%p6727_p4), %s392_s23, 256  }
  0xba   : > { %5634 = vsyncadd (%p6727_p4), %s392_s23, 4294967040  ;;  %p6728_p5 = scmp.eq.s32.totalorder %s5824_s15, 0 }
  0xbc   : > { %5636 = dma.done.wait (%p6728_p5), [#allocation12], 10240   ;;  %p6729_p0 = pmov %p6728_p5 }
  0xbd   : > { %v5211_v0 = vld [vmem:[#allocation11 + $0x38] sm:$0xff]   ;;  %v5212_v1 = vld [vmem:[#allocation11 + $0x30] sm:$0xff]   ;;  %v5213_v2 = vld [vmem:[#allocation11 + $0x28] sm:$0xff]   ;;  %s6730_s3 = sld [smem:[#allocation61_spill]]  ;;  %s6130_s11 = scalar_lea.vmem [#allocation14], %s4117_s19 }
  0xbe   : > { %5638 = vsyncadd (%p6729_p0), [#allocation12], 4294957056  ;;  %4978 = vmatprep.subr.bf16.mxu0 %v5211_v0  ;;  %v5214_v3 = vld [vmem:[#allocation11 + $0x20] sm:$0xff]   ;;  %v467_v5 = vld [vmem:[%s395_s7 + $0x8] sm:$0xff]  ;;  %s6731_s1 = sld [smem:[#allocation24_spill]] }
  0xbf   : > { %4979 = vmatpush3.bf16.msra.mxu0 %v5211_v0  ;;  %v466_v4 = vld [vmem:[%s395_s7] sm:$0xff]  ;;  %v479_v8 = vld [vmem:[%s6059_s22 + $0x8] sm:$0xff]  ;;  %v481_v10 = vld [vmem:[%s6059_s22 + $0x18] sm:$0xff] }
  0xc0   : > { %4980 = vmatprep.subr.bf16.mxu0 %v5212_v1  ;;  %v478_v6 = vld [vmem:[%s6059_s22] sm:$0xff]  ;;  %v4632_v7 = vpack.c.bf16 %v467_v5, %v466_v4  ;;  %v480_v9 = vld [vmem:[%s6059_s22 + $0x10] sm:$0xff]  ;;  %v5215_v11 = vld [vmem:[#allocation11 + $0x18] sm:$0xff]  }
  0xc1   : > { %v4637_v12 = vpack.c.bf16 %v479_v8, %v478_v6  ;;  %v4642_v13 = vpack.c.bf16 %v481_v10, %v480_v9  ;;  %v482_v14 = vld [vmem:[%s6059_s22 + $0x20] sm:$0xff]  ;;  %v483_v15 = vld [vmem:[%s6059_s22 + $0x28] sm:$0xff]  ;;  %v484_v16 = vld [vmem:[%s6059_s22 + $0x30] sm:$0xff] }
  0xc2   : > { %4633 = vst [vmem:[#allocation2] sm:$0xff] %v4632_v7   ;;  %v4647_v17 = vpack.c.bf16 %v483_v15, %v482_v14  ;;  %v485_v18 = vld [vmem:[%s6059_s22 + $0x38] sm:$0xff]  ;;  %v486_v19 = vld [vmem:[%s6059_s22 + $0x40] sm:$0xff]  ;;  %v487_v20 = vld [vmem:[%s6059_s22 + $0x48] sm:$0xff] }
  0xc3   : > { %4981 = vmatpush3.bf16.msra.mxu0 %v5212_v1  ;;  %4679 = vst [vmem:[#allocation2 + $0x8] sm:$0xff] %v4637_v12   ;;  %4680 = vst [vmem:[#allocation2 + $0x10] sm:$0xff] %v4642_v13   ;;  %v4652_v21 = vpack.c.bf16 %v485_v18, %v484_v16  ;;  %v4657_v22 = vpack.c.bf16 %v487_v20, %v486_v19  ;;  %v488_v23 = vld [vmem:[%s6059_s22 + $0x50] sm:$0xff]  ;;  %v489_v24 = vld [vmem:[%s6059_s22 + $0x58] sm:$0xff] }
  0xc4   : > { %4982 = vmatprep.subr.bf16.mxu0 %v5213_v2  ;;  %v490_v25 = vld [vmem:[%s6059_s22 + $0x60] sm:$0xff]  ;;  %4681 = vst [vmem:[#allocation2 + $0x18] sm:$0xff] %v4647_v17   ;;  %v4662_v26 = vpack.c.bf16 %v489_v24, %v488_v23  ;;  %v491_v27 = vld [vmem:[%s6059_s22 + $0x68] sm:$0xff]  ;;  %v492_v28 = vld [vmem:[%s6059_s22 + $0x70] sm:$0xff]  ;;  %p4162_p8 = scmp.ne.s32.totalorder %s6731_s1, 0 }
  0xc5   : > { %v493_v29 = vld [vmem:[%s6059_s22 + $0x78] sm:$0xff]  ;;  %4682 = vst [vmem:[#allocation2 + $0x20] sm:$0xff] %v4652_v21   ;;  %4683 = vst [vmem:[#allocation2 + $0x28] sm:$0xff] %v4657_v22   ;;  %v4667_v30 = vpack.c.bf16 %v491_v27, %v490_v25  ;;  %v574_v32 = vld [vmem:[%s404_s27] sm:$0xff] }
  0xc6   : > { %v4672_v31 = vpack.c.bf16 %v493_v29, %v492_v28  ;;  %v575_v33 = vld [vmem:[%s404_s27 + $0x8] sm:$0xff]  ;;  %4684 = vst [vmem:[#allocation2 + $0x30] sm:$0xff] %v4662_v26   ;;  %v5216_v35 = vld [vmem:[#allocation11 + $0x10] sm:$0xff]   ;;  %v5218_v38 = vld [vmem:[#allocation11] sm:$0xff]  }
  0xc7   : > { %4983 = vmatpush3.bf16.msra.mxu0 %v5213_v2  ;;  %v4677_v34 = vpack.c.bf16 %v575_v33, %v574_v32  ;;  %4685 = vst [vmem:[#allocation2 + $0x38] sm:$0xff] %v4667_v30   ;;  %v5217_v37 = vld [vmem:[#allocation11 + $0x8] sm:$0xff]   ;;  %v6106_v48 = vld [vmem:[%s6730_s3] ss:$0 sm:$0xff] }
  0xc8   : > { %4984 = vmatprep.subr.bf16.mxu0 %v5214_v3  ;;  %4686 = vst [vmem:[#allocation2 + $0x40] sm:$0xff] %v4672_v31  }
  0xc9   : > { %4687 = vst [vmem:[#allocation2 + $0x48] sm:$0xff] %v4677_v34   ;;  %v5219_v36 = vld [vmem:[#allocation2] sm:$0xff]  }
  0xca   : > { %4994 = vmatprep.mubr.bf16.mxu0 %v5219_v36  ;;  %v5220_v39 = vld [vmem:[#allocation2 + $0x8] sm:$0xff]   ;;  %v5221_v40 = vld [vmem:[#allocation2 + $0x10] sm:$0xff]  }
  0xcb   : > { %4985 = vmatpush3.bf16.msra.mxu0 %v5214_v3  ;;  %v5222_v41 = vld [vmem:[#allocation2 + $0x18] sm:$0xff]  }
  0xcc   : > { %4986 = vmatprep.subr.bf16.mxu0 %v5215_v11  ;;  %v5223_v42 = vld [vmem:[#allocation2 + $0x20] sm:$0xff]   ;;  %v5224_v43 = vld [vmem:[#allocation2 + $0x28] sm:$0xff]  }
  0xcd   : > { %v5225_v44 = vld [vmem:[#allocation2 + $0x30] sm:$0xff]  }
  0xce   : > { %v5226_v45 = vld [vmem:[#allocation2 + $0x38] sm:$0xff]  }
  0xcf   : > { %4987 = vmatpush3.bf16.msra.mxu0 %v5215_v11  ;;  %v5227_v46 = vld [vmem:[#allocation2 + $0x40] sm:$0xff]  }
  0xd0   : > { %4988 = vmatprep.subr.bf16.mxu0 %v5216_v35  ;;  %v5228_v47 = vld [vmem:[#allocation2 + $0x48] sm:$0xff]  }
  0xd3   : > { %4989 = vmatpush3.bf16.msra.mxu0 %v5216_v35 }
  0xd4   : > { %4990 = vmatprep.subr.bf16.mxu0 %v5217_v37 }
  0xd7   : > { %4991 = vmatpush3.bf16.msra.mxu0 %v5217_v37 }
  0xd8   : > { %4992 = vmatprep.subr.bf16.mxu0 %v5218_v38 }
  0xdb   : > { %4993 = vmatpush3.bf16.msra.mxu0 %v5218_v38 }
  0xde   : > { %4995 = vmatmul.mubr.bf16.vlgmr.msra.gmra.mxu0 %v5220_v39 }
  0xdf   : > { %4998 = vmatprep.mubr.bf16.mxu0 %v5221_v40 }
  0xe6   : > { %4999 = vmatmul.mubr.bf16.gmra.mxu0 %v5222_v41 }
  0xe7   : > { %5002 = vmatprep.mubr.bf16.mxu0 %v5223_v42 }
  0xee   : > { %5003 = vmatmul.mubr.bf16.gmra.mxu0 %v5224_v43 }
  0xef   : > { %5006 = vmatprep.mubr.bf16.mxu0 %v5225_v44 }
  0xf6   : > { %5007 = vmatmul.mubr.bf16.gmra.mxu0 %v5226_v45 }
  0xf7   : > { %5010 = vmatprep.mubr.bf16.mxu0 %v5227_v46 }
  0xfe   : > { %5011 = vmatmul.mubr.bf16.gmra.mxu0 %v5228_v47 }
 0x19e   : > { %v4996_v49 = vpop.f32.mrf.mxu0 }
 0x19f   : > { %v780_v50 = vadd.f32 %v4996_v49, %v6106_v48 }
 0x1a0   : > { %v771_v51 = vpop.f32.mrf.mxu0 }
 0x1a1   : > { %vm852_vm0 = vcmp.gt.f32.partialorder %v780_v50, 0.0  ;;  %v872_v52 = vmul.f32 0.1, %v780_v50  ;;  %v772_v53 = vadd.f32 %v6106_v48, %v771_v51 }
 0x1a2   : > { %v4997_v54 = vpop.f32.mrf.mxu0 }
 0x1a3   : > { %v892_v55 = vsel %vm852_vm0, %v780_v50, %v872_v52  ;;  %vm850_vm1 = vcmp.gt.f32.partialorder %v772_v53, 0.0  ;;  %v870_v56 = vmul.f32 0.1, %v772_v53  ;;  %v783_v57 = vadd.f32 %v4997_v54, %v6106_v48 }
 0x1a4   : > { %912 = vst [vmem:[#allocation3 + $0x18] sm:$0xff] %v892_v55  ;;  %v774_v58 = vpop.f32.mrf.mxu0 }
 0x1a5   : > { %v890_v59 = vsel %vm850_vm1, %v772_v53, %v870_v56  ;;  %vm853_vm2 = vcmp.gt.f32.partialorder %v783_v57, 0.0  ;;  %v873_v60 = vmul.f32 0.1, %v783_v57  ;;  %v775_v61 = vadd.f32 %v6106_v48, %v774_v58 }
 0x1a6   : > { %910 = vst [vmem:[#allocation3 + $0x8] sm:$0xff] %v890_v59  ;;  %v5000_v62 = vpop.f32.mrf.mxu0 }
 0x1a7   : > { %v893_v63 = vsel %vm853_vm2, %v783_v57, %v873_v60  ;;  %vm851_vm3 = vcmp.gt.f32.partialorder %v775_v61, 0.0  ;;  %v871_v0 = vmul.f32 0.1, %v775_v61  ;;  %v796_v1 = vadd.f32 %v5000_v62, %v6106_v48 }
 0x1a8   : > { %913 = vst [vmem:[#allocation3 + $0x20] sm:$0xff] %v893_v63  ;;  %v787_v2 = vpop.f32.mrf.mxu0 }
 0x1a9   : > { %v891_v3 = vsel %vm851_vm3, %v775_v61, %v871_v0  ;;  %vm856_vm4 = vcmp.gt.f32.partialorder %v796_v1, 0.0  ;;  %v876_v4 = vmul.f32 0.1, %v796_v1  ;;  %v788_v5 = vadd.f32 %v6106_v48, %v787_v2 }
 0x1aa   : > { %911 = vst [vmem:[#allocation3 + $0x10] sm:$0xff] %v891_v3  ;;  %v5001_v6 = vpop.f32.mrf.mxu0 }
 0x1ab   : > { %v896_v7 = vsel %vm856_vm4, %v796_v1, %v876_v4  ;;  %vm854_vm5 = vcmp.gt.f32.partialorder %v788_v5, 0.0  ;;  %v874_v8 = vmul.f32 0.1, %v788_v5  ;;  %v799_v9 = vadd.f32 %v5001_v6, %v6106_v48 }
 0x1ac   : > { %916 = vst [vmem:[#allocation3 + $0x38] sm:$0xff] %v896_v7  ;;  %v790_v10 = vpop.f32.mrf.mxu0 }
 0x1ad   : > { %v894_v11 = vsel %vm854_vm5, %v788_v5, %v874_v8  ;;  %vm857_vm6 = vcmp.gt.f32.partialorder %v799_v9, 0.0  ;;  %v877_v12 = vmul.f32 0.1, %v799_v9  ;;  %v791_v13 = vadd.f32 %v6106_v48, %v790_v10 }
 0x1ae   : > { %914 = vst [vmem:[#allocation3 + $0x28] sm:$0xff] %v894_v11  ;;  %v5004_v14 = vpop.f32.mrf.mxu0 }
 0x1af   : > { %v897_v15 = vsel %vm857_vm6, %v799_v9, %v877_v12  ;;  %vm855_vm7 = vcmp.gt.f32.partialorder %v791_v13, 0.0  ;;  %v875_v16 = vmul.f32 0.1, %v791_v13  ;;  %v812_v17 = vadd.f32 %v5004_v14, %v6106_v48 }
 0x1b0   : > { %917 = vst [vmem:[#allocation3 + $0x40] sm:$0xff] %v897_v15  ;;  %v803_v18 = vpop.f32.mrf.mxu0 }
 0x1b1   : > { %v895_v19 = vsel %vm855_vm7, %v791_v13, %v875_v16  ;;  %vm860_vm8 = vcmp.gt.f32.partialorder %v812_v17, 0.0  ;;  %v880_v20 = vmul.f32 0.1, %v812_v17  ;;  %v804_v21 = vadd.f32 %v6106_v48, %v803_v18 }
 0x1b2   : > { %915 = vst [vmem:[#allocation3 + $0x30] sm:$0xff] %v895_v19  ;;  %v5005_v22 = vpop.f32.mrf.mxu0 }
 0x1b3   : > { %v900_v23 = vsel %vm860_vm8, %v812_v17, %v880_v20  ;;  %vm858_vm9 = vcmp.gt.f32.partialorder %v804_v21, 0.0  ;;  %v878_v24 = vmul.f32 0.1, %v804_v21  ;;  %v815_v25 = vadd.f32 %v5005_v22, %v6106_v48 }
 0x1b4   : > { %920 = vst [vmem:[#allocation3 + $0x58] sm:$0xff] %v900_v23  ;;  %v806_v26 = vpop.f32.mrf.mxu0 }
 0x1b5   : > { %v898_v27 = vsel %vm858_vm9, %v804_v21, %v878_v24  ;;  %vm861_vm10 = vcmp.gt.f32.partialorder %v815_v25, 0.0  ;;  %v881_v28 = vmul.f32 0.1, %v815_v25  ;;  %v807_v29 = vadd.f32 %v6106_v48, %v806_v26 }
 0x1b6   : > { %918 = vst [vmem:[#allocation3 + $0x48] sm:$0xff] %v898_v27  ;;  %v5008_v30 = vpop.f32.mrf.mxu0 }
 0x1b7   : > { %v901_v31 = vsel %vm861_vm10, %v815_v25, %v881_v28  ;;  %vm859_vm11 = vcmp.gt.f32.partialorder %v807_v29, 0.0  ;;  %v879_v32 = vmul.f32 0.1, %v807_v29  ;;  %v828_v33 = vadd.f32 %v5008_v30, %v6106_v48 }
 0x1b8   : > { %921 = vst [vmem:[#allocation3 + $0x60] sm:$0xff] %v901_v31  ;;  %v819_v34 = vpop.f32.mrf.mxu0 }
 0x1b9   : > { %v899_v35 = vsel %vm859_vm11, %v807_v29, %v879_v32  ;;  %vm864_vm12 = vcmp.gt.f32.partialorder %v828_v33, 0.0  ;;  %v884_v36 = vmul.f32 0.1, %v828_v33  ;;  %v820_v37 = vadd.f32 %v6106_v48, %v819_v34 }
 0x1ba   : > { %919 = vst [vmem:[#allocation3 + $0x50] sm:$0xff] %v899_v35  ;;  %v5009_v38 = vpop.f32.mrf.mxu0 }
 0x1bb   : > { %v904_v39 = vsel %vm864_vm12, %v828_v33, %v884_v36  ;;  %vm862_vm13 = vcmp.gt.f32.partialorder %v820_v37, 0.0  ;;  %v882_v40 = vmul.f32 0.1, %v820_v37  ;;  %v831_v41 = vadd.f32 %v5009_v38, %v6106_v48 }
 0x1bc   : > { %924 = vst [vmem:[#allocation3 + $0x78] sm:$0xff] %v904_v39  ;;  %v822_v42 = vpop.f32.mrf.mxu0 }
 0x1bd   : > { %v902_v43 = vsel %vm862_vm13, %v820_v37, %v882_v40  ;;  %vm865_vm14 = vcmp.gt.f32.partialorder %v831_v41, 0.0  ;;  %v885_v44 = vmul.f32 0.1, %v831_v41  ;;  %v823_v45 = vadd.f32 %v6106_v48, %v822_v42 }
 0x1be   : > { %922 = vst [vmem:[#allocation3 + $0x68] sm:$0xff] %v902_v43  ;;  %v5012_v46 = vpop.f32.mrf.mxu0 }
 0x1bf   : > { %v905_v47 = vsel %vm865_vm14, %v831_v41, %v885_v44  ;;  %vm863_vm15 = vcmp.gt.f32.partialorder %v823_v45, 0.0  ;;  %v883_v49 = vmul.f32 0.1, %v823_v45  ;;  %v844_v50 = vadd.f32 %v5012_v46, %v6106_v48 }
 0x1c0   : > { %925 = vst [vmem:[#allocation3 + $0x80] sm:$0xff] %v905_v47  ;;  %v835_v51 = vpop.f32.mrf.mxu0 }
 0x1c1   : > { %v903_v52 = vsel %vm863_vm15, %v823_v45, %v883_v49  ;;  %vm868_vm0 = vcmp.gt.f32.partialorder %v844_v50, 0.0  ;;  %v888_v53 = vmul.f32 0.1, %v844_v50  ;;  %v836_v54 = vadd.f32 %v6106_v48, %v835_v51 }
 0x1c2   : > { %923 = vst [vmem:[#allocation3 + $0x70] sm:$0xff] %v903_v52  ;;  %v5013_v55 = vpop.f32.mrf.mxu0 }
 0x1c3   : > { %v908_v56 = vsel %vm868_vm0, %v844_v50, %v888_v53  ;;  %vm866_vm1 = vcmp.gt.f32.partialorder %v836_v54, 0.0  ;;  %v886_v57 = vmul.f32 0.1, %v836_v54  ;;  %v847_v58 = vadd.f32 %v5013_v55, %v6106_v48 }
 0x1c4   : > { %928 = vst [vmem:[#allocation3 + $0x98] sm:$0xff] %v908_v56  ;;  %v838_v59 = vpop.f32.mrf.mxu0 }
 0x1c5   : > { %v906_v60 = vsel %vm866_vm1, %v836_v54, %v886_v57  ;;  %vm869_vm2 = vcmp.gt.f32.partialorder %v847_v58, 0.0  ;;  %v889_v61 = vmul.f32 0.1, %v847_v58  ;;  %v839_v62 = vadd.f32 %v6106_v48, %v838_v59 }
 0x1c6   : > { %926 = vst [vmem:[#allocation3 + $0x88] sm:$0xff] %v906_v60  ;;  %933 = sbr.rel (%p4162_p8) target bundleno = 461 (0x1cd), region = 72 }
 0x1c7   : > { %v909_v63 = vsel %vm869_vm2, %v847_v58, %v889_v61  ;;  %vm867_vm3 = vcmp.gt.f32.partialorder %v839_v62, 0.0  ;;  %v887_v0 = vmul.f32 0.1, %v839_v62 }
 0x1c8   : > { %929 = vst [vmem:[#allocation3 + $0xa0] sm:$0xff] %v909_v63 }
 0x1c9   : > { %v907_v1 = vsel %vm867_vm3, %v839_v62, %v887_v0 }
 0x1ca   : > { %927 = vst [vmem:[#allocation3 + $0x90] sm:$0xff] %v907_v1 }
 0x1cb   : > { %v5708_v2 = vmov 0.0  }
 0x1cc   : > { %934 = vst [vmem:[#allocation3 + $0x8] sm:$0xff] %v5708_v2  ;;  %935 = vst [vmem:[#allocation3 + $0x10] sm:$0xff] %v5708_v2 }
 0x1cd PF: > { %s6732_s17 = sld [smem:[#allocation24_spill]] }
 0x1d3   : > { %p4163_p6 = scmp.ne.s32.totalorder %s6732_s17, 1 }
 0x1d5   : > { %939 = sbr.rel (%p4163_p6) target bundleno = 476 (0x1dc), region = 76 }
 0x1da   : > { %v5709_v48 = vmov 0.0  }
 0x1db   : > { %940 = vst [vmem:[#allocation3 + $0x98] sm:$0xff] %v5709_v48  ;;  %941 = vst [vmem:[#allocation3 + $0xa0] sm:$0xff] %v5709_v48 }
 0x1dc PF: > { %v5229_v3 = vld [vmem:[#allocation13 + $0x78] sm:$0xff]   ;;  %v5233_v7 = vld [vmem:[#allocation13 + $0x70] sm:$0xff]   ;;  %v942_v8 = vlaneseq  ;;  %v5237_v12 = vld [vmem:[#allocation13 + $0x68] sm:$0xff]   ;;  %s6733_s16 = sld [smem:[#allocation63_spill]]  ;;  %s3931_s23 = sshll.u32 %s6130_s11, 4  ;;  %s6551_s23 = int_to_ptr.vmem [resolvable:$true] %s3931_s23 }
 0x1dd   : > { %v5230_v4 = vld [vmem:[#allocation13 + $0x38] sm:$0xff]   ;;  %4706 = vmatprep.subr.bf16.mxu1 %v5229_v3  ;;  %v5234_v9 = vld [vmem:[#allocation13 + $0x30] sm:$0xff]   ;;  %v5238_v14 = vld [vmem:[#allocation13 + $0x28] sm:$0xff]   ;;  %s6780_s0 = sld [smem:[#allocation24_spill]]  ;;  %s3916_s13 = scalar_lea.sflag [#allocation7], %s6053_s26 }
 0x1de   : > { %v5231_v5 = vld [vmem:[#allocation13 + $0xf8] sm:$0xff]   ;;  %4707 = vmatpush3.bf16.msra.mxu1 %v5230_v4  ;;  %v5235_v10 = vld [vmem:[#allocation13 + $0xf0] sm:$0xff]   ;;  %v6134_v13 = vshrl.u32 %v942_v8, 7  ;;  %v5239_v15 = vld [vmem:[#allocation13 + $0xe8] sm:$0xff]   ;;  %s6781_s12 = sld [smem:[#allocation25_spill]]  ;;  %s5541_s3 = scalar_lea.vmem %s6551_s23, 2048 }
 0x1df   : > { %v5232_v6 = vld [vmem:[#allocation13 + $0xb8] sm:$0xff]   ;;  %4770 = vmatprep.subr.bf16.mxu0 %v5231_v5  ;;  %4708 = vmatprep.subr.bf16.mxu1 %v5233_v7  ;;  %v5236_v11 = vld [vmem:[#allocation13 + $0xb0] sm:$0xff]   ;;  %v5240_v16 = vld [vmem:[#allocation13 + $0xa8] sm:$0xff]   ;;  %s6782_s25 = sld [smem:[#allocation64_spill]]  ;;  %p5542_p9 = scmp.ne.s32.totalorder %s6551_s23, %s5541_s3 }
 0x1e0   : > { %4771 = vmatpush3.bf16.msra.mxu0 %v5232_v6  ;;  %v5241_v17 = vld [vmem:[#allocation13 + $0x60] sm:$0xff]   ;;  %v944_v18 = vadd.s32 8, %v6134_v13  ;;  %v963_v21 = vand.u32 15, %v6134_v13  ;;  %v5245_v23 = vld [vmem:[#allocation13 + $0x58] sm:$0xff]   ;;  %v945_v26 = vadd.s32 16, %v6134_v13  ;;  %v946_v30 = vadd.s32 24, %v6134_v13 }
 0x1e1   : > { %4772 = vmatprep.subr.bf16.mxu0 %v5235_v10  ;;  %v5242_v19 = vld [vmem:[#allocation13 + $0x20] sm:$0xff]   ;;  %v5246_v25 = vld [vmem:[#allocation13 + $0x18] sm:$0xff]   ;;  %v5249_v31 = vld [vmem:[#allocation13 + $0x50] sm:$0xff]   ;;  %v947_v39 = vadd.s32 32, %v6134_v13  ;;  %v948_v43 = vadd.s32 40, %v6134_v13  ;;  %v950_v50 = vadd.s32 56, %v6134_v13 }
 0x1e2   : > { %4709 = vmatpush3.bf16.msra.mxu1 %v5234_v9  ;;  %v5243_v20 = vld [vmem:[#allocation13 + $0xe0] sm:$0xff]   ;;  %v970_v24 = vand.u32 15, %v944_v18  ;;  %v5247_v27 = vld [vmem:[#allocation13 + $0xd8] sm:$0xff]   ;;  %v6139_v28 = vadd.s32 4294967295, %v963_v21  ;;  %v5250_v33 = vld [vmem:[#allocation13 + $0x10] sm:$0xff]   ;;  %v977_v34 = vand.u32 15, %v945_v26 }
 0x1e3   : > { %4710 = vmatprep.subr.bf16.mxu1 %v5237_v12  ;;  %v5244_v22 = vld [vmem:[#allocation13 + $0xa0] sm:$0xff]   ;;  %v5248_v29 = vld [vmem:[#allocation13 + $0x98] sm:$0xff]   ;;  %v5251_v35 = vld [vmem:[#allocation13 + $0xd0] sm:$0xff]   ;;  %v984_v37 = vand.u32 15, %v946_v30  ;;  %v991_v47 = vand.u32 15, %v947_v39  ;;  %v998_v52 = vand.u32 15, %v948_v43 }
 0x1e4   : > { %4773 = vmatpush3.bf16.msra.mxu0 %v5236_v11  ;;  %v6142_v32 = vadd.s32 1, %v970_v24  ;;  %vm1183_vm4 = vcmp.ge.s32.totalorder %v6139_v28, 0  ;;  %v5252_v36 = vld [vmem:[#allocation13 + $0x90] sm:$0xff]   ;;  %v5253_v38 = vld [vmem:[#allocation13 + $0x48] sm:$0xff]   ;;  %v6147_v41 = vadd.s32 4294967295, %v977_v34  ;;  %v5257_v46 = vld [vmem:[#allocation13 + $0x40] sm:$0xff]  }
 0x1e5   : > { %4774 = vmatprep.subr.bf16.mxu0 %v5239_v15  ;;  %v5254_v40 = vld [vmem:[#allocation13 + $0x8] sm:$0xff]   ;;  %v6150_v45 = vadd.s32 1, %v984_v37  ;;  %v5258_v49 = vld [vmem:[#allocation13] sm:$0xff]   ;;  %v1151_v53 = vld [vmem:[#allocation3 + $0x7] sm:$0xff]  ;;  %v949_v56 = vadd.s32 48, %v6134_v13  ;;  %v1012_v57 = vand.u32 15, %v950_v50  ;;  %s6783_s15 = smov %s6782_s25 }
 0x1e6   : > { %4711 = vmatpush3.bf16.msra.mxu1 %v5238_v14  ;;  %vm1504_vm5 = vcmp.lt.s32.totalorder %v6142_v32, 16  ;;  %v5255_v42 = vld [vmem:[#allocation13 + $0xc8] sm:$0xff]   ;;  %v5259_v51 = vld [vmem:[#allocation13 + $0xc0] sm:$0xff]   ;;  %v1359_v55 = vld [vmem:[#allocation3 + $0x8] sm:$0xff]  ;;  %vm1185_vm6 = vcmp.ge.s32.totalorder %v6147_v41, 0  ;;  %v1263_v58 = vsel %vm1183_vm4, %v1151_v53, 0.0 }
 0x1e7   : > { %4712 = vmatprep.subr.bf16.mxu1 %v5241_v17  ;;  %v5256_v44 = vld [vmem:[#allocation13 + $0x88] sm:$0xff]   ;;  %v1152_v54 = vld [vmem:[#allocation3 + $0xf] sm:$0xff]  ;;  %v4501_v61 = vpack.c.bf16 %v1359_v55, %v1359_v55  ;;  %v4485_v62 = vpack.c.bf16 %v1263_v58, %v1263_v58  ;;  %vm1506_vm7 = vcmp.lt.s32.totalorder %v6150_v45, 16  ;;  %v6158_v3 = vadd.s32 4294967295, %v991_v47  ;;  %v6178_v26 = vld [vmem:[#allocation3 + $0x27] sm:$0xff]  ;;  %s4454_s2 = sshll.u32 %s6780_s0, 4 }
 0x1e8   : > { %4775 = vmatpush3.bf16.msra.mxu0 %v5240_v16  ;;  %v4486_v59 = vpack.c.bf16 %v1152_v54, %v1152_v54  ;;  %v1360_v60 = vld [vmem:[#allocation3 + $0x10] sm:$0xff]  ;;  %v5264_v1 = vld [vmem:[#allocation13 + $0x178] sm:$0xff]   ;;  %v6160_v4 = vadd.s32 1, %v998_v52  ;;  %v6162_v5 = vadd.s32 1, %v1012_v57  ;;  %v1664_v9 = vld [vmem:[#allocation3 + $0x1f] sm:$0xff]  ;;  %v1005_v10 = vand.u32 15, %v949_v56 }
 0x1e9   : > { %4776 = vmatprep.subr.bf16.mxu0 %v5243_v20  ;;  %v4502_v63 = vpack.c.bf16 %v1360_v60, %v1360_v60  ;;  %v5263_v0 = vld [vmem:[#allocation13 + $0x80] sm:$0xff]   ;;  %1439 = vst [vmem:[#allocation4 + $0x4] sm:$0xf] %v4501_v61  ;;  %1343 = vst [vmem:[#allocation4] sm:$0xf] %v4485_v62  ;;  %v4534_v14 = vpack.c.bf16 %v1664_v9, %v1664_v9  ;;  %v1361_v16 = vld [vmem:[#allocation3 + $0x18] sm:$0xff] }
 0x1ea   : > { %4713 = vmatpush3.bf16.msra.mxu1 %v5242_v19  ;;  %1344 = vst [vmem:[#allocation4 + $0x24] sm:$0xf] %v4486_v59  ;;  %v1455_v2 = vld [vmem:[#allocation3 + $0x9] sm:$0xff]  ;;  %v1456_v48 = vld [vmem:[#allocation3 + $0x11] sm:$0xff]  ;;  %v1362_v19 = vld [vmem:[#allocation3 + $0x20] sm:$0xff]  ;;  %v4503_v20 = vpack.c.bf16 %v1361_v16, %v1361_v16  ;;  %vm1187_vm8 = vcmp.ge.s32.totalorder %v6158_v3, 0 }
 0x1eb   : > { %4714 = vmatprep.subr.bf16.mxu1 %v5245_v23  ;;  %1440 = vst [vmem:[#allocation4 + $0x28] sm:$0xf] %v4502_v63  ;;  %v1568_v6 = vsel %vm1504_vm5, %v1456_v48, 0.0  ;;  %v4517_v7 = vpack.c.bf16 %v1455_v2, %v1455_v2  ;;  %v1663_v8 = vld [vmem:[#allocation3 + $0x17] sm:$0xff]  ;;  %1760 = vst [vmem:[#allocation4 + $0x30] sm:$0xf] %v4534_v14  ;;  %v4504_v21 = vpack.c.bf16 %v1362_v19, %v1362_v19 }
 0x1ec   : > { %4777 = vmatpush3.bf16.msra.mxu0 %v5244_v22  ;;  %v4518_v11 = vpack.c.bf16 %v1568_v6, %v1568_v6  ;;  %v1679_v12 = vsel %vm1183_vm4, %v1663_v8, 0.0  ;;  %v1265_v15 = vsel %vm1185_vm6, %v1663_v8, 0.0  ;;  %1346 = vst [vmem:[#allocation4 + $0x6c] sm:$0xf] %v4534_v14  ;;  %v1457_v22 = vld [vmem:[#allocation3 + $0x19] sm:$0xff]  ;;  %v6170_v23 = vld [vmem:[#allocation3 + $0x21] sm:$0xff] }
 0x1ed   : > { %4778 = vmatprep.subr.bf16.mxu0 %v5247_v27  ;;  %1647 = vst [vmem:[#allocation4 + $0x8] sm:$0xf] %v4517_v7  ;;  %v4533_v17 = vpack.c.bf16 %v1679_v12, %v1679_v12  ;;  %v4487_v18 = vpack.c.bf16 %v1265_v15, %v1265_v15  ;;  %vm1508_vm9 = vcmp.lt.s32.totalorder %v6160_v4, 16  ;;  %vm1510_vm10 = vcmp.lt.s32.totalorder %v6162_v5, 16  ;;  %1441 = vst [vmem:[#allocation4 + $0x4c] sm:$0xf] %v4503_v20 }
 0x1ee   : > { %4715 = vmatpush3.bf16.msra.mxu1 %v5246_v25  ;;  %1648 = vst [vmem:[#allocation4 + $0x2c] sm:$0xf] %v4518_v11  ;;  %v1570_v24 = vsel %vm1506_vm7, %v6170_v23, 0.0  ;;  %v4519_v25 = vpack.c.bf16 %v1457_v22, %v1457_v22  ;;  %v1666_v27 = vld [vmem:[#allocation3 + $0x2f] sm:$0xff]  ;;  %v6182_v30 = vadd.s32 4294967295, %v1005_v10  ;;  %v1681_v34 = vsel %vm1185_vm6, %v6178_v26, 0.0 }
 0x1ef   : > { %4716 = vmatprep.subr.bf16.mxu1 %v5249_v31  ;;  %1759 = vst [vmem:[#allocation4 + $0xc] sm:$0xf] %v4533_v17  ;;  %1345 = vst [vmem:[#allocation4 + $0x48] sm:$0xf] %v4487_v18  ;;  %v6185_v31 = vadd.s32 64, %v6134_v13  ;;  %v5268_v37 = vld [vmem:[#allocation13 + $0x138] sm:$0xff]  }
 0x1f0   : > { %4779 = vmatpush3.bf16.msra.mxu0 %v5248_v29  ;;  %v6180_v29 = vld [vmem:[#allocation3 + $0x41] sm:$0xff]  ;;  %1855 = vst [vmem:[#allocation4 + $0x10] sm:$0xf] %v4503_v20  ;;  %1442 = vst [vmem:[#allocation4 + $0x70] sm:$0xf] %v4504_v21  ;;  %v1364_v43 = vld [vmem:[#allocation3 + $0x30] sm:$0xff] }
 0x1f1   : > { %4780 = vmatprep.subr.bf16.mxu0 %v5251_v35  ;;  %v4536_v35 = vpack.c.bf16 %v1666_v27, %v1666_v27  ;;  %1856 = vst [vmem:[#allocation4 + $0x34] sm:$0xf] %v4504_v21  ;;  %1649 = vst [vmem:[#allocation4 + $0x50] sm:$0xf] %v4519_v25  ;;  %v4506_v50 = vpack.c.bf16 %v1364_v43, %v1364_v43  ;;  %v5272_v53 = vld [vmem:[#allocation13 + $0x170] sm:$0xff]   ;;  %v1459_v54 = vld [vmem:[#allocation3 + $0x29] sm:$0xff] }
 0x1f2   : > { %4717 = vmatpush3.bf16.msra.mxu1 %v5250_v33  ;;  %v4520_v33 = vpack.c.bf16 %v1570_v24, %v1570_v24  ;;  %1967 = vst [vmem:[#allocation4 + $0x14] sm:$0xf] %v4519_v25  ;;  %v5262_v52 = vld [vmem:[#allocation4 + $0x4] ss:$36 sps:$4 sm:$0xff]   ;;  %vm1189_vm11 = vcmp.ge.s32.totalorder %v6182_v30, 0  ;;  %v1019_v56 = vand.u32 15, %v6185_v31  ;;  %v4521_v59 = vpack.c.bf16 %v1459_v54, %v1459_v54 }
 0x1f3   : > { %4718 = vmatprep.subr.bf16.mxu1 %v5253_v38  ;;  %v4535_v38 = vpack.c.bf16 %v1681_v34, %v1681_v34  ;;  %1762 = vst [vmem:[#allocation4 + $0x78] sm:$0xf] %v4536_v35  ;;  %1348 = vst [vmem:[#allocation4 + $0xb4] sm:$0xf] %v4536_v35  ;;  %v6199_v55 = vld [vmem:[#allocation3 + $0x31] sm:$0xff]  ;;  %3366 = vmatprep.mubr.bf16.mxu1 %v5262_v52  ;;  %v5275_v57 = vld [vmem:[#allocation13 + $0x130] sm:$0xff]  }
 0x1f4   : > { %4781 = vmatpush3.bf16.msra.mxu0 %v5252_v36  ;;  %v2210_v36 = vsel %vm1506_vm7, %v6180_v29, 0.0  ;;  %1650 = vst [vmem:[#allocation4 + $0x74] sm:$0xf] %v4520_v33  ;;  %2080 = vst [vmem:[#allocation4 + $0x3c] sm:$0xf] %v4536_v35  ;;  %v1572_v58 = vsel %vm1508_vm9, %v6199_v55, 0.0 }
 0x1f5   : > { %4782 = vmatprep.subr.bf16.mxu0 %v5255_v42  ;;  %v4616_v39 = vpack.c.bf16 %v2210_v36, %v2210_v36  ;;  %v1363_v42 = vld [vmem:[#allocation3 + $0x28] sm:$0xff]  ;;  %1761 = vst [vmem:[#allocation4 + $0x54] sm:$0xf] %v4535_v38  ;;  %1444 = vst [vmem:[#allocation4 + $0xb8] sm:$0xf] %v4506_v50  ;;  %v6206_v60 = vld [vmem:[#allocation3 + $0x37] sm:$0xff]  ;;  %v4522_v2 = vpack.c.bf16 %v1572_v58, %v1572_v58 }
 0x1f6   : > { %4719 = vmatpush3.bf16.msra.mxu1 %v5254_v40  ;;  %v1267_v40 = vsel %vm1187_vm8, %v6178_v26, 0.0  ;;  %2176 = vst [vmem:[#allocation4 + $0x40] sm:$0xf] %v4506_v50  ;;  %1858 = vst [vmem:[#allocation4 + $0x7c] sm:$0xf] %v4506_v50  ;;  %v1668_v61 = vld [vmem:[#allocation3 + $0x3f] sm:$0xff] }
 0x1f7   : > { %4720 = vmatprep.subr.bf16.mxu1 %v5257_v46  ;;  %v5260_v46 = vld [vmem:[#allocation4] ss:$36 sps:$4 sm:$0xff]   ;;  %v4489_v47 = vpack.c.bf16 %v1267_v40, %v1267_v40  ;;  %2290 = vst [vmem:[#allocation4 + $0x8c] sm:$0xf] %v4616_v39  ;;  %v952_v62 = vadd.s32 72, %v6134_v13  ;;  %v953_v63 = vadd.s32 80, %v6134_v13  ;;  %v4538_v6 = vpack.c.bf16 %v1668_v61, %v1668_v61 }
 0x1f8   : > { %4783 = vmatpush3.bf16.msra.mxu0 %v5256_v44  ;;  %v1574_v44 = vsel %vm1510_vm10, %v6180_v29, 0.0  ;;  %v1683_v48 = vsel %vm1187_vm8, %v6206_v60, 0.0  ;;  %v5269_v7 = vld [vmem:[#allocation4 + $0x4c] ss:$36 sps:$4 sm:$0xff]   ;;  %1651 = vst [vmem:[#allocation4 + $0x98] sm:$0xf] %v4521_v59 }
 0x1f9   : > { %4784 = vmatprep.subr.bf16.mxu0 %v5259_v51  ;;  %v4524_v51 = vpack.c.bf16 %v1574_v44, %v1574_v44  ;;  %1347 = vst [vmem:[#allocation4 + $0x90] sm:$0xf] %v4489_v47  ;;  %v4537_v8 = vpack.c.bf16 %v1683_v48, %v1683_v48  ;;  %v1269_v9 = vsel %vm1189_vm11, %v6206_v60, 0.0  ;;  %1969 = vst [vmem:[#allocation4 + $0x5c] sm:$0xf] %v4521_v59  ;;  %v5280_v10 = vld [vmem:[#allocation13 + $0x168] sm:$0xff]  }
 0x1fa   : > { %4721 = vmatpush3.bf16.msra.mxu1 %v5258_v49  ;;  %v4505_v49 = vpack.c.bf16 %v1363_v42, %v1363_v42  ;;  %1652 = vst [vmem:[#allocation4 + $0xbc] sm:$0xf] %v4522_v2  ;;  %1764 = vst [vmem:[#allocation4 + $0xc0] sm:$0xf] %v4538_v6  ;;  %v4491_v11 = vpack.c.bf16 %v1269_v9, %v1269_v9  ;;  %v6216_v12 = vadd.s32 4294967295, %v1019_v56  ;;  %v1365_v15 = vld [vmem:[#allocation3 + $0x38] sm:$0xff] }
 0x1fb   : > { %4834 = vmatprep.subr.bf16.mxu1 %v5264_v1  ;;  %1654 = vst [vmem:[#allocation4 + $0x104] sm:$0xf] %v4524_v51  ;;  %v5267_v1 = vld [vmem:[#allocation4 + $0xc] ss:$36 sps:$4 sm:$0xff]   ;;  %1350 = vst [vmem:[#allocation4 + $0xfc] sm:$0xf] %v4538_v6  ;;  %v4507_v19 = vpack.c.bf16 %v1365_v15, %v1365_v15 }
 0x1fc   : > { %4785 = vmatpush3.bf16.msra.mxu0 %v5263_v0  ;;  %1443 = vst [vmem:[#allocation4 + $0x94] sm:$0xf] %v4505_v49  ;;  %2175 = vst [vmem:[#allocation4 + $0x1c] sm:$0xf] %v4505_v49  ;;  %v5265_v0 = vld [vmem:[#allocation4 + $0x8] ss:$36 sps:$4 sm:$0xff]   ;;  %3463 = vmatprep.mubr.bf16.mxu0 %v5267_v1 }
 0x1fd   : > { %1857 = vst [vmem:[#allocation4 + $0x58] sm:$0xf] %v4505_v49  ;;  %3367 = vmatmul.mubr.bf16.vlgmr.msra.gmra.mxu1 %v5260_v46  ;;  %2082 = vst [vmem:[#allocation4 + $0x84] sm:$0xf] %v4538_v6  ;;  %v5271_v14 = vld [vmem:[#allocation4 + $0x48] ss:$36 sps:$4 sm:$0xff]  }
 0x1fe   : > { %4835 = vmatpush3.bf16.msra.mxu1 %v5268_v37  ;;  %3374 = vmatprep.mubr.bf16.mxu1 %v5269_v7  ;;  %1763 = vst [vmem:[#allocation4 + $0x9c] sm:$0xf] %v4537_v8  ;;  %v1026_v16 = vand.u32 15, %v952_v62  ;;  %v5273_v17 = vld [vmem:[#allocation4 + $0x54] ss:$36 sps:$4 sm:$0xff]   ;;  %v5283_v18 = vld [vmem:[#allocation13 + $0x128] sm:$0xff]  }
 0x1ff   : > { %4836 = vmatprep.subr.bf16.mxu1 %v5272_v53  ;;  %3464 = vmatmul.mubr.bf16.vlgmr.msra.gmra.mxu0 %v5265_v0  ;;  %1349 = vst [vmem:[#allocation4 + $0xd8] sm:$0xf] %v4491_v11  ;;  %v1033_v20 = vand.u32 15, %v953_v63  ;;  %v954_v22 = vadd.s32 88, %v6134_v13  ;;  %v5276_v24 = vld [vmem:[#allocation4 + $0x50] ss:$36 sps:$4 sm:$0xff]  }
 0x200   : > { %3471 = vmatprep.mubr.bf16.mxu0 %v5273_v17  ;;  %v1366_v25 = vld [vmem:[#allocation3 + $0x40] sm:$0xff]  ;;  %1445 = vst [vmem:[#allocation4 + $0xdc] sm:$0xf] %v4507_v19  ;;  %vm1191_vm12 = vcmp.ge.s32.totalorder %v6216_v12, 0  ;;  %2177 = vst [vmem:[#allocation4 + $0x64] sm:$0xf] %v4507_v19 }
 0x201   : > { %1859 = vst [vmem:[#allocation4 + $0xa0] sm:$0xf] %v4507_v19  ;;  %v4508_v27 = vpack.c.bf16 %v1366_v25, %v1366_v25  ;;  %v5288_v31 = vld [vmem:[#allocation13 + $0x160] sm:$0xff]   ;;  %v1461_v33 = vld [vmem:[#allocation3 + $0x39] sm:$0xff]  ;;  %v6220_v34 = vadd.s32 1, %v1026_v16  ;;  %v6223_v35 = vadd.s32 96, %v6134_v13 }
 0x202   : > { %4837 = vmatpush3.bf16.msra.mxu1 %v5275_v57  ;;  %v4523_v36 = vpack.c.bf16 %v1461_v33, %v1461_v33  ;;  %v1669_v37 = vld [vmem:[#allocation3 + $0x47] sm:$0xff]  ;;  %v1670_v38 = vld [vmem:[#allocation3 + $0x4f] sm:$0xff]  ;;  %v6225_v39 = vadd.s32 4294967295, %v1033_v20  ;;  %v1888_v40 = vsel %vm1504_vm5, %v6170_v23, 0.0  ;;  %v1040_v52 = vand.u32 15, %v954_v22  ;;  %v1671_v8 = vld [vmem:[#allocation3 + $0x57] sm:$0xff] }
 0x203   : > { %v5277_v21 = vld [vmem:[#allocation4 + $0x94] ss:$36 sps:$4 sm:$0xff]   ;;  %4838 = vmatprep.subr.bf16.mxu1 %v5280_v10  ;;  %1446 = vst [vmem:[#allocation4 + $0x100] sm:$0xf] %v4508_v27  ;;  %v1685_v42 = vsel %vm1189_vm11, %v1669_v37, 0.0  ;;  %v4540_v43 = vpack.c.bf16 %v1670_v38, %v1670_v38  ;;  %v5291_v44 = vld [vmem:[#allocation13 + $0x120] sm:$0xff]   ;;  %v4566_v47 = vpack.c.bf16 %v1888_v40, %v1888_v40 }
 0x204   : > { %v1271_v46 = vsel %vm1191_vm12, %v1669_v37, 0.0  ;;  %2178 = vst [vmem:[#allocation4 + $0x88] sm:$0xf] %v4508_v27  ;;  %1860 = vst [vmem:[#allocation4 + $0xc4] sm:$0xf] %v4508_v27  ;;  %v4539_v51 = vpack.c.bf16 %v1685_v42, %v1685_v42  ;;  %v5293_v53 = vld [vmem:[#allocation13 + $0x1f8] sm:$0xff]  }
 0x205   : > { %3375 = vmatmul.mubr.bf16.gmra.mxu1 %v5271_v14  ;;  %v5279_v49 = vld [vmem:[#allocation4 + $0x90] ss:$36 sps:$4 sm:$0xff]   ;;  %v5281_v50 = vld [vmem:[#allocation4 + $0x9c] ss:$36 sps:$4 sm:$0xff]   ;;  %1653 = vst [vmem:[#allocation4 + $0xe0] sm:$0xf] %v4523_v36  ;;  %v4493_v23 = vpack.c.bf16 %v1271_v46, %v1271_v46  ;;  %4898 = vmatprep.subr.bf16.mxu0 %v5293_v53 }
 0x206   : > { %3382 = vmatprep.mubr.bf16.mxu1 %v5277_v21  ;;  %4839 = vmatpush3.bf16.msra.mxu1 %v5283_v18  ;;  %1971 = vst [vmem:[#allocation4 + $0xa4] sm:$0xf] %v4523_v36  ;;  %1766 = vst [vmem:[#allocation4 + $0x108] sm:$0xf] %v4540_v43  ;;  %vm1512_vm13 = vcmp.lt.s32.totalorder %v6220_v34, 16  ;;  %v5294_v54 = vld [vmem:[#allocation13 + $0x1b8] sm:$0xff]  }
 0x207   : > { %4840 = vmatprep.subr.bf16.mxu1 %v5288_v31  ;;  %3472 = vmatmul.mubr.bf16.gmra.mxu0 %v5276_v24  ;;  %1352 = vst [vmem:[#allocation4 + $0x144] sm:$0xf] %v4540_v43  ;;  %1968 = vst [vmem:[#allocation4 + $0x38] sm:$0xf] %v4566_v47  ;;  %v1047_v56 = vand.u32 15, %v6223_v35  ;;  %v1367_v58 = vld [vmem:[#allocation3 + $0x48] sm:$0xff] }
 0x208   : > { %2084 = vst [vmem:[#allocation4 + $0xcc] sm:$0xf] %v4540_v43  ;;  %3479 = vmatprep.mubr.bf16.mxu0 %v5281_v50  ;;  %1765 = vst [vmem:[#allocation4 + $0xe4] sm:$0xf] %v4539_v51  ;;  %v5284_v57 = vld [vmem:[#allocation4 + $0x98] ss:$36 sps:$4 sm:$0xff]   ;;  %4899 = vmatpush3.bf16.msra.mxu0 %v5294_v54  ;;  %v4509_v63 = vpack.c.bf16 %v1367_v58, %v1367_v58 }
 0x209   : > { %1351 = vst [vmem:[#allocation4 + $0x120] sm:$0xf] %v4493_v23  ;;  %v1368_v59 = vld [vmem:[#allocation3 + $0x50] sm:$0xff]  ;;  %vm1193_vm14 = vcmp.ge.s32.totalorder %v6225_v39, 0  ;;  %v1999_v61 = vsel %vm1183_vm4, %v6178_v26, 0.0  ;;  %v1890_v62 = vsel %vm1506_vm7, %v6199_v55, 0.0 }
 0x20a   : > { %4841 = vmatpush3.bf16.msra.mxu1 %v5291_v44  ;;  %v4510_v0 = vpack.c.bf16 %v1368_v59, %v1368_v59  ;;  %v5298_v1 = vld [vmem:[#allocation13 + $0x158] sm:$0xff]   ;;  %v6243_v2 = vadd.s32 1, %v1040_v52  ;;  %v4581_v48 = vpack.c.bf16 %v1999_v61, %v1999_v61  ;;  %v1464_v7 = vld [vmem:[#allocation3 + $0x51] sm:$0xff]  ;;  %v4568_v9 = vpack.c.bf16 %v1890_v62, %v1890_v62  ;;  %1447 = vst [vmem:[#allocation4 + $0x124] sm:$0xf] %v4509_v63  ;;  %v5303_v27 = vld [vmem:[#allocation13 + $0x1f0] sm:$0xff]  }
 0x20b   : > { %v1463_v6 = vld [vmem:[#allocation3 + $0x49] sm:$0xff]  ;;  %v2001_v28 = vsel %vm1185_vm6, %v6206_v60, 0.0  ;;  %v1892_v45 = vsel %vm1508_vm9, %v6180_v29, 0.0  ;;  %v2003_v26 = vsel %vm1187_vm8, %v1669_v37, 0.0  ;;  %4842 = vmatprep.subr.bf16.mxu1 %v5298_v1  ;;  %v1576_v10 = vsel %vm1512_vm13, %v1464_v7, 0.0  ;;  %v1672_v60 = vld [vmem:[#allocation3 + $0x5f] sm:$0xff]  ;;  %4900 = vmatprep.subr.bf16.mxu0 %v5303_v27 }
 0x20c   : > { %v5285_v55 = vld [vmem:[#allocation4 + $0xdc] ss:$36 sps:$4 sm:$0xff]   ;;  %1448 = vst [vmem:[#allocation4 + $0x148] sm:$0xf] %v4510_v0  ;;  %v4525_v11 = vpack.c.bf16 %v1463_v6, %v1463_v6  ;;  %2079 = vst [vmem:[#allocation4 + $0x18] sm:$0xf] %v4581_v48  ;;  %v4583_v14 = vpack.c.bf16 %v2001_v28, %v2001_v28  ;;  %v4570_v41 = vpack.c.bf16 %v1892_v45, %v1892_v45 }
 0x20d   : > { %3383 = vmatmul.mubr.bf16.gmra.mxu1 %v5279_v49  ;;  %2179 = vst [vmem:[#allocation4 + $0xac] sm:$0xf] %v4509_v63  ;;  %2180 = vst [vmem:[#allocation4 + $0xd0] sm:$0xf] %v4510_v0  ;;  %v4526_v29 = vpack.c.bf16 %v1576_v10, %v1576_v10  ;;  %v1687_v3 = vsel %vm1191_vm12, %v1671_v8, 0.0  ;;  %v4585_v15 = vpack.c.bf16 %v2003_v26, %v2003_v26  ;;  %v5301_v18 = vld [vmem:[#allocation13 + $0x118] sm:$0xff]  }
 0x20e   : > { %1861 = vst [vmem:[#allocation4 + $0xe8] sm:$0xf] %v4509_v63  ;;  %1862 = vst [vmem:[#allocation4 + $0x10c] sm:$0xf] %v4510_v0  ;;  %3390 = vmatprep.mubr.bf16.mxu1 %v5285_v55  ;;  %v4541_v16 = vpack.c.bf16 %v1687_v3, %v1687_v3  ;;  %v4542_v17 = vpack.c.bf16 %v1672_v60, %v1672_v60  ;;  %v1273_v19 = vsel %vm1193_vm14, %v1671_v8, 0.0  ;;  %v6259_v20 = vadd.s32 4294967295, %v1047_v56 }
 0x20f   : > { %1970 = vst [vmem:[#allocation4 + $0x80] sm:$0xf] %v4568_v9  ;;  %1655 = vst [vmem:[#allocation4 + $0x128] sm:$0xf] %v4525_v11  ;;  %3480 = vmatmul.mubr.bf16.gmra.mxu0 %v5284_v57  ;;  %v5287_v21 = vld [vmem:[#allocation4 + $0xd8] ss:$36 sps:$4 sm:$0xff]   ;;  %v4495_v24 = vpack.c.bf16 %v1273_v19, %v1273_v19  ;;  %4843 = vmatpush3.bf16.msra.mxu1 %v5301_v18 }
 0x210   : > { %2081 = vst [vmem:[#allocation4 + $0x60] sm:$0xf] %v4583_v14  ;;  %1972 = vst [vmem:[#allocation4 + $0xc8] sm:$0xf] %v4570_v41  ;;  %v5289_v22 = vld [vmem:[#allocation4 + $0xe4] ss:$36 sps:$4 sm:$0xff]  }
 0x211   : > { %1973 = vst [vmem:[#allocation4 + $0xec] sm:$0xf] %v4525_v11  ;;  %1656 = vst [vmem:[#allocation4 + $0x14c] sm:$0xf] %v4526_v29  ;;  %v1894_v25 = vsel %vm1510_vm10, %v1464_v7, 0.0  ;;  %v2005_v33 = vsel %vm1189_vm11, %v1671_v8, 0.0  ;;  %3487 = vmatprep.mubr.bf16.mxu0 %v5289_v22 }
 0x212   : > { %2083 = vst [vmem:[#allocation4 + $0xa8] sm:$0xf] %v4585_v15  ;;  %1767 = vst [vmem:[#allocation4 + $0x12c] sm:$0xf] %v4541_v16  ;;  %v4572_v31 = vpack.c.bf16 %v1894_v25, %v1894_v25  ;;  %v5292_v35 = vld [vmem:[#allocation4 + $0xe0] ss:$36 sps:$4 sm:$0xff]   ;;  %v4587_v42 = vpack.c.bf16 %v2005_v33, %v2005_v33 }
 0x213   : > { %1768 = vst [vmem:[#allocation4 + $0x150] sm:$0xf] %v4542_v17  ;;  %1354 = vst [vmem:[#allocation4 + $0x18c] sm:$0xf] %v4542_v17  ;;  %v5304_v36 = vld [vmem:[#allocation13 + $0x1b0] sm:$0xff]   ;;  %v1369_v37 = vld [vmem:[#allocation3 + $0x58] sm:$0xff] }
 0x214   : > { %2086 = vst [vmem:[#allocation4 + $0x114] sm:$0xf] %v4542_v17  ;;  %1353 = vst [vmem:[#allocation4 + $0x168] sm:$0xf] %v4495_v24  ;;  %v956_v38 = vadd.s32 104, %v6134_v13  ;;  %v6267_v40 = vadd.s32 112, %v6134_v13  ;;  %v4511_v44 = vpack.c.bf16 %v1369_v37, %v1369_v37  ;;  %4901 = vmatpush3.bf16.msra.mxu0 %v5304_v36 }
 0x215   : > { %v1370_v43 = vld [vmem:[#allocation3 + $0x60] sm:$0xff]  ;;  %1974 = vst [vmem:[#allocation4 + $0x110] sm:$0xf] %v4572_v31  ;;  %v5295_v46 = vld [vmem:[#allocation4 + $0x124] ss:$36 sps:$4 sm:$0xff]   ;;  %vm1514_vm15 = vcmp.lt.s32.totalorder %v6243_v2, 16  ;;  %3391 = vmatmul.mubr.bf16.gmra.mxu1 %v5287_v21 }
 0x216   : > { %v4512_v30 = vpack.c.bf16 %v1370_v43, %v1370_v43  ;;  %2085 = vst [vmem:[#allocation4 + $0xf0] sm:$0xf] %v4587_v42  ;;  %1449 = vst [vmem:[#allocation4 + $0x16c] sm:$0xf] %v4511_v44  ;;  %v5308_v47 = vld [vmem:[#allocation13 + $0x150] sm:$0xff]   ;;  %vm1195_vm0 = vcmp.ge.s32.totalorder %v6259_v20, 0  ;;  %3398 = vmatprep.mubr.bf16.mxu1 %v5295_v46 }
 0x217   : > { %v1465_v49 = vld [vmem:[#allocation3 + $0x59] sm:$0xff]  ;;  %2181 = vst [vmem:[#allocation4 + $0xf4] sm:$0xf] %v4511_v44  ;;  %1863 = vst [vmem:[#allocation4 + $0x130] sm:$0xf] %v4511_v44  ;;  %v1466_v50 = vld [vmem:[#allocation3 + $0x61] sm:$0xff]  ;;  %4844 = vmatprep.subr.bf16.mxu1 %v5308_v47  ;;  %3488 = vmatmul.mubr.bf16.gmra.mxu0 %v5292_v35 }
 0x218   : > { %1450 = vst [vmem:[#allocation4 + $0x190] sm:$0xf] %v4512_v30  ;;  %v4527_v51 = vpack.c.bf16 %v1465_v49, %v1465_v49  ;;  %v1673_v23 = vld [vmem:[#allocation3 + $0x67] sm:$0xff]  ;;  %v1674_v52 = vld [vmem:[#allocation3 + $0x6f] sm:$0xff]  ;;  %v1054_v53 = vand.u32 15, %v956_v38  ;;  %v1061_v54 = vand.u32 15, %v6267_v40 }
 0x219   : > { %2182 = vst [vmem:[#allocation4 + $0x118] sm:$0xf] %v4512_v30  ;;  %1864 = vst [vmem:[#allocation4 + $0x154] sm:$0xf] %v4512_v30  ;;  %v1578_v56 = vsel %vm1514_vm15, %v1466_v50, 0.0  ;;  %v1689_v57 = vsel %vm1193_vm14, %v1673_v23, 0.0  ;;  %v4544_v58 = vpack.c.bf16 %v1674_v52, %v1674_v52 }
 0x21a   : > { %v5299_v59 = vld [vmem:[#allocation4 + $0x12c] ss:$36 sps:$4 sm:$0xff]   ;;  %v4528_v61 = vpack.c.bf16 %v1578_v56, %v1578_v56  ;;  %1657 = vst [vmem:[#allocation4 + $0x170] sm:$0xf] %v4527_v51  ;;  %v4543_v62 = vpack.c.bf16 %v1689_v57, %v1689_v57  ;;  %v1275_v63 = vsel %vm1195_vm0, %v1673_v23, 0.0  ;;  %v1896_v0 = vsel %vm1512_vm13, %v1466_v50, 0.0 }
 0x21b   : > { %1975 = vst [vmem:[#allocation4 + $0x134] sm:$0xf] %v4527_v51  ;;  %v5297_v1 = vld [vmem:[#allocation4 + $0x120] ss:$36 sps:$4 sm:$0xff]   ;;  %1770 = vst [vmem:[#allocation4 + $0x198] sm:$0xf] %v4544_v58  ;;  %v4497_v6 = vpack.c.bf16 %v1275_v63, %v1275_v63  ;;  %v4574_v7 = vpack.c.bf16 %v1896_v0, %v1896_v0  ;;  %3495 = vmatprep.mubr.bf16.mxu0 %v5299_v59 }
 0x21c   : > { %v5311_v48 = vld [vmem:[#allocation13 + $0x110] sm:$0xff]   ;;  %1356 = vst [vmem:[#allocation4 + $0x1d4] sm:$0xf] %v4544_v58  ;;  %v2007_v8 = vsel %vm1191_vm12, %v1673_v23, 0.0  ;;  %2088 = vst [vmem:[#allocation4 + $0x15c] sm:$0xf] %v4544_v58 }
 0x21d   : > { %v5302_v9 = vld [vmem:[#allocation4 + $0x128] ss:$36 sps:$4 sm:$0xff]   ;;  %1658 = vst [vmem:[#allocation4 + $0x194] sm:$0xf] %v4528_v61  ;;  %1769 = vst [vmem:[#allocation4 + $0x174] sm:$0xf] %v4543_v62  ;;  %v4589_v26 = vpack.c.bf16 %v2007_v8, %v2007_v8  ;;  %4845 = vmatpush3.bf16.msra.mxu1 %v5311_v48 }
 0x21e   : > { %v5313_v28 = vld [vmem:[#allocation13 + $0x1e8] sm:$0xff]   ;;  %v958_v45 = vadd.s32 120, %v6134_v13  ;;  %1355 = vst [vmem:[#allocation4 + $0x1b0] sm:$0xf] %v4497_v6  ;;  %1976 = vst [vmem:[#allocation4 + $0x158] sm:$0xf] %v4574_v7  ;;  %3399 = vmatmul.mubr.bf16.gmra.mxu1 %v5297_v1 }
 0x21f   : > { %v5314_v55 = vld [vmem:[#allocation13 + $0x1a8] sm:$0xff]   ;;  %4902 = vmatprep.subr.bf16.mxu0 %v5313_v28  ;;  %v5315_v10 = vld [vmem:[#allocation13 + $0x1e0] sm:$0xff]   ;;  %v6283_v11 = vadd.s32 1, %v1054_v53  ;;  %2087 = vst [vmem:[#allocation4 + $0x138] sm:$0xf] %v4589_v26  ;;  %v1371_v14 = vld [vmem:[#allocation3 + $0x68] sm:$0xff]  ;;  %3496 = vmatmul.mubr.bf16.gmra.mxu0 %v5302_v9 }
 0x220   : > { %v5305_v12 = vld [vmem:[#allocation4 + $0x16c] ss:$36 sps:$4 sm:$0xff]   ;;  %4903 = vmatpush3.bf16.msra.mxu0 %v5314_v55  ;;  %v1372_v41 = vld [vmem:[#allocation3 + $0x70] sm:$0xff]  ;;  %v6285_v29 = vadd.s32 4294967295, %v1061_v54  ;;  %v1068_v60 = vand.u32 15, %v958_v45  ;;  %v4513_v3 = vpack.c.bf16 %v1371_v14, %v1371_v14  ;;  %v5325_v42 = vld [vmem:[#allocation13 + $0x1d8] sm:$0xff]  }
 0x221   : > { %4904 = vmatprep.subr.bf16.mxu0 %v5315_v10  ;;  %3406 = vmatprep.mubr.bf16.mxu1 %v5305_v12  ;;  %v5307_v13 = vld [vmem:[#allocation4 + $0x168] ss:$36 sps:$4 sm:$0xff]   ;;  %v4514_v15 = vpack.c.bf16 %v1372_v41, %v1372_v41  ;;  %v5318_v16 = vld [vmem:[#allocation13 + $0x1a0] sm:$0xff]   ;;  %vm1516_vm1 = vcmp.lt.s32.totalorder %v6283_v11, 16  ;;  %v5326_v44 = vld [vmem:[#allocation13 + $0x198] sm:$0xff]   ;;  %s4455_s6 = sshll.u32 %s6781_s12, 5 }
 0x222   : > { %v5320_v17 = vld [vmem:[#allocation13 + $0x148] sm:$0xff]   ;;  %v1467_v18 = vld [vmem:[#allocation3 + $0x69] sm:$0xff]  ;;  %1451 = vst [vmem:[#allocation4 + $0x1b4] sm:$0xf] %v4513_v3  ;;  %2183 = vst [vmem:[#allocation4 + $0x13c] sm:$0xf] %v4513_v3  ;;  %s3928_s20 = sadd.s32 %s4455_s6, %s4454_s2 }
 0x223   : > { %1452 = vst [vmem:[#allocation4 + $0x1d8] sm:$0xf] %v4514_v15  ;;  %v4529_v21 = vpack.c.bf16 %v1467_v18, %v1467_v18  ;;  %2184 = vst [vmem:[#allocation4 + $0x160] sm:$0xf] %v4514_v15  ;;  %4846 = vmatprep.subr.bf16.mxu1 %v5320_v17  ;;  %v1468_v24 = vld [vmem:[#allocation3 + $0x71] sm:$0xff]  ;;  %vm1197_vm2 = vcmp.ge.s32.totalorder %v6285_v29, 0 }
 0x224   : > { %v5309_v19 = vld [vmem:[#allocation4 + $0x174] ss:$36 sps:$4 sm:$0xff]   ;;  %4905 = vmatpush3.bf16.msra.mxu0 %v5318_v16  ;;  %1865 = vst [vmem:[#allocation4 + $0x178] sm:$0xf] %v4513_v3  ;;  %1866 = vst [vmem:[#allocation4 + $0x19c] sm:$0xf] %v4514_v15 }
 0x225   : > { %v5312_v22 = vld [vmem:[#allocation4 + $0x170] ss:$36 sps:$4 sm:$0xff]   ;;  %v1675_v25 = vld [vmem:[#allocation3 + $0x77] sm:$0xff]  ;;  %v6289_v27 = vadd.s32 1, %v1068_v60  ;;  %3503 = vmatprep.mubr.bf16.mxu0 %v5309_v19  ;;  %v1580_v31 = vsel %vm1516_vm1, %v1468_v24, 0.0  ;;  %v1898_v30 = vsel %vm1514_vm15, %v1468_v24, 0.0  ;;  %4906 = vmatprep.subr.bf16.mxu0 %v5325_v42 }
 0x226   : > { %1659 = vst [vmem:[#allocation4 + $0x1b8] sm:$0xf] %v4529_v21  ;;  %v1676_v33 = vld [vmem:[#allocation3 + $0x7f] sm:$0xff]  ;;  %v1691_v35 = vsel %vm1195_vm0, %v1675_v25, 0.0  ;;  %1977 = vst [vmem:[#allocation4 + $0x17c] sm:$0xf] %v4529_v21  ;;  %v4530_v37 = vpack.c.bf16 %v1580_v31, %v1580_v31  ;;  %3407 = vmatmul.mubr.bf16.gmra.mxu1 %v5307_v13  ;;  %v4576_v51 = vpack.c.bf16 %v1898_v30, %v1898_v30 }
 0x227   : > { %v5323_v36 = vld [vmem:[#allocation13 + $0x108] sm:$0xff]   ;;  %2295 = vst [vmem:[#allocation4 + $0x140] sm:$0xf] %v4529_v21  ;;  %v4545_v38 = vpack.c.bf16 %v1691_v35, %v1691_v35  ;;  %v4546_v40 = vpack.c.bf16 %v1676_v33, %v1676_v33  ;;  %v1277_v43 = vsel %vm1197_vm2, %v1675_v25, 0.0  ;;  %v5327_v47 = vld [vmem:[#allocation13 + $0x1d0] sm:$0xff]   ;;  %vm1518_vm3 = vcmp.lt.s32.totalorder %v6289_v27, 16  ;;  %3504 = vmatmul.mubr.bf16.gmra.mxu0 %v5312_v22 }
 0x228   : > { %1660 = vst [vmem:[#allocation4 + $0x1dc] sm:$0xf] %v4530_v37  ;;  %4847 = vmatpush3.bf16.msra.mxu1 %v5323_v36  ;;  %v4499_v46 = vpack.c.bf16 %v1277_v43, %v1277_v43  ;;  %v1373_v49 = vld [vmem:[#allocation3 + $0x78] sm:$0xff]  ;;  %v1374_v50 = vld [vmem:[#allocation3 + $0x80] sm:$0xff]  ;;  %v2009_v23 = vsel %vm1193_vm14, %v1675_v25, 0.0  ;;  %v2216_v52 = vsel %vm1512_vm13, %v1468_v24, 0.0  ;;  %4907 = vmatpush3.bf16.msra.mxu0 %v5326_v44 }
 0x229   : > { %1771 = vst [vmem:[#allocation4 + $0x1bc] sm:$0xf] %v4545_v38  ;;  %1772 = vst [vmem:[#allocation4 + $0x1e0] sm:$0xf] %v4546_v40  ;;  %v4515_v54 = vpack.c.bf16 %v1373_v49, %v1373_v49  ;;  %v4516_v56 = vpack.c.bf16 %v1374_v50, %v1374_v50  ;;  %v4591_v57 = vpack.c.bf16 %v2009_v23, %v2009_v23  ;;  %v5319_v59 = vld [vmem:[#allocation4 + $0x1b0] ss:$36 sps:$4 sm:$0xff]   ;;  %4908 = vmatprep.subr.bf16.mxu0 %v5327_v47 }
 0x22a   : > { %1358 = vst [vmem:[#allocation4 + $0x21c] sm:$0xf] %v4546_v40  ;;  %2090 = vst [vmem:[#allocation4 + $0x1a4] sm:$0xf] %v4546_v40  ;;  %v5316_v53 = vld [vmem:[#allocation4 + $0x1b4] ss:$36 sps:$4 sm:$0xff]   ;;  %v4622_v58 = vpack.c.bf16 %v2216_v52, %v2216_v52 }
 0x22b   : > { %1357 = vst [vmem:[#allocation4 + $0x1f8] sm:$0xf] %v4499_v46  ;;  %1978 = vst [vmem:[#allocation4 + $0x1a0] sm:$0xf] %v4576_v51  ;;  %3414 = vmatprep.mubr.bf16.mxu1 %v5316_v53  ;;  %v5330_v61 = vld [vmem:[#allocation13 + $0x190] sm:$0xff]   ;;  %v5332_v34 = vld [vmem:[#allocation13 + $0x140] sm:$0xff]  }
 0x22c   : > { %1453 = vst [vmem:[#allocation4 + $0x1fc] sm:$0xf] %v4515_v54  ;;  %1454 = vst [vmem:[#allocation4 + $0x220] sm:$0xf] %v4516_v56  ;;  %v1469_v39 = vld [vmem:[#allocation3 + $0x79] sm:$0xff]  ;;  %v1470_v62 = vld [vmem:[#allocation3 + $0x81] sm:$0xff]  ;;  %4909 = vmatpush3.bf16.msra.mxu0 %v5330_v61  ;;  %4848 = vmatprep.subr.bf16.mxu1 %v5332_v34 }
 0x22d   : > { %2089 = vst [vmem:[#allocation4 + $0x180] sm:$0xf] %v4591_v57  ;;  %2185 = vst [vmem:[#allocation4 + $0x184] sm:$0xf] %v4515_v54  ;;  %v1582_v63 = vsel %vm1518_vm3, %v1470_v62, 0.0  ;;  %v4531_v0 = vpack.c.bf16 %v1469_v39, %v1469_v39  ;;  %v1677_v1 = vld [vmem:[#allocation3 + $0x87] sm:$0xff] }
 0x22e   : > { %2186 = vst [vmem:[#allocation4 + $0x1a8] sm:$0xf] %v4516_v56  ;;  %1867 = vst [vmem:[#allocation4 + $0x1c0] sm:$0xf] %v4515_v54  ;;  %v1678_v48 = vld [vmem:[#allocation3 + $0x8f] sm:$0xff]  ;;  %v1900_v6 = vsel %vm1516_vm1, %v1470_v62, 0.0  ;;  %3415 = vmatmul.mubr.bf16.gmra.mxu1 %v5319_v59  ;;  %v4532_v8 = vpack.c.bf16 %v1582_v63, %v1582_v63 }
 0x22f   : > { %1868 = vst [vmem:[#allocation4 + $0x1e4] sm:$0xf] %v4516_v56  ;;  %2296 = vst [vmem:[#allocation4 + $0x164] sm:$0xf] %v4622_v58  ;;  %v1693_v9 = vsel %vm1197_vm2, %v1677_v1, 0.0  ;;  %v4548_v28 = vpack.c.bf16 %v1678_v48, %v1678_v48  ;;  %v4578_v45 = vpack.c.bf16 %v1900_v6, %v1900_v6  ;;  %v5335_v10 = vld [vmem:[#allocation13 + $0x100] sm:$0xff]  }
 0x230   : > { %v5321_v7 = vld [vmem:[#allocation4 + $0x1bc] ss:$36 sps:$4 sm:$0xff]   ;;  %1661 = vst [vmem:[#allocation4 + $0x200] sm:$0xf] %v4531_v0  ;;  %v4547_v55 = vpack.c.bf16 %v1693_v9, %v1693_v9  ;;  %1979 = vst [vmem:[#allocation4 + $0x1c4] sm:$0xf] %v4531_v0  ;;  %4849 = vmatpush3.bf16.msra.mxu1 %v5335_v10 }
 0x231   : > { %v5324_v26 = vld [vmem:[#allocation4 + $0x1b8] ss:$36 sps:$4 sm:$0xff]   ;;  %v2011_v12 = vsel %vm1195_vm0, %v1677_v1, 0.0  ;;  %2297 = vst [vmem:[#allocation4 + $0x188] sm:$0xf] %v4531_v0  ;;  %3511 = vmatprep.mubr.bf16.mxu0 %v5321_v7  ;;  %v5337_v14 = vld [vmem:[#allocation13 + $0x1c8] sm:$0xff]  }
 0x232   : > { %1662 = vst [vmem:[#allocation4 + $0x224] sm:$0xf] %v4532_v8  ;;  %1774 = vst [vmem:[#allocation4 + $0x228] sm:$0xf] %v4548_v28  ;;  %v4593_v41 = vpack.c.bf16 %v2011_v12, %v2011_v12  ;;  %v2218_v60 = vsel %vm1514_vm15, %v1470_v62, 0.0  ;;  %3512 = vmatmul.mubr.bf16.gmra.mxu0 %v5324_v26  ;;  %v5338_v13 = vld [vmem:[#allocation13 + $0x188] sm:$0xff]   ;;  %4910 = vmatprep.subr.bf16.mxu0 %v5337_v14 }
 0x233   : > { %1980 = vst [vmem:[#allocation4 + $0x1e8] sm:$0xf] %v4578_v45  ;;  %2092 = vst [vmem:[#allocation4 + $0x1ec] sm:$0xf] %v4548_v28  ;;  %v4624_v3 = vpack.c.bf16 %v2218_v60, %v2218_v60  ;;  %v5328_v15 = vld [vmem:[#allocation4 + $0x1fc] ss:$36 sps:$4 sm:$0xff]   ;;  %4911 = vmatpush3.bf16.msra.mxu0 %v5338_v13 }
 0x234   : > { %1773 = vst [vmem:[#allocation4 + $0x204] sm:$0xf] %v4547_v55  ;;  %2091 = vst [vmem:[#allocation4 + $0x1c8] sm:$0xf] %v4593_v41  ;;  %v5331_v20 = vld [vmem:[#allocation4 + $0x1f8] ss:$36 sps:$4 sm:$0xff]   ;;  %3422 = vmatprep.mubr.bf16.mxu1 %v5328_v15 }
 0x235   : > { %2298 = vst [vmem:[#allocation4 + $0x1ac] sm:$0xf] %v4624_v3  ;;  %v5339_v16 = vld [vmem:[#allocation13 + $0x1c0] sm:$0xff]   ;;  %v5342_v17 = vld [vmem:[#allocation4 + $0x14] ss:$36 sps:$4 sm:$0xff]   ;;  %v5358_v36 = vld [vmem:[#allocation13 + $0x228] sm:$0xff]  }
 0x236   : > { %3423 = vmatmul.mubr.bf16.gmra.mxu1 %v5331_v20  ;;  %4912 = vmatprep.subr.bf16.mxu0 %v5339_v16  ;;  %v5343_v18 = vld [vmem:[#allocation13 + $0x180] sm:$0xff]   ;;  %v5344_v2 = vld [vmem:[#allocation13 + $0x238] sm:$0xff]   ;;  %v5340_v22 = vld [vmem:[#allocation4 + $0x10] ss:$36 sps:$4 sm:$0xff]   ;;  %s4456_s7 = sshll.u32 %s3928_s20, 7  ;;  %p6784_p2 = scmp.ne.s32.totalorder %s6701_s4, 0 }
 0x237   : > { %3560 = vmatprep.mubr.bf16.mxu1 %v5342_v17  ;;  %4913 = vmatpush3.bf16.msra.mxu0 %v5343_v18  ;;  %v5347_v24 = vld [vmem:[#allocation4 + $0x1c] ss:$36 sps:$4 sm:$0xff]   ;;  %v5351_v31 = vld [vmem:[#allocation13 + $0x230] sm:$0xff]   ;;  %v5352_v35 = vld [vmem:[#allocation4 + $0x64] ss:$36 sps:$4 sm:$0xff]   ;;  %s6557_s27 = scalar_lea.hbm %s6782_s25, %s4456_s7 }
 0x238   : > { %5014 = vmatprep.subr.bf16.mxu1 %v5344_v2  ;;  %v5348_v25 = vld [vmem:[#allocation4 + $0x5c] ss:$36 sps:$4 sm:$0xff]   ;;  %v5355_v38 = vld [vmem:[#allocation4 + $0xa4] ss:$36 sps:$4 sm:$0xff]   ;;  %v5359_v43 = vld [vmem:[#allocation4 + $0xac] ss:$36 sps:$4 sm:$0xff]   ;;  %p5543_p13 = pnand %p5542_p9, %p6784_p2 }
 0x239   : > { %v5336_v21 = vld [vmem:[#allocation4 + $0x200] ss:$36 sps:$4 sm:$0xff]   ;;  %v5345_v33 = vld [vmem:[#allocation4 + $0x18] ss:$36 sps:$4 sm:$0xff]   ;;  %v5362_v30 = vld [vmem:[#allocation4 + $0xec] ss:$36 sps:$4 sm:$0xff]  }
 0x23a   : > { %v5350_v37 = vld [vmem:[#allocation4 + $0x58] ss:$36 sps:$4 sm:$0xff]   ;;  %v5365_v40 = vld [vmem:[#allocation13 + $0x220] sm:$0xff]   ;;  %v5379_v47 = vld [vmem:[#allocation13 + $0x210] sm:$0xff]   ;;  %p5544_p1 = pneg %p5543_p13 }
 0x23b   : > { %v5333_v19 = vld [vmem:[#allocation4 + $0x204] ss:$36 sps:$4 sm:$0xff]   ;;  %v5372_v44 = vld [vmem:[#allocation13 + $0x218] sm:$0xff]   ;;  %v1998_v62 = vld [vmem:[#allocation3 + $0x9f] sm:$0xff] }
 0x23c   : > { %3519 = vmatprep.mubr.bf16.mxu0 %v5333_v19  ;;  %v5354_v42 = vld [vmem:[#allocation4 + $0x60] ss:$36 sps:$4 sm:$0xff]   ;;  %v5361_v49 = vld [vmem:[#allocation4 + $0xa8] ss:$36 sps:$4 sm:$0xff]   ;;  %v5366_v50 = vld [vmem:[#allocation4 + $0xf4] ss:$36 sps:$4 sm:$0xff]   ;;  %v4596_v6 = vpack.c.bf16 %v1998_v62, %v1998_v62 }
 0x23d   : > { %3520 = vmatmul.mubr.bf16.gmra.mxu0 %v5336_v21  ;;  %v5357_v46 = vld [vmem:[#allocation4 + $0xa0] ss:$36 sps:$4 sm:$0xff]   ;;  %v6314_v51 = vld [vmem:[#allocation13 + $0x208] sm:$0xff]   ;;  %v2107_v23 = vld [vmem:[#allocation3 + $0x88] sm:$0xff] }
 0x23e   : > { %3657 = vmatprep.mubr.bf16.mxu0 %v5347_v24  ;;  %3561 = vmatmul.mubr.bf16.vlgmr.msra.gmra.mxu1 %v5340_v22  ;;  %v2108_v52 = vld [vmem:[#allocation3 + $0x90] sm:$0xff]  ;;  %v5364_v54 = vld [vmem:[#allocation4 + $0xe8] ss:$36 sps:$4 sm:$0xff]   ;;  %v4609_v56 = vpack.c.bf16 %v2107_v23, %v2107_v23  ;;  %v5369_v61 = vld [vmem:[#allocation4 + $0x134] ss:$36 sps:$4 sm:$0xff]  }
 0x23f   : > { %5015 = vmatpush3.bf16.msra.mxu1 %v5344_v2  ;;  %3568 = vmatprep.mubr.bf16.mxu1 %v5348_v25  ;;  %v1885_v53 = vld [vmem:[#allocation3 + $0x89] sm:$0xff]  ;;  %v4610_v57 = vpack.c.bf16 %v2108_v52, %v2108_v52  ;;  %v1886_v58 = vld [vmem:[#allocation3 + $0x91] sm:$0xff]  ;;  %v2110_v8 = vld [vmem:[#allocation3 + $0xa0] sm:$0xff]  ;;  %2094 = vst [vmem:[#allocation4 + $0x234] sm:$0xf] %v4596_v6 }
 0x240   : > { %5016 = vmatprep.subr.bf16.mxu1 %v5351_v31  ;;  %v4579_v59 = vpack.c.bf16 %v1885_v53, %v1885_v53  ;;  %v1902_v34 = vsel %vm1518_vm3, %v1886_v58, 0.0  ;;  %v1997_v39 = vld [vmem:[#allocation3 + $0x97] sm:$0xff]  ;;  %v2220_v63 = vsel %vm1516_vm1, %v1886_v58, 0.0  ;;  %2187 = vst [vmem:[#allocation4 + $0x1cc] sm:$0xf] %v4609_v56  ;;  %v2191_v9 = vld [vmem:[#allocation3 + $0x29] sm:$0xff]  ;;  %v4612_v26 = vpack.c.bf16 %v2110_v8, %v2110_v8 }
 0x241   : > { %2188 = vst [vmem:[#allocation4 + $0x1f0] sm:$0xf] %v4610_v57  ;;  %1869 = vst [vmem:[#allocation4 + $0x208] sm:$0xf] %v4609_v56  ;;  %v4580_v0 = vpack.c.bf16 %v1902_v34, %v1902_v34  ;;  %v5393_v1 = vld [vmem:[#allocation13 + $0x200] sm:$0xff]   ;;  %v2013_v48 = vsel %vm1197_vm2, %v1997_v39, 0.0  ;;  %v4626_v28 = vpack.c.bf16 %v2220_v63, %v2220_v63  ;;  %v4613_v12 = vpack.c.bf16 %v2191_v9, %v2191_v9 }
 0x242   : > { %1870 = vst [vmem:[#allocation4 + $0x22c] sm:$0xf] %v4610_v57  ;;  %1981 = vst [vmem:[#allocation4 + $0x20c] sm:$0xf] %v4579_v59  ;;  %v2109_v7 = vld [vmem:[#allocation3 + $0x98] sm:$0xff]  ;;  %v4595_v11 = vpack.c.bf16 %v2013_v48, %v2013_v48  ;;  %v2195_v41 = vld [vmem:[#allocation3 + $0x49] sm:$0xff] }
 0x243   : > { %5017 = vmatpush3.bf16.msra.mxu1 %v5351_v31  ;;  %2299 = vst [vmem:[#allocation4 + $0x1d0] sm:$0xf] %v4579_v59  ;;  %v4611_v45 = vpack.c.bf16 %v2109_v7, %v2109_v7  ;;  %v2192_v55 = vld [vmem:[#allocation3 + $0x31] sm:$0xff]  ;;  %v2193_v10 = vld [vmem:[#allocation3 + $0x39] sm:$0xff]  ;;  %1982 = vst [vmem:[#allocation4 + $0x230] sm:$0xf] %v4580_v0  ;;  %v4617_v20 = vpack.c.bf16 %v2195_v41, %v2195_v41 }
 0x244   : > { %5018 = vmatprep.subr.bf16.mxu1 %v5358_v36  ;;  %v2208_v29 = vsel %vm1504_vm5, %v2192_v55, 0.0  ;;  %v4615_v14 = vpack.c.bf16 %v2193_v10, %v2193_v10  ;;  %v2196_v60 = vld [vmem:[#allocation3 + $0x51] sm:$0xff]  ;;  %v2197_v13 = vld [vmem:[#allocation3 + $0x59] sm:$0xff]  ;;  %2300 = vst [vmem:[#allocation4 + $0x1f4] sm:$0xf] %v4626_v28  ;;  %v2198_v16 = vld [vmem:[#allocation3 + $0x61] sm:$0xff] }
 0x245   : > { %3658 = vmatmul.mubr.bf16.vlgmr.msra.gmra.mxu0 %v5345_v33  ;;  %2093 = vst [vmem:[#allocation4 + $0x210] sm:$0xf] %v4595_v11  ;;  %2189 = vst [vmem:[#allocation4 + $0x214] sm:$0xf] %v4611_v45  ;;  %v4614_v3 = vpack.c.bf16 %v2208_v29, %v2208_v29  ;;  %v2212_v15 = vsel %vm1508_vm9, %v2196_v60, 0.0  ;;  %v4619_v17 = vpack.c.bf16 %v2197_v13, %v2197_v13  ;;  %v2214_v18 = vsel %vm1510_vm10, %v2198_v16, 0.0 }
 0x246   : > { %3665 = vmatprep.mubr.bf16.mxu0 %v5352_v35  ;;  %3569 = vmatmul.mubr.bf16.gmra.mxu1 %v5350_v37  ;;  %2190 = vst [vmem:[#allocation4 + $0x238] sm:$0xf] %v4612_v26  ;;  %2287 = vst [vmem:[#allocation4 + $0x20] sm:$0xf] %v4613_v12  ;;  %v4618_v32 = vpack.c.bf16 %v2212_v15, %v2212_v15  ;;  %v2205_v2 = vld [vmem:[#allocation3 + $0x99] sm:$0xff]  ;;  %v4620_v21 = vpack.c.bf16 %v2214_v18, %v2214_v18  ;;  %v2206_v4 = vld [vmem:[#allocation3 + $0xa1] sm:$0xff] }
 0x247   : > { %3576 = vmatprep.mubr.bf16.mxu1 %v5355_v38  ;;  %5019 = vmatpush3.bf16.msra.mxu1 %v5358_v36  ;;  %2289 = vst [vmem:[#allocation4 + $0x68] sm:$0xf] %v4615_v14  ;;  %v5368_v19 = vld [vmem:[#allocation4 + $0xf0] ss:$36 sps:$4 sm:$0xff]   ;;  %2288 = vst [vmem:[#allocation4 + $0x44] sm:$0xf] %v4614_v3  ;;  %v4627_v22 = vpack.c.bf16 %v2205_v2, %v2205_v2 }
 0x248   : > { %5020 = vmatprep.subr.bf16.mxu1 %v5365_v40  ;;  %2291 = vst [vmem:[#allocation4 + $0xb0] sm:$0xf] %v4617_v20  ;;  %2293 = vst [vmem:[#allocation4 + $0xf8] sm:$0xf] %v4619_v17  ;;  %v5373_v24 = vld [vmem:[#allocation4 + $0x13c] ss:$36 sps:$4 sm:$0xff]  }
 0x249   : > { %2292 = vst [vmem:[#allocation4 + $0xd4] sm:$0xf] %v4618_v32  ;;  %v2222_v25 = vsel %vm1518_vm3, %v2206_v4, 0.0  ;;  %2294 = vst [vmem:[#allocation4 + $0x11c] sm:$0xf] %v4620_v21 }
 0x24a   : > { %v4628_v5 = vpack.c.bf16 %v2222_v25, %v2222_v25  ;;  %2301 = vst [vmem:[#allocation4 + $0x218] sm:$0xf] %v4627_v22  ;;  %v5371_v31 = vld [vmem:[#allocation4 + $0x130] ss:$36 sps:$4 sm:$0xff]   ;;  %v5376_v33 = vld [vmem:[#allocation4 + $0x17c] ss:$36 sps:$4 sm:$0xff]  }
 0x24b   : > { %5021 = vmatpush3.bf16.msra.mxu1 %v5365_v40  ;;  %v5375_v35 = vld [vmem:[#allocation4 + $0x138] ss:$36 sps:$4 sm:$0xff]   ;;  %v5380_v36 = vld [vmem:[#allocation4 + $0x184] ss:$36 sps:$4 sm:$0xff]   ;;  %v5387_v40 = vld [vmem:[#allocation4 + $0x1cc] ss:$36 sps:$4 sm:$0xff]  }
 0x24c   : > { %5022 = vmatprep.subr.bf16.mxu1 %v5372_v44  ;;  %2302 = vst [vmem:[#allocation4 + $0x23c] sm:$0xf] %v4628_v5  ;;  %v5378_v37 = vld [vmem:[#allocation4 + $0x178] ss:$36 sps:$4 sm:$0xff]   ;;  %v5383_v38 = vld [vmem:[#allocation4 + $0x1c4] ss:$36 sps:$4 sm:$0xff]  }
 0x24d   : > { %3666 = vmatmul.mubr.bf16.gmra.mxu0 %v5354_v42  ;;  %v5382_v27 = vld [vmem:[#allocation4 + $0x180] ss:$36 sps:$4 sm:$0xff]   ;;  %v5402_v53 = vld [vmem:[#allocation4 + $0x188] ss:$36 sps:$4 sm:$0xff]  }
 0x24e   : > { %3673 = vmatprep.mubr.bf16.mxu0 %v5359_v43  ;;  %3577 = vmatmul.mubr.bf16.gmra.mxu1 %v5357_v46  ;;  %v5385_v42 = vld [vmem:[#allocation4 + $0x1c0] ss:$36 sps:$4 sm:$0xff]   ;;  %v5390_v43 = vld [vmem:[#allocation4 + $0x20c] ss:$36 sps:$4 sm:$0xff]   ;;  %v5394_v46 = vld [vmem:[#allocation4 + $0x214] ss:$36 sps:$4 sm:$0xff]  }
 0x24f   : > { %3584 = vmatprep.mubr.bf16.mxu1 %v5362_v30  ;;  %5023 = vmatpush3.bf16.msra.mxu1 %v5372_v44  ;;  %v5389_v44 = vld [vmem:[#allocation4 + $0x1c8] ss:$36 sps:$4 sm:$0xff]   ;;  %v5401_v52 = vld [vmem:[#allocation4 + $0x140] ss:$36 sps:$4 sm:$0xff]  }
 0x250   : > { %5024 = vmatprep.subr.bf16.mxu1 %v5379_v47  ;;  %v5392_v30 = vld [vmem:[#allocation4 + $0x208] ss:$36 sps:$4 sm:$0xff]   ;;  %v5400_v23 = vld [vmem:[#allocation4 + $0xf8] ss:$36 sps:$4 sm:$0xff]   ;;  %v6335_v58 = vld [vmem:[%s6733_s16] ss:$0 sm:$0xff] }
 0x253   : > { %5025 = vmatpush3.bf16.msra.mxu1 %v5379_v47  ;;  %v5397_v47 = vld [vmem:[#allocation4 + $0x20] ss:$36 sps:$4 sm:$0xff]   ;;  %v5404_v56 = vld [vmem:[#allocation4 + $0x218] ss:$36 sps:$4 sm:$0xff]  }
 0x254   : > { %5026 = vmatprep.subr.bf16.mxu1 %v6314_v51 }
 0x255   : > { %3674 = vmatmul.mubr.bf16.gmra.mxu0 %v5361_v49  ;;  %v5396_v49 = vld [vmem:[#allocation4 + $0x210] ss:$36 sps:$4 sm:$0xff]  }
 0x256   : > { %3681 = vmatprep.mubr.bf16.mxu0 %v5366_v50  ;;  %3585 = vmatmul.mubr.bf16.gmra.mxu1 %v5364_v54  ;;  %v5398_v50 = vld [vmem:[#allocation4 + $0x68] ss:$36 sps:$4 sm:$0xff]   ;;  %v5403_v54 = vld [vmem:[#allocation4 + $0x1d0] ss:$36 sps:$4 sm:$0xff]  }
 0x257   : > { %3592 = vmatprep.mubr.bf16.mxu1 %v5369_v61  ;;  %5027 = vmatpush3.bf16.msra.mxu1 %v6314_v51  ;;  %v5399_v51 = vld [vmem:[#allocation4 + $0xb0] ss:$36 sps:$4 sm:$0xff]  }
 0x258   : > { %5028 = vmatprep.subr.bf16.mxu1 %v5393_v1 }
 0x25b   : > { %5029 = vmatpush3.bf16.msra.mxu1 %v5393_v1 }
 0x25d   : > { %3682 = vmatmul.mubr.bf16.gmra.mxu0 %v5368_v19 }
 0x25e   : > { %3689 = vmatprep.mubr.bf16.mxu0 %v5373_v24  ;;  %3593 = vmatmul.mubr.bf16.gmra.mxu1 %v5371_v31 }
 0x25f   : > { %3600 = vmatprep.mubr.bf16.mxu1 %v5376_v33 }
 0x265   : > { %3690 = vmatmul.mubr.bf16.gmra.mxu0 %v5375_v35 }
 0x266   : > { %3697 = vmatprep.mubr.bf16.mxu0 %v5380_v36  ;;  %3601 = vmatmul.mubr.bf16.gmra.mxu1 %v5378_v37 }
 0x267   : > { %3608 = vmatprep.mubr.bf16.mxu1 %v5383_v38 }
 0x26d   : > { %3698 = vmatmul.mubr.bf16.gmra.mxu0 %v5382_v27 }
 0x26e   : > { %3705 = vmatprep.mubr.bf16.mxu0 %v5387_v40  ;;  %3609 = vmatmul.mubr.bf16.gmra.mxu1 %v5385_v42 }
 0x26f   : > { %3616 = vmatprep.mubr.bf16.mxu1 %v5390_v43 }
 0x275   : > { %3706 = vmatmul.mubr.bf16.gmra.mxu0 %v5389_v44 }
 0x276   : > { %3713 = vmatprep.mubr.bf16.mxu0 %v5394_v46  ;;  %3617 = vmatmul.mubr.bf16.gmra.mxu1 %v5392_v30 }
 0x277   : > { %5030 = vmatprep.mubr.bf16.mxu1 %v5397_v47 }
 0x27d   : > { %3714 = vmatmul.mubr.bf16.gmra.mxu0 %v5396_v49 }
 0x27e   : > { %5031 = vmatmul.mubr.bf16.vlgmr.msra.gmra.mxu1 %v5398_v50 }
 0x27f   : > { %5034 = vmatprep.mubr.bf16.mxu1 %v5399_v51 }
 0x286   : > { %5035 = vmatmul.mubr.bf16.gmra.mxu1 %v5400_v23 }
 0x287   : > { %5038 = vmatprep.mubr.bf16.mxu1 %v5401_v52 }
 0x28e   : > { %5039 = vmatmul.mubr.bf16.gmra.mxu1 %v5402_v53 }
 0x28f   : > { %5042 = vmatprep.mubr.bf16.mxu1 %v5403_v54 }
 0x296   : > { %5043 = vmatmul.mubr.bf16.gmra.mxu1 %v5404_v56 }
 0x2bd   : > { %v4722_v57 = vpop.f32.mrf.mxu1 }
 0x2bf   : > { %v4723_v59 = vpop.f32.mrf.mxu1  ;;  %v4786_v34 = vpop.f32.mrf.mxu0 }
 0x2c0   : > { %v4724_v61 = vadd.f32 %v4723_v59, %v4722_v57 }
 0x2c1   : > { %v4725_v39 = vpop.f32.mrf.mxu1  ;;  %v4787_v63 = vpop.f32.mrf.mxu0 }
 0x2c2   : > { %v3369_v62 = vadd.f32 %v4724_v61, %v6335_v58  ;;  %v4788_v0 = vadd.f32 %v4787_v63, %v4786_v34 }
 0x2c3   : > { %v4726_v1 = vpop.f32.mrf.mxu1  ;;  %v4789_v6 = vpop.f32.mrf.mxu0 }
 0x2c4   : > { %v4727_v48 = vadd.f32 %v4726_v1, %v4725_v39  ;;  %v6338_v7 = vadd.f32 %v4788_v0, %v3369_v62 }
 0x2c5   : > { %v4728_v8 = vpop.f32.mrf.mxu1  ;;  %v4790_v28 = vpop.f32.mrf.mxu0 }
 0x2c6   : > { %v3372_v9 = vadd.f32 %v4727_v48, %v6335_v58  ;;  %v4791_v11 = vadd.f32 %v4790_v28, %v4789_v6 }
 0x2c7   : > { %v4729_v45 = vpop.f32.mrf.mxu1  ;;  %v4792_v55 = vpop.f32.mrf.mxu0 }
 0x2c8   : > { %v4730_v26 = vadd.f32 %v4729_v45, %v4728_v8  ;;  %v6341_v10 = vadd.f32 %v4791_v11, %v3372_v9 }
 0x2c9   : > { %v4731_v29 = vpop.f32.mrf.mxu1  ;;  %v4793_v14 = vpop.f32.mrf.mxu0 }
 0x2ca   : > { %v3377_v12 = vadd.f32 %v4730_v26, %v6335_v58  ;;  %v4794_v41 = vadd.f32 %v4793_v14, %v4792_v55 }
 0x2cb   : > { %v4732_v60 = vpop.f32.mrf.mxu1  ;;  %v4795_v3 = vpop.f32.mrf.mxu0 }
 0x2cc   : > { %v4733_v13 = vadd.f32 %v4732_v60, %v4731_v29  ;;  %v6344_v15 = vadd.f32 %v4794_v41, %v3377_v12 }
 0x2cd   : > { %v4734_v20 = vpop.f32.mrf.mxu1  ;;  %v4796_v17 = vpop.f32.mrf.mxu0 }
 0x2ce   : > { %v3380_v16 = vadd.f32 %v4733_v13, %v6335_v58  ;;  %v4797_v32 = vadd.f32 %v4796_v17, %v4795_v3 }
 0x2cf   : > { %v4735_v18 = vpop.f32.mrf.mxu1  ;;  %v4798_v19 = vpop.f32.mrf.mxu0 }
 0x2d0   : > { %v4736_v2 = vadd.f32 %v4735_v18, %v4734_v20  ;;  %v6347_v21 = vadd.f32 %v4797_v32, %v3380_v16 }
 0x2d1   : > { %v4737_v4 = vpop.f32.mrf.mxu1  ;;  %v4799_v24 = vpop.f32.mrf.mxu0 }
 0x2d2   : > { %v3385_v22 = vadd.f32 %v4736_v2, %v6335_v58  ;;  %v4800_v25 = vadd.f32 %v4799_v24, %v4798_v19 }
 0x2d3   : > { %v4738_v5 = vpop.f32.mrf.mxu1  ;;  %v4801_v33 = vpop.f32.mrf.mxu0 }
 0x2d4   : > { %v4739_v31 = vadd.f32 %v4738_v5, %v4737_v4  ;;  %v6350_v35 = vadd.f32 %v4800_v25, %v3385_v22 }
 0x2d5   : > { %v4740_v36 = vpop.f32.mrf.mxu1  ;;  %v4802_v38 = vpop.f32.mrf.mxu0 }
 0x2d6   : > { %v3388_v37 = vadd.f32 %v4739_v31, %v6335_v58  ;;  %v4803_v27 = vadd.f32 %v4802_v38, %v4801_v33 }
 0x2d7   : > { %v4741_v40 = vpop.f32.mrf.mxu1  ;;  %v4804_v43 = vpop.f32.mrf.mxu0 }
 0x2d8   : > { %v4742_v42 = vadd.f32 %v4741_v40, %v4740_v36  ;;  %v6353_v44 = vadd.f32 %v4803_v27, %v3388_v37 }
 0x2d9   : > { %v4743_v46 = vpop.f32.mrf.mxu1  ;;  %v4805_v47 = vpop.f32.mrf.mxu0 }
 0x2da   : > { %v3393_v30 = vadd.f32 %v4742_v42, %v6335_v58  ;;  %v4806_v49 = vadd.f32 %v4805_v47, %v4804_v43 }
 0x2db   : > { %v4744_v50 = vpop.f32.mrf.mxu1  ;;  %v4807_v23 = vpop.f32.mrf.mxu0 }
 0x2dc   : > { %v4745_v51 = vadd.f32 %v4744_v50, %v4743_v46  ;;  %v6356_v52 = vadd.f32 %v4806_v49, %v3393_v30 }
 0x2dd   : > { %v4808_v56 = vpop.f32.mrf.mxu0 }
 0x2de   : > { %v4746_v53 = vpop.f32.mrf.mxu1  ;;  %v3396_v54 = vadd.f32 %v4745_v51, %v6335_v58  ;;  %v4809_v57 = vadd.f32 %v4808_v56, %v4807_v23 }
 0x2df   : > { %v4810_v34 = vpop.f32.mrf.mxu0 }
 0x2e0   : > { %v4747_v59 = vpop.f32.mrf.mxu1  ;;  %v6359_v39 = vadd.f32 %v4809_v57, %v3396_v54 }
 0x2e1   : > { %v4748_v61 = vadd.f32 %v4747_v59, %v4746_v53  ;;  %v4811_v0 = vpop.f32.mrf.mxu0 }
 0x2e2   : > { %v4749_v62 = vpop.f32.mrf.mxu1  ;;  %v4812_v1 = vadd.f32 %v4811_v0, %v4810_v34 }
 0x2e3   : > { %v3401_v63 = vadd.f32 %v4748_v61, %v6335_v58  ;;  %v4813_v8 = vpop.f32.mrf.mxu0 }
 0x2e4   : > { %v4750_v48 = vpop.f32.mrf.mxu1 }
 0x2e5   : > { %v4751_v6 = vadd.f32 %v4750_v48, %v4749_v62  ;;  %v6362_v9 = vadd.f32 %v4812_v1, %v3401_v63  ;;  %v4814_v45 = vpop.f32.mrf.mxu0 }
 0x2e6   : > { %v4752_v28 = vpop.f32.mrf.mxu1  ;;  %v4815_v26 = vadd.f32 %v4814_v45, %v4813_v8 }
 0x2e7   : > { %v3404_v11 = vadd.f32 %v4751_v6, %v6335_v58  ;;  %v4816_v12 = vpop.f32.mrf.mxu0 }
 0x2e8   : > { %v4753_v55 = vpop.f32.mrf.mxu1 }
 0x2e9   : > { %v4754_v29 = vadd.f32 %v4753_v55, %v4752_v28  ;;  %v6365_v14 = vadd.f32 %v4815_v26, %v3404_v11  ;;  %v4817_v13 = vpop.f32.mrf.mxu0 }
 0x2ea   : > { %v4755_v41 = vpop.f32.mrf.mxu1  ;;  %v4818_v3 = vadd.f32 %v4817_v13, %v4816_v12 }
 0x2eb   : > { %6734 = vst [vmem:[#allocation34_spill] sm:$0xff] %v6365_v14  ;;  %v3409_v60 = vadd.f32 %v4754_v29, %v6335_v58  ;;  %v4819_v17 = vpop.f32.mrf.mxu0 }
 0x2ec   : > { %v4756_v20 = vpop.f32.mrf.mxu1 }
 0x2ed   : > { %v4757_v16 = vadd.f32 %v4756_v20, %v4755_v41  ;;  %v6368_v32 = vadd.f32 %v4818_v3, %v3409_v60  ;;  %v4820_v19 = vpop.f32.mrf.mxu0 }
 0x2ee   : > { %v4758_v18 = vpop.f32.mrf.mxu1  ;;  %v4821_v4 = vadd.f32 %v4820_v19, %v4819_v17 }
 0x2ef   : > { %6735 = vst [vmem:[#allocation35_spill] sm:$0xff] %v6368_v32  ;;  %v3412_v2 = vadd.f32 %v4757_v16, %v6335_v58 }
 0x2f0   : > { %v4759_v22 = vpop.f32.mrf.mxu1 }
 0x2f1   : > { %v4760_v24 = vadd.f32 %v4759_v22, %v4758_v18  ;;  %v6371_v5 = vadd.f32 %v4821_v4, %v3412_v2 }
 0x2f2   : > { %v4822_v25 = vpop.f32.mrf.mxu0  ;;  %v4761_v31 = vpop.f32.mrf.mxu1 }
 0x2f3   : > { %6736 = vst [vmem:[#allocation36_spill] sm:$0xff] %v6371_v5  ;;  %v3417_v33 = vadd.f32 %v4760_v24, %v6335_v58 }
 0x2f4   : > { %v4823_v36 = vpop.f32.mrf.mxu0  ;;  %v4762_v38 = vpop.f32.mrf.mxu1 }
 0x2f5   : > { %v4824_v37 = vadd.f32 %v4823_v36, %v4822_v25  ;;  %v4763_v27 = vadd.f32 %v4762_v38, %v4761_v31 }
 0x2f6   : > { %v4825_v40 = vpop.f32.mrf.mxu0  ;;  %v4764_v43 = vpop.f32.mrf.mxu1 }
 0x2f7   : > { %v6374_v42 = vadd.f32 %v4824_v37, %v3417_v33  ;;  %v3420_v46 = vadd.f32 %v4763_v27, %v6335_v58 }
 0x2f8   : > { %v4826_v30 = vpop.f32.mrf.mxu0  ;;  %v4765_v49 = vpop.f32.mrf.mxu1 }
 0x2f9   : > { %6737 = vst [vmem:[#allocation37_spill] sm:$0xff] %v6374_v42  ;;  %v4827_v47 = vadd.f32 %v4826_v30, %v4825_v40  ;;  %v6377_v50 = vadd.f32 %v4765_v49, %v4764_v43 }
 0x2fa   : > { %v4767_v23 = vpop.f32.mrf.mxu1 }
 0x2fb   : > { %v6379_v51 = vadd.f32 %v4827_v47, %v3420_v46 }
 0x2fc   : > { %v4768_v54 = vpop.f32.mrf.mxu1 }
 0x2fd   : > { %6738 = vst [vmem:[#allocation38_spill] sm:$0xff] %v6379_v51  ;;  %v6381_v53 = vpop.f32.mrf.mxu0  ;;  %v6385_v57 = vadd.f32 %v4768_v54, %v4767_v23 }
 0x2fe   : > { %v4850_v59 = vpop.f32.mrf.mxu1 }
 0x2ff   : > { %v6383_v56 = vpop.f32.mrf.mxu0 }
 0x300   : > { %v4851_v34 = vpop.f32.mrf.mxu1 }
 0x301   : > { %v6387_v61 = vpop.f32.mrf.mxu0 }
 0x302   : > { %v4853_v63 = vpop.f32.mrf.mxu1 }
 0x303   : > { %v6389_v62 = vpop.f32.mrf.mxu0 }
 0x304   : > { %v4854_v1 = vpop.f32.mrf.mxu1 }
 0x305   : > { %v6391_v0 = vpop.f32.mrf.mxu0 }
 0x306   : > { %v4856_v6 = vpop.f32.mrf.mxu1 }
 0x307   : > { %v6393_v48 = vpop.f32.mrf.mxu0 }
 0x308   : > { %v4857_v28 = vpop.f32.mrf.mxu1 }
 0x309   : > { %v6395_v8 = vpop.f32.mrf.mxu0 }
 0x30a   : > { %v4859_v45 = vpop.f32.mrf.mxu1 }
 0x30b   : > { %v6397_v11 = vpop.f32.mrf.mxu0 }
 0x30c   : > { %v4860_v55 = vpop.f32.mrf.mxu1 }
 0x30d   : > { %v4920_v26 = vpop.f32.mrf.mxu0 }
 0x30e   : > { %v4862_v12 = vpop.f32.mrf.mxu1 }
 0x30f   : > { %v4921_v29 = vpop.f32.mrf.mxu0 }
 0x310   : > { %v4863_v60 = vpop.f32.mrf.mxu1 }
 0x311   : > { %v4923_v41 = vpop.f32.mrf.mxu0 }
 0x312   : > { %v4865_v3 = vpop.f32.mrf.mxu1 }
 0x313   : > { %v4924_v13 = vpop.f32.mrf.mxu0 }
 0x314   : > { %v4866_v16 = vpop.f32.mrf.mxu1 }
 0x315   : > { %v4926_v20 = vpop.f32.mrf.mxu0 }
 0x316   : > { %v4868_v18 = vpop.f32.mrf.mxu1 }
 0x317   : > { %v4927_v17 = vpop.f32.mrf.mxu0 }
 0x318   : > { %v4869_v19 = vpop.f32.mrf.mxu1 }
 0x319   : > { %v4929_v2 = vpop.f32.mrf.mxu0 }
 0x31a   : > { %v4871_v22 = vpop.f32.mrf.mxu1 }
 0x31b   : > { %v4930_v4 = vpop.f32.mrf.mxu0 }
 0x31c   : > { %v4872_v25 = vpop.f32.mrf.mxu1 }
 0x31d   : > { %v4932_v24 = vpop.f32.mrf.mxu0 }
 0x31e   : > { %v4874_v33 = vpop.f32.mrf.mxu1 }
 0x31f   : > { %v4933_v31 = vpop.f32.mrf.mxu0 }
 0x320   : > { %v4875_v37 = vpop.f32.mrf.mxu1 }
 0x321   : > { %v6399_v36 = vpop.f32.mrf.mxu0 }
 0x322   : > { %v6403_v27 = vpop.f32.mrf.mxu1 }
 0x323   : > { %v6401_v38 = vpop.f32.mrf.mxu0  ;;  %6739 = vst [vmem:[#allocation39_spill] sm:$0xff] %v6403_v27  ;;  %v4867_v27 = vadd.f32 %v4866_v16, %v4865_v3 }
 0x324   : > { %v6407_v43 = vpop.f32.mrf.mxu1 }
 0x325   : > { %v6405_v40 = vpop.f32.mrf.mxu0  ;;  %6741 = vst [vmem:[#allocation41_spill] sm:$0xff] %v6407_v43 }
 0x326   : > { %6740 = vst [vmem:[#allocation40_spill] sm:$0xff] %v6405_v40  ;;  %v6411_v30 = vpop.f32.mrf.mxu1 }
 0x327   : > { %v6409_v46 = vpop.f32.mrf.mxu0  ;;  %6743 = vst [vmem:[#allocation43_spill] sm:$0xff] %v6411_v30  ;;  %v4855_v30 = vadd.f32 %v4854_v1, %v4853_v63  ;;  %v4916_v63 = vadd.f32 %v6393_v48, %v6391_v0  ;;  %v4934_v0 = vadd.f32 %v4933_v31, %v4932_v24  ;;  %v4873_v48 = vadd.f32 %v4872_v25, %v4871_v22 }
 0x328   : > { %6742 = vst [vmem:[#allocation42_spill] sm:$0xff] %v6409_v46  ;;  %v6415_v49 = vpop.f32.mrf.mxu1 }
 0x329   : > { %v6413_v47 = vpop.f32.mrf.mxu0  ;;  %6745 = vst [vmem:[#allocation45_spill] sm:$0xff] %v6415_v49  ;;  %v3566_v1 = vadd.f32 %v4855_v30, %v6341_v10  ;;  %v3870_v30 = vld [vmem:[%s6059_s22 + $0x18] sm:$0xff] }
 0x32a   : > { %6744 = vst [vmem:[#allocation44_spill] sm:$0xff] %v6413_v47  ;;  %v6419_v54 = vpop.f32.mrf.mxu1  ;;  %v6757_v22 = vld [vmem:[#allocation39_spill] sm:$0xff] }
 0x32b   : > { %v6417_v23 = vpop.f32.mrf.mxu0  ;;  %6747 = vst [vmem:[#allocation47_spill] sm:$0xff] %v6419_v54 }
 0x32c   : > { %6746 = vst [vmem:[#allocation46_spill] sm:$0xff] %v6417_v23  ;;  %v6423_v42 = vpop.f32.mrf.mxu1  ;;  %v4858_v23 = vadd.f32 %v4857_v28, %v4856_v6  ;;  %v4830_v6 = vadd.f32 %v6383_v56, %v6381_v53  ;;  %v4870_v28 = vadd.f32 %v4869_v19, %v4868_v18  ;;  %v4925_v56 = vadd.f32 %v4924_v13, %v4923_v41  ;;  %v6758_v24 = vld [vmem:[#allocation41_spill] sm:$0xff] }
 0x32d   : > { %v6421_v51 = vpop.f32.mrf.mxu0  ;;  %6749 = vst [vmem:[#allocation49_spill] sm:$0xff] %v6423_v42  ;;  %v4852_v42 = vadd.f32 %v4851_v34, %v4850_v59  ;;  %v3428_v59 = vadd.f32 %v6385_v57, %v6335_v58  ;;  %v4928_v57 = vadd.f32 %v4927_v17, %v4926_v20  ;;  %v4937_v13 = vadd.f32 %v6401_v38, %v6399_v36 }
 0x32e   : > { %6748 = vst [vmem:[#allocation48_spill] sm:$0xff] %v6421_v51  ;;  %v6427_v32 = vpop.f32.mrf.mxu1  ;;  %v3587_v10 = vadd.f32 %v4870_v28, %v6356_v52  ;;  %v4879_v25 = vadd.f32 %v6758_v24, %v6757_v22  ;;  %v6759_v31 = vld [vmem:[#allocation43_spill] sm:$0xff]  ;;  %v3871_v24 = vld [vmem:[%s6059_s22 + $0x20] sm:$0xff] }
 0x32f   : > { %v6425_v5 = vpop.f32.mrf.mxu0  ;;  %6751 = vst [vmem:[#allocation51_spill] sm:$0xff] %v6427_v32  ;;  %v3571_v32 = vadd.f32 %v4858_v23, %v6344_v15  ;;  %v4833_v15 = vadd.f32 %v6389_v62, %v6387_v61  ;;  %v3563_v34 = vadd.f32 %v4852_v42, %v6338_v7  ;;  %v3582_v61 = vadd.f32 %v4867_v27, %v6353_v44  ;;  %v6761_v23 = vld [vmem:[#allocation40_spill] sm:$0xff] }
 0x330   : > { %6750 = vst [vmem:[#allocation50_spill] sm:$0xff] %v6425_v5  ;;  %v6431_v46 = vpop.f32.mrf.mxu1  ;;  %v4861_v5 = vadd.f32 %v4860_v55, %v4859_v45  ;;  %v4931_v42 = vadd.f32 %v4930_v4, %v4929_v2  ;;  %v3684_v20 = vadd.f32 %v4934_v0, %v3587_v10  ;;  %v3867_v2 = vld [vmem:[%s6059_s22] sm:$0xff] }
 0x331   : > { %v6429_v14 = vpop.f32.mrf.mxu0  ;;  %6753 = vst [vmem:[#allocation53_spill] sm:$0xff] %v6431_v46  ;;  %v4864_v46 = vadd.f32 %v4863_v60, %v4862_v12  ;;  %v3590_v60 = vadd.f32 %v4873_v48, %v6359_v39  ;;  %v6760_v39 = vld [vmem:[#allocation45_spill] sm:$0xff] }
 0x332   : > { %6752 = vst [vmem:[#allocation52_spill] sm:$0xff] %v6429_v14  ;;  %v6435_v47 = vpop.f32.mrf.mxu1  ;;  %v4922_v14 = vadd.f32 %v4921_v29, %v4920_v26  ;;  %v3574_v53 = vadd.f32 %v4861_v5, %v6347_v21  ;;  %v3660_v5 = vadd.f32 %v4916_v63, %v3563_v34  ;;  %v6474_v26 = vadd.f32 %v4833_v15, %v3428_v59  ;;  %v6763_v28 = vld [vmem:[#allocation47_spill] sm:$0xff] }
 0x333   : > { %v6433_v40 = vpop.f32.mrf.mxu0  ;;  %6755 = vst [vmem:[#allocation55_spill] sm:$0xff] %v6435_v47  ;;  %v3679_v16 = vadd.f32 %v4931_v42, %v3582_v61 }
 0x334   : > { %6754 = vst [vmem:[#allocation54_spill] sm:$0xff] %v6433_v40  ;;  %v6437_v49 = vpop.f32.mrf.mxu1  ;;  %v3668_v7 = vadd.f32 %v4922_v14, %v3571_v32  ;;  %v3671_v29 = vadd.f32 %v4925_v56, %v3574_v53  ;;  %v3869_v32 = vld [vmem:[%s6059_s22 + $0x10] sm:$0xff]  ;;  %v6764_v59 = vld [vmem:[#allocation49_spill] sm:$0xff]  ;;  %v3868_v56 = vld [vmem:[%s6059_s22 + $0x8] sm:$0xff] }
 0x335   : > { %6756 = vst [vmem:[#allocation56_spill] sm:$0xff] %v6437_v49  ;;  %v6439_v54 = vpop.f32.mrf.mxu0  ;;  %v3425_v49 = vadd.f32 %v6377_v50, %v6335_v58  ;;  %v4919_v50 = vadd.f32 %v6397_v11, %v6395_v8  ;;  %v3579_v58 = vadd.f32 %v4864_v46, %v6350_v35  ;;  %v4876_v35 = vadd.f32 %v4875_v37, %v4874_v33  ;;  %v6767_v10 = vld [vmem:[#allocation48_spill] sm:$0xff] }
 0x336   : > { %v6441_v51 = vpop.f32.mrf.mxu1  ;;  %v4882_v33 = vadd.f32 %v6760_v39, %v6759_v31  ;;  %v4885_v15 = vadd.f32 %v6764_v59, %v6763_v28 }
 0x337   : > { %v6446_v40 = vpop.f32.mrf.mxu0  ;;  %v6472_v11 = vadd.f32 %v4830_v6, %v3425_v49  ;;  %v3663_v44 = vadd.f32 %v4919_v50, %v3566_v1  ;;  %v3676_v41 = vadd.f32 %v4928_v57, %v3579_v58  ;;  %v3595_v4 = vadd.f32 %v4876_v35, %v6362_v9  ;;  %v6762_v6 = vld [vmem:[#allocation42_spill] sm:$0xff] }
 0x338   : > { %v6443_v43 = vpop.f32.mrf.mxu1  ;;  %v4940_v9 = vadd.f32 %v6762_v6, %v6761_v23  ;;  %v3687_v1 = vadd.f32 %v4937_v13, %v3590_v60  ;;  %v6765_v57 = vld [vmem:[#allocation34_spill] sm:$0xff]  ;;  %v6771_v60 = vld [vmem:[#allocation36_spill] sm:$0xff]  ;;  %v6774_v23 = vld [vmem:[#allocation51_spill] sm:$0xff] }
 0x339   : > { %v6469_v62 = vpop.f32.mrf.mxu0  ;;  %v3598_v61 = vadd.f32 %v4879_v25, %v6765_v57  ;;  %v6768_v0 = vld [vmem:[#allocation50_spill] sm:$0xff]  ;;  %v3606_v13 = vadd.f32 %v4885_v15, %v6771_v60  ;;  %v6775_v6 = vld [vmem:[#allocation53_spill] sm:$0xff] }
 0x33a   : > { %v6452_v47 = vpop.f32.mrf.mxu1  ;;  %v4946_v48 = vadd.f32 %v6768_v0, %v6767_v10  ;;  %v4888_v28 = vadd.f32 %v6775_v6, %v6774_v23  ;;  %v6776_v10 = vld [vmem:[#allocation37_spill] sm:$0xff]  ;;  %v3879_v23 = vld [vmem:[%s6059_s22 + $0x60] sm:$0xff] }
 0x33b   : > { %v6476_v12 = vpop.f32.mrf.mxu0  ;;  %v3878_v60 = vld [vmem:[%s6059_s22 + $0x58] sm:$0xff] }
 0x33c   : > { %v6465_v45 = vpop.f32.mrf.mxu1  ;;  %v3611_v0 = vadd.f32 %v4888_v28, %v6776_v10 }
 0x33d   : > { %v6488_v38 = vpop.f32.mrf.mxu0 }
 0x33e   : > { %v5032_v8 = vpop.f32.mrf.mxu1 }
 0x33f   : > { %v3765_v21 = vadd.f32 %v5032_v8, %v3668_v7  ;;  %v6766_v7 = vld [vmem:[#allocation35_spill] sm:$0xff] }
 0x340   : > { %v3756_v55 = vpop.f32.mrf.mxu1  ;;  %v3603_v42 = vadd.f32 %v4882_v33, %v6766_v7  ;;  %v3877_v7 = vld [vmem:[%s6059_s22 + $0x50] sm:$0xff] }
 0x341   : > { %vm3821_vm4 = vcmp.gt.f32.partialorder %v3765_v21, 0.0  ;;  %v3837_v14 = vmul.f32 0.1, %v3765_v21  ;;  %v3757_v52 = vadd.f32 %v3756_v55, %v3660_v5  ;;  %v4957_v5 = vpop.f32.mrf.mxu0 }
 0x342   : > { %v5033_v3 = vpop.f32.mrf.mxu1  ;;  %v3700_v33 = vadd.f32 %v4946_v48, %v3603_v42  ;;  %v6778_v48 = vld [vmem:[#allocation56_spill] sm:$0xff] }
 0x343   : > { %v3853_v17 = vsel %vm3821_vm4, %v3765_v21, %v3837_v14  ;;  %vm3819_vm5 = vcmp.gt.f32.partialorder %v3757_v52, 0.0  ;;  %v3835_v18 = vmul.f32 0.1, %v3757_v52  ;;  %v3768_v19 = vadd.f32 %v5033_v3, %v3671_v29  ;;  %v3873_v29 = vld [vmem:[%s6059_s22 + $0x30] sm:$0xff] }
 0x344   : > { %v3885_v37 = vadd.f32 %v3869_v32, %v3853_v17  ;;  %v3759_v36 = vpop.f32.mrf.mxu1  ;;  %v6769_v14 = vld [vmem:[#allocation44_spill] sm:$0xff]  ;;  %v6770_v32 = vld [vmem:[#allocation46_spill] sm:$0xff] }
 0x345   : > { %v3851_v27 = vsel %vm3819_vm5, %v3757_v52, %v3835_v18  ;;  %vm3822_vm6 = vcmp.gt.f32.partialorder %v3768_v19, 0.0  ;;  %v3838_v46 = vmul.f32 0.1, %v3768_v19  ;;  %v3760_v49 = vadd.f32 %v3759_v36, %v3663_v44  ;;  %v6772_v3 = vld [vmem:[#allocation52_spill] sm:$0xff]  ;;  %v4959_v36 = vpop.f32.mrf.mxu0 }
 0x346   : > { %3901 = vst [vmem:[%s6130_s11 + $0x10] sm:$0xff] %v3885_v37  ;;  %v3883_v34 = vadd.f32 %v3867_v2, %v3851_v27  ;;  %v5036_v63 = vpop.f32.mrf.mxu1  ;;  %v4943_v52 = vadd.f32 %v6770_v32, %v6769_v14  ;;  %v3692_v37 = vadd.f32 %v4940_v9, %v3595_v4  ;;  %v3872_v9 = vld [vmem:[%s6059_s22 + $0x28] sm:$0xff] }
 0x347   : > { %v3854_v50 = vsel %vm3822_vm6, %v3768_v19, %v3838_v46  ;;  %vm3820_vm7 = vcmp.gt.f32.partialorder %v3760_v49, 0.0  ;;  %v3836_v53 = vmul.f32 0.1, %v3760_v49  ;;  %v3781_v58 = vadd.f32 %v5036_v63, %v3684_v20  ;;  %v6773_v20 = vld [vmem:[#allocation54_spill] sm:$0xff] }
 0x348   : > { %3899 = vst [vmem:[%s6130_s11] sm:$0xff] %v3883_v34  ;;  %v3886_v8 = vadd.f32 %v3870_v30, %v3854_v50  ;;  %v3772_v21 = vpop.f32.mrf.mxu1  ;;  %v4949_v17 = vadd.f32 %v6773_v20, %v6772_v3  ;;  %v3874_v30 = vld [vmem:[%s6059_s22 + $0x38] sm:$0xff]  ;;  %v4958_v50 = vadd.f32 %v4957_v5, %v6488_v38  ;;  %v6777_v38 = vld [vmem:[#allocation55_spill] sm:$0xff]  ;;  %v6779_v3 = vld [vmem:[#allocation38_spill] sm:$0xff] }
 0x349   : > { %v3852_v35 = vsel %vm3820_vm7, %v3760_v49, %v3836_v53  ;;  %vm3825_vm8 = vcmp.gt.f32.partialorder %v3781_v58, 0.0  ;;  %v3841_v55 = vmul.f32 0.1, %v3781_v58  ;;  %v3773_v44 = vadd.f32 %v3772_v21, %v3676_v41 }
 0x34a   : > { %3902 = vst [vmem:[%s6130_s11 + $0x18] sm:$0xff] %v3886_v8  ;;  %v3884_v18 = vadd.f32 %v3868_v56, %v3852_v35  ;;  %v5037_v2 = vpop.f32.mrf.mxu1  ;;  %v4894_v41 = vadd.f32 %v6443_v43, %v6441_v51  ;;  %v3703_v51 = vadd.f32 %v4949_v17, %v3606_v13  ;;  %v3695_v43 = vadd.f32 %v4943_v52, %v3598_v61  ;;  %v3875_v35 = vld [vmem:[%s6059_s22 + $0x40] sm:$0xff] }
 0x34b   : > { %v3857_v19 = vsel %vm3825_vm8, %v3781_v58, %v3841_v55  ;;  %vm3823_vm9 = vcmp.gt.f32.partialorder %v3773_v44, 0.0  ;;  %v3839_v22 = vmul.f32 0.1, %v3773_v44  ;;  %v3784_v25 = vadd.f32 %v5037_v2, %v3687_v1  ;;  %v4960_v58 = vpop.f32.mrf.mxu0 }
 0x34c   : > { %3900 = vst [vmem:[%s6130_s11 + $0x8] sm:$0xff] %v3884_v18  ;;  %v3889_v31 = vadd.f32 %v3873_v29, %v3857_v19  ;;  %v3775_v39 = vpop.f32.mrf.mxu1  ;;  %v3619_v1 = vadd.f32 %v4894_v41, %v6472_v11  ;;  %v4952_v11 = vadd.f32 %v6446_v40, %v6439_v54  ;;  %v4891_v8 = vadd.f32 %v6778_v48, %v6777_v38 }
 0x34d   : > { %v3855_v27 = vsel %vm3823_vm9, %v3773_v44, %v3839_v22  ;;  %vm3826_vm10 = vcmp.gt.f32.partialorder %v3784_v25, 0.0  ;;  %v3842_v46 = vmul.f32 0.1, %v3784_v25  ;;  %v3776_v49 = vadd.f32 %v3775_v39, %v3679_v16 }
 0x34e   : > { %3905 = vst [vmem:[%s6130_s11 + $0x30] sm:$0xff] %v3889_v31  ;;  %v3887_v59 = vadd.f32 %v3871_v24, %v3855_v27  ;;  %v5040_v15 = vpop.f32.mrf.mxu1  ;;  %v4897_v16 = vadd.f32 %v6465_v45, %v6452_v47  ;;  %v4961_v44 = vadd.f32 %v4960_v58, %v4959_v36  ;;  %v3716_v40 = vadd.f32 %v4958_v50, %v3619_v1  ;;  %v3876_v24 = vld [vmem:[%s6059_s22 + $0x48] sm:$0xff] }
 0x34f   : > { %v3858_v34 = vsel %vm3826_vm10, %v3784_v25, %v3842_v46  ;;  %vm3824_vm11 = vcmp.gt.f32.partialorder %v3776_v49, 0.0  ;;  %v3840_v4 = vmul.f32 0.1, %v3776_v49  ;;  %v3797_v63 = vadd.f32 %v5040_v15, %v3700_v33  ;;  %v3880_v1 = vld [vmem:[%s6059_s22 + $0x68] sm:$0xff] }
 0x350   : > { %3903 = vst [vmem:[%s6130_s11 + $0x20] sm:$0xff] %v3887_v59  ;;  %v3890_v53 = vadd.f32 %v3874_v30, %v3858_v34  ;;  %v3788_v56 = vpop.f32.mrf.mxu1  ;;  %v3622_v29 = vadd.f32 %v4897_v16, %v6474_v26  ;;  %v3614_v20 = vadd.f32 %v4891_v8, %v6779_v3  ;;  %v4955_v17 = vadd.f32 %v6476_v12, %v6469_v62  ;;  %v3881_v12 = vld [vmem:[%s6059_s22 + $0x70] sm:$0xff] }
 0x351   : > { %v3856_v57 = vsel %vm3824_vm11, %v3776_v49, %v3840_v4  ;;  %vm3829_vm12 = vcmp.gt.f32.partialorder %v3797_v63, 0.0  ;;  %v3845_v61 = vmul.f32 0.1, %v3797_v63  ;;  %v3789_v42 = vadd.f32 %v3788_v56, %v3692_v37 }
 0x352   : > { %3906 = vst [vmem:[%s6130_s11 + $0x38] sm:$0xff] %v3890_v53  ;;  %v3888_v47 = vadd.f32 %v3872_v9, %v3856_v57  ;;  %v5041_v45 = vpop.f32.mrf.mxu1  ;;  %v3708_v2 = vadd.f32 %v4952_v11, %v3611_v0  ;;  %v3719_v39 = vadd.f32 %v4961_v44, %v3622_v29  ;;  %v3711_v46 = vadd.f32 %v4955_v17, %v3614_v20 }
 0x353   : > { %v3861_v21 = vsel %vm3829_vm12, %v3797_v63, %v3845_v61  ;;  %vm3827_vm13 = vcmp.gt.f32.partialorder %v3789_v42, 0.0  ;;  %v3843_v5 = vmul.f32 0.1, %v3789_v42  ;;  %v3800_v55 = vadd.f32 %v5041_v45, %v3703_v51 }
 0x354   : > { %3904 = vst [vmem:[%s6130_s11 + $0x28] sm:$0xff] %v3888_v47  ;;  %v3893_v14 = vadd.f32 %v3877_v7, %v3861_v21  ;;  %v3791_v32 = vpop.f32.mrf.mxu1 }
 0x355   : > { %v3859_v54 = vsel %vm3827_vm13, %v3789_v42, %v3843_v5  ;;  %vm3830_vm14 = vcmp.gt.f32.partialorder %v3800_v55, 0.0  ;;  %v3846_v52 = vmul.f32 0.1, %v3800_v55  ;;  %v3792_v13 = vadd.f32 %v3791_v32, %v3695_v43  ;;  %v3882_v43 = vld [vmem:[%s6059_s22 + $0x78] sm:$0xff]  ;;  %s5710_s22 = smov [#allocation14]  }
 0x356   : > { %3909 = vst [vmem:[%s6130_s11 + $0x50] sm:$0xff] %v3893_v14  ;;  %v3891_v26 = vadd.f32 %v3875_v35, %v3859_v54  ;;  %v5044_v18 = vpop.f32.mrf.mxu1  ;;  %s5545_s1 = sshll.u32 %s5710_s22, 4  ;;  %s5546_s1 = int_to_ptr.vmem [resolvable:$false] %s5545_s1 }
 0x357   : > { %v3862_v19 = vsel %vm3830_vm14, %v3800_v55, %v3846_v52  ;;  %vm3828_vm15 = vcmp.gt.f32.partialorder %v3792_v13, 0.0  ;;  %v3844_v22 = vmul.f32 0.1, %v3792_v13  ;;  %v3813_v25 = vadd.f32 %v5044_v18, %v3716_v40  ;;  %s5547_s17 = scalar_lea.vmem %s5546_s1, 4096  ;;  %p5548_p12 = scmp.lt.s32.totalorder %s6551_s23, %s5546_s1 }
 0x358   : > { %3907 = vst [vmem:[%s6130_s11 + $0x40] sm:$0xff] %v3891_v26  ;;  %v3894_v41 = vadd.f32 %v3878_v60, %v3862_v19  ;;  %v3804_v31 = vpop.f32.mrf.mxu1  ;;  %p5549_p11 = scmp.lt.s32.totalorder %s5547_s17, %s5541_s3 }
 0x359   : > { %v3860_v33 = vsel %vm3828_vm15, %v3792_v13, %v3844_v22  ;;  %vm3833_vm0 = vcmp.gt.f32.partialorder %v3813_v25, 0.0  ;;  %v3849_v62 = vmul.f32 0.1, %v3813_v25  ;;  %v3805_v37 = vadd.f32 %v3804_v31, %v3708_v2 }
 0x35a   : > { %3910 = vst [vmem:[%s6130_s11 + $0x58] sm:$0xff] %v3894_v41  ;;  %v3892_v36 = vadd.f32 %v3876_v24, %v3860_v33  ;;  %v5045_v27 = vpop.f32.mrf.mxu1  ;;  %p5550_p7 = por %p5549_p11, %p5548_p12 }
 0x35b   : > { %v3865_v30 = vsel %vm3833_vm0, %v3813_v25, %v3849_v62  ;;  %vm3831_vm1 = vcmp.gt.f32.partialorder %v3805_v37, 0.0  ;;  %v3847_v49 = vmul.f32 0.1, %v3805_v37  ;;  %v3816_v6 = vadd.f32 %v5045_v27, %v3719_v39 }
 0x35c   : > { %3908 = vst [vmem:[%s6130_s11 + $0x48] sm:$0xff] %v3892_v36  ;;  %v3897_v28 = vadd.f32 %v3881_v12, %v3865_v30  ;;  %v3807_v59 = vpop.f32.mrf.mxu1  ;;  %p5551_p3 = pnand %p5550_p7, %p5544_p1 }
 0x35d   : > { %v3863_v15 = vsel %vm3831_vm1, %v3805_v37, %v3847_v49  ;;  %vm3834_vm2 = vcmp.gt.f32.partialorder %v3816_v6, 0.0  ;;  %v3850_v51 = vmul.f32 0.1, %v3816_v6  ;;  %v3808_v34 = vadd.f32 %v3807_v59, %v3711_v46 }
 0x35e   : > { %3913 = vst [vmem:[%s6130_s11 + $0x70] sm:$0xff] %v3897_v28  ;;  %v3895_v4 = vadd.f32 %v3879_v23, %v3863_v15 }
 0x35f   : > { %v3866_v9 = vsel %vm3834_vm2, %v3816_v6, %v3850_v51  ;;  %vm3832_vm3 = vcmp.gt.f32.partialorder %v3808_v34, 0.0  ;;  %v3848_v63 = vmul.f32 0.1, %v3808_v34 }
 0x360   : > { %3911 = vst [vmem:[%s6130_s11 + $0x60] sm:$0xff] %v3895_v4  ;;  %v3898_v50 = vadd.f32 %v3882_v43, %v3866_v9 }
 0x361   : > { %v3864_v16 = vsel %vm3832_vm3, %v3808_v34, %v3848_v63 }
 0x362   : > { %3914 = vst [vmem:[%s6130_s11 + $0x78] sm:$0xff] %v3898_v50  ;;  %v3896_v53 = vadd.f32 %v3880_v1, %v3864_v16 }
 0x364   : > { %3912 = vst [vmem:[%s6130_s11 + $0x68] sm:$0xff] %v3896_v53 }
 0x365   : > { %5554 = shalt.err (!%p5551_p3)
}
 0x366   : > { %s5555_s11 = scalar_lea.hbm %s6557_s27, 2048  ;;  %s5559_s16 = scalar_lea.hbm %s6783_s15, 8192 }
 0x367   : > { %p5556_p10 = scmp.ne.s32.totalorder %s6557_s27, %s5555_s11  ;;  %p5560_p0 = scmp.lt.s32.totalorder %s6557_s27, %s6783_s15 }
 0x368   : > { %p5561_p8 = scmp.lt.s32.totalorder %s5559_s16, %s5555_s11 }
 0x369   : > { %p5557_p4 = pnand %p5556_p10, %p6784_p2 }
 0x36a   : > { %p5562_p6 = por %p5561_p8, %p5560_p0 }
 0x36b   : > { %p5558_p5 = pneg %p5557_p4 }
 0x36d   : > { %p5563_p9 = pnand %p5562_p6, %p5558_p5 }
 0x36f   : > { %5566 = shalt.err (!%p5563_p9)
}
 0x370   : > { %s5711_s2 = smov 128   ;;  %s5712_s6 = smov 8  }
 0x371   : > { %5060 = dma.vmem_to_hbm [thread:$0]  (%p6784_p2), %s6551_s23, 2048, %s6557_s27, %s3916_s13, %s5711_s2, %s5711_s2, %s5712_s6  }
 0x372 PF: > { %p5088_p13 = scmp.ge.s32.totalorder %s5697_s14, 2  ;;  %s3946_s20 = sand.u32 1, %s5669_s30  }
 0x373   : > { %p6785_p1 = scmp.ne.s32.totalorder %s6704_s24, 0  ;;  %s3947_s7 = scalar_lea.sflag [#allocation7], %s3946_s20 }
 0x375   : > { %p5080_p12 = pnand %p5088_p13, %p6785_p1 }
 0x377   : > { %p5081_p11 = pneg %p5080_p12 }
 0x379   : > { %5640 = dma.done.wait (%p5081_p11), %s3947_s7, 2048  }
 0x37a   : > { %5642 = vsyncadd (%p5081_p11), %s3947_s7, 4294965248  ;;  %s27_s14 = sadd.s32 1, %s5697_s14   ;;  %s6787_s24 = sld [smem:[#allocation21_spill]] }
 0x37b   : > { %p6588_p7 = scmp.ge.s32.totalorder %s27_s14, 6   ;;  %s6788_s25 = sld [smem:[#allocation22_spill]] }
 0x37c   : > { %s6789_s27 = sld [smem:[#allocation23_spill]]  ;;  %s6796_s26 = smov %s6818_s21 }
 0x37d   : > { %s6790_s4 = sld [smem:[#allocation33_spill]]  ;;  %s6797_s28 = smov %s5665_s29 }
 0x37e   : > { %s6791_s23 = sld [smem:[#allocation26_spill]]  ;;  %s6799_s30 = smov %s5673_s8 }
 0x37f   : > { %s6792_s11 = sld [smem:[#allocation27_spill]]  ;;  %s6800_s8 = smov %s5677_s9 }
 0x380   : > { %s6793_s12 = sld [smem:[#allocation29_spill]]  ;;  %s6801_s9 = smov %s5955_s18 }
 0x381   : > { %s6794_s13 = sld [smem:[#allocation30_spill]]  ;;  %26 = sbr.rel (!%p6588_p7) target bundleno = 22 (0x16), region = 133 }
 0x383   : > { %s6798_s29 = smov %s6790_s4 }
 0x384   : > { %s6802_s10 = smov %s6791_s23 }
 0x386   :  { %3952 = vsyncpa [#allocation6], 1 }
 0x387   :  { %3954 = vsyncpa [#allocation6 + $0x1], 1 }
 0x388   :  { %3955 = vsyncpa [#allocation9], 1 }
 0x389   :  { %3957 = vsyncpa [#allocation9 + $0x1], 1 }
 0x38a   :  { %3958 = vsyncpa [#allocation12], 1 }
 0x38b   :  { %3959 = vsyncpa [#allocation7], 1 }
 0x38c   :  { %3961 = vsyncpa [#allocation7 + $0x1], 1 }

</bundles_post_ra>
